<compile_context>
chip_gen: v6e
topology: v6e:2x2x1
jax: 0.10.0
libtpu: 0.0.40
codegen_flags: <defaults>
</compile_context>

<pallas_src>
import functools

import jax
import jax.numpy as jnp
import numpy as np
from jax.experimental import pallas as pl
from jax.experimental.pallas import tpu as pltpu

EPS = 1e-5  # PyTorch BatchNorm2d default eps


def _bottleneck_kernel(x_ref, w1_ref, b1_ref, w2_ref, b2_ref,
                       w3_ref, b3_ref, ws_ref, bs_ref,
                       o_ref, pad_ref, col_ref, *, stride, has_proj, bo, hi):
    """One (image, row-band) grid step.

    x_ref   : (1, H, W, cin)    bf16 full image (block constant across bands)
    pad_ref : (hi+2, W+2, Cpad) bf16 scratch -- zero-padded conv1 output band
    col_ref : (bo*Wo, 9*Cpad)   bf16 scratch -- lane-aligned im2col staging
    o_ref   : (1, bo, Wo, C4)   f32 output band
    """
    _, H, W, cin = x_ref.shape
    Cpad = w1_ref.shape[1]
    C4 = w3_ref.shape[1]
    Wo = (W - 1) // stride + 1
    band = pl.program_id(1)
    r0 = band * hi                       # first interior input row of this band

    w1 = w1_ref[...]
    b1 = b1_ref[...]

    def conv1(rows2d):                   # (m, cin) bf16 -> (m, Cpad) bf16
        y = jnp.dot(rows2d, w1, preferred_element_type=jnp.float32)
        return jnp.maximum(y + b1, 0.0).astype(jnp.bfloat16)

    # ---- conv1 (1x1, BN scale folded into the weight) -----------------------
    # ALL of pad_ref is rewritten on every grid step (interior + border
    # strips): scratch is private per TensorCore, so a program_id()==0 guard
    # would leave stale VMEM garbage on the second core under megacore.
    pad_ref[:, 0:1, :] = jnp.zeros((hi + 2, 1, Cpad), jnp.bfloat16)
    pad_ref[:, W + 1:W + 2, :] = jnp.zeros((hi + 2, 1, Cpad), jnp.bfloat16)

    x_band = x_ref[0, pl.ds(r0, hi), :, :]                       # (hi, W, cin)
    pad_ref[1:hi + 1, 1:W + 1, :] = conv1(
        x_band.reshape(hi * W, cin)).reshape(hi, W, Cpad)

    # 1-row halos: conv1 of the neighbouring input row, zero at image borders.
    r_top = jnp.maximum(r0 - 1, 0)
    top = conv1(x_ref[0, pl.ds(r_top, 1), :, :].reshape(W, cin))
    top = jnp.where(band > 0, top, jnp.zeros_like(top))
    pad_ref[0:1, 1:W + 1, :] = top.reshape(1, W, Cpad)

    r_bot = r0 + hi
    bot = conv1(x_ref[0, pl.ds(jnp.minimum(r_bot, H - 1), 1), :, :]
                .reshape(W, cin))
    bot = jnp.where(r_bot < H, bot, jnp.zeros_like(bot))
    pad_ref[hi + 1:hi + 2, 1:W + 1, :] = bot.reshape(1, W, Cpad)

    # ---- conv2: 3x3 / stride / pad=1 as ONE im2col matmul (K = 9*Cpad) ------
    # Tap pitch Cpad is a multiple of 128 -> every staging store is a
    # lane-aligned, full-width vst.
    for dh in range(3):
        for dw in range(3):
            t = dh * 3 + dw
            if stride == 1:
                patch = pad_ref[dh:dh + bo, dw:dw + Wo, :]
            else:
                patch = pad_ref[pl.ds(dh, bo, stride=stride),
                                pl.ds(dw, Wo, stride=stride), :]
            col_ref[:, t * Cpad:(t + 1) * Cpad] = patch.reshape(bo * Wo, Cpad)

    y2 = jnp.dot(col_ref[...], w2_ref[...],
                 preferred_element_type=jnp.float32)
    y2 = jnp.maximum(y2 + b2_ref[...], 0.0).astype(jnp.bfloat16)

    # ---- conv3: 1x1 (final ReLU applied after the shortcut add) -------------
    y3 = jnp.dot(y2, w3_ref[...], preferred_element_type=jnp.float32)
    y3 = y3 + b3_ref[...]

    # ---- shortcut ------------------------------------------------------------
    if has_proj:
        if stride == 1:
            xs = x_ref[0, pl.ds(r0, bo), :, :]
        else:
            xs = x_ref[0, pl.ds(r0, bo, stride=stride),
                       pl.ds(0, Wo, stride=stride), :]
        sc = jnp.dot(xs.reshape(bo * Wo, cin), ws_ref[...],
                     preferred_element_type=jnp.float32) + bs_ref[...]
    else:
        xs = x_ref[0, pl.ds(r0, bo), :, :]        # identity (stride==1, cin==C4)
        sc = xs.reshape(bo * Wo, C4).astype(jnp.float32)

    o_ref[0] = (jnp.maximum(y3 + sc, 0.0)
                .reshape(bo, Wo, C4).astype(o_ref.dtype))


def bottleneck_block(x_nchw, params, *, stride=1):
    """Fused ResNet bottleneck block. Input/output are NCHW float32."""
    x = jnp.transpose(x_nchw, (0, 2, 3, 1)).astype(jnp.bfloat16)  # NCHW -> NHWC
    N, H, W, cin = x.shape
    C = params["w1"].shape[1]
    C4 = params["w3"].shape[1]
    has_proj = (stride != 1) or (cin != C4)
    Ho = (H - 1) // stride + 1
    Wo = (W - 1) // stride + 1
    Cpad = ((C + 127) // 128) * 128          # lane-aligned mid-channel pitch

    # Row bands: pipeline input DMA / output writeback with compute and keep
    # per-step scratch small (important for v7x's 64 MiB VMEM).
    if H % stride == 0:
        bo = next((b for b in (8, 4, 2) if Ho % b == 0), Ho)
        hi = bo * stride
    else:
        bo, hi = Ho, H                       # fallback: single band, whole image
    n_bands = Ho // bo

    # Host-side one-time fold of the BN scale into the conv weights (only the
    # bias add remains in-kernel); mid channels zero-padded to Cpad so every
    # im2col tap store is 128-lane aligned.  Weights/activations bf16 (what the
    # MXU consumes at default precision), accumulation stays f32.
    w1 = jnp.pad(params["w1"] * params["s1"], ((0, 0), (0, Cpad - C)))
    b1 = jnp.pad(params["b1"], ((0, 0), (0, Cpad - C)))
    w2 = params["w2"] * params["s2"].reshape(1, 1, 1, C)
    w2 = jnp.pad(w2, ((0, 0), (0, 0), (0, Cpad - C), (0, Cpad - C)))
    w2 = w2.reshape(9 * Cpad, Cpad)          # (dh, dw, ci) order == col layout
    b2 = jnp.pad(params["b2"], ((0, 0), (0, Cpad - C)))
    w3 = jnp.pad(params["w3"] * params["s3"], ((0, Cpad - C), (0, 0)))
    b3 = params["b3"]
    ws = params["ws"] * params["ss"]
    bs = params["bs"]
    weight_args = [w1.astype(jnp.bfloat16), b1,
                   w2.astype(jnp.bfloat16), b2,
                   w3.astype(jnp.bfloat16), b3,
                   ws.astype(jnp.bfloat16), bs]

    def full_spec(arr):
        nd = arr.ndim
        return pl.BlockSpec(arr.shape, lambda n, b, _nd=nd: (0,) * _nd)

    # Tight VMEM budget: double-buffered in/out blocks + resident weights +
    # scratch + headroom (v7x has only 64 MiB physical VMEM).
    elt = lambda a: int(np.prod(a.shape)) * a.dtype.itemsize
    scratch_bytes = ((hi + 2) * (W + 2) * Cpad + bo * Wo * 9 * Cpad) * 2
    vmem_limit = (2 * (H * W * cin * 2 + bo * Wo * C4 * 4
                       + sum(elt(a) for a in weight_args))
                  + scratch_bytes + (8 << 20))
    vmem_limit = int(max(16 << 20, min(vmem_limit, 44 << 20)))

    kernel = functools.partial(_bottleneck_kernel, stride=stride,
                               has_proj=has_proj, bo=bo, hi=hi)
    out_nhwc = pl.pallas_call(
        kernel,
        grid=(N, n_bands),
        in_specs=[pl.BlockSpec((1, H, W, cin), lambda n, b: (n, 0, 0, 0))]
                 + [full_spec(a) for a in weight_args],
        out_specs=pl.BlockSpec((1, bo, Wo, C4), lambda n, b: (n, b, 0, 0)),
        out_shape=jax.ShapeDtypeStruct((N, Ho, Wo, C4), jnp.float32),
        scratch_shapes=[
            pltpu.VMEM((hi + 2, W + 2, Cpad), jnp.bfloat16),   # padded conv1 band
            pltpu.VMEM((bo * Wo, 9 * Cpad), jnp.bfloat16),     # im2col staging
        ],
        compiler_params=pltpu.CompilerParams(
            dimension_semantics=("parallel", "parallel"),      # megacore on v7x
            vmem_limit_bytes=vmem_limit),
    )(x, *weight_args)
    return jnp.transpose(out_nhwc, (0, 3, 1, 2))               # NHWC -> NCHW


def init_params(key, cin, cout):
    """Deterministic synthetic params (conv weights + folded BN scale/bias)."""
    keys = iter(jax.random.split(key, 20))

    def conv_w(kk, ci, co, kh=1, kw=1):
        fan_in = ci * kh * kw
        w = jax.random.normal(kk, (kh, kw, ci, co), jnp.float32) / np.sqrt(fan_in)
        return w.reshape(ci, co) if (kh == 1 and kw == 1) else w

    def bn_fold(c):
        gamma = 1.0 + 0.1 * jax.random.normal(next(keys), (c,), jnp.float32)
        beta = 0.1 * jax.random.normal(next(keys), (c,), jnp.float32)
        mean = 0.1 * jax.random.normal(next(keys), (c,), jnp.float32)
        var = jnp.abs(jax.random.normal(next(keys), (c,), jnp.float32)) + 0.5
        scale = gamma / jnp.sqrt(var + EPS)
        bias = beta - mean * scale
        return scale.reshape(1, c), bias.reshape(1, c)

    p = {}
    p["w1"] = conv_w(next(keys), cin, cout)            # 1x1, cin -> cout
    p["s1"], p["b1"] = bn_fold(cout)
    p["w2"] = conv_w(next(keys), cout, cout, 3, 3)     # 3x3, cout -> cout
    p["s2"], p["b2"] = bn_fold(cout)
    p["w3"] = conv_w(next(keys), cout, 4 * cout)       # 1x1, cout -> 4*cout
    p["s3"], p["b3"] = bn_fold(4 * cout)
    p["ws"] = conv_w(next(keys), cin, 4 * cout)        # shortcut 1x1
    p["ss"], p["bs"] = bn_fold(4 * cout)
    return p


def reference(x_nchw, p, *, stride=1):
    """Pure-JAX reference (lax conv) with identical semantics."""
    x = jnp.transpose(x_nchw, (0, 2, 3, 1)).astype(jnp.float32)
    cin = x.shape[-1]
    C4 = p["w3"].shape[1]
    has_proj = (stride != 1) or (cin != C4)

    def conv(y, w, s, pad):
        if w.ndim == 2:
            w = w.reshape(1, 1, *w.shape)
        return jax.lax.conv_general_dilated(
            y, w, window_strides=(s, s), padding=pad,
            dimension_numbers=("NHWC", "HWIO", "NHWC"))

    def bn(y, s, b):
        return y * s.reshape(1, 1, 1, -1) + b.reshape(1, 1, 1, -1)

    y = jax.nn.relu(bn(conv(x, p["w1"], 1, "VALID"), p["s1"], p["b1"]))
    y = jax.nn.relu(bn(conv(y, p["w2"], stride, [(1, 1), (1, 1)]),
                       p["s2"], p["b2"]))
    y = bn(conv(y, p["w3"], 1, "VALID"), p["s3"], p["b3"])
    if has_proj:
        sc = bn(conv(x, p["ws"], stride, "VALID"), p["ss"], p["bs"])
    else:
        sc = x
    out = jax.nn.relu(y + sc)
    return jnp.transpose(out, (0, 3, 1, 2))


if __name__ == "__main__":
    key = jax.random.PRNGKey(0)
    k_x, k_p = jax.random.split(key)

    N, Cin, H, W = 2, 4, 16, 16
    Cout, stride = 4, 1                 # 4*Cout != Cin -> projection shortcut

    x = jax.random.normal(k_x, (N, Cin, H, W), jnp.float32)   # NCHW, as PyTorch
    params = init_params(k_p, Cin, Cout)

    out = bottleneck_block(x, params, stride=stride)
    out = jax.block_until_ready(out)

    ref = reference(x, params, stride=stride)
    # Kernel runs bf16 activations/weights with f32 accumulation; reference is
    # f32 with default (bf16-MXU) dot precision -> loose-ish tolerance.
    np.testing.assert_allclose(np.asarray(out), np.asarray(ref),
                               rtol=5e-2, atol=1e-1)
    print("KERNEL_OK")
</pallas_src>

<mosaic_0001>
module attributes {stable_mosaic.version = 11 : i64} {
  func.func @_bottleneck_kernel(%arg0: i32, %arg1: i32, %arg2: memref<1x16x16x4xbf16, #tpu.memory_space<vmem>>, %arg3: memref<4x128xbf16, #tpu.memory_space<vmem>>, %arg4: memref<1x128xf32, #tpu.memory_space<vmem>>, %arg5: memref<1152x128xbf16, #tpu.memory_space<vmem>>, %arg6: memref<1x128xf32, #tpu.memory_space<vmem>>, %arg7: memref<128x16xbf16, #tpu.memory_space<vmem>>, %arg8: memref<1x16xf32, #tpu.memory_space<vmem>>, %arg9: memref<4x16xbf16, #tpu.memory_space<vmem>>, %arg10: memref<1x16xf32, #tpu.memory_space<vmem>>, %arg11: memref<1x8x16x16xf32, #tpu.memory_space<vmem>>, %arg12: memref<10x18x128xbf16, #tpu.memory_space<vmem>>, %arg13: memref<128x1152xbf16, #tpu.memory_space<vmem>>) attributes {dimension_semantics = [#tpu.dimension_semantics<parallel>, #tpu.dimension_semantics<parallel>], iteration_bounds = array<i64: 2, 2>, scalar_prefetch = 0 : i64, scratch_operands = 2 : i64, tpu.core_type = #tpu.core_type<tc>, window_params = [{transform_indices = @transform_0, window_bounds = array<i64: 1, 16, 16, 4>}, {pipeline_mode = #tpu.pipeline_mode<synchronous>, transform_indices = @transform_1, window_bounds = array<i64: 4, 128>}, {pipeline_mode = #tpu.pipeline_mode<synchronous>, transform_indices = @transform_2, window_bounds = array<i64: 1, 128>}, {pipeline_mode = #tpu.pipeline_mode<synchronous>, transform_indices = @transform_3, window_bounds = array<i64: 1152, 128>}, {pipeline_mode = #tpu.pipeline_mode<synchronous>, transform_indices = @transform_4, window_bounds = array<i64: 1, 128>}, {pipeline_mode = #tpu.pipeline_mode<synchronous>, transform_indices = @transform_5, window_bounds = array<i64: 128, 16>}, {pipeline_mode = #tpu.pipeline_mode<synchronous>, transform_indices = @transform_6, window_bounds = array<i64: 1, 16>}, {pipeline_mode = #tpu.pipeline_mode<synchronous>, transform_indices = @transform_7, window_bounds = array<i64: 4, 16>}, {pipeline_mode = #tpu.pipeline_mode<synchronous>, transform_indices = @transform_8, window_bounds = array<i64: 1, 16>}, {transform_indices = @transform_9, window_bounds = array<i64: 1, 8, 16, 16>}]} {
    %c8_i32 = arith.constant 8 : i32
    %0 = arith.muli %arg1, %c8_i32 : i32
    %c0 = arith.constant 0 : index
    %c0_0 = arith.constant 0 : index
    %1 = vector.load %arg3[%c0, %c0_0] : memref<4x128xbf16, #tpu.memory_space<vmem>>, vector<4x128xbf16>
    %c0_1 = arith.constant 0 : index
    %c0_2 = arith.constant 0 : index
    %2 = vector.load %arg4[%c0_1, %c0_2] : memref<1x128xf32, #tpu.memory_space<vmem>>, vector<1x128xf32>
    %cst = arith.constant 0.000000e+00 : bf16
    %3 = vector.broadcast %cst : bf16 to vector<10x1x128xbf16>
    %c0_3 = arith.constant 0 : index
    %c0_4 = arith.constant 0 : index
    %c0_5 = arith.constant 0 : index
    %4 = vector.load %arg12[%c0_3, %c0_4, %c0_5] : memref<10x18x128xbf16, #tpu.memory_space<vmem>>, vector<10x1x128xbf16>
    tpu.vector_store %arg12[%c0_3, %c0_4, %c0_5], %3 {strides = array<i32>} : memref<10x18x128xbf16, #tpu.memory_space<vmem>>, vector<10x1x128xbf16>,
    %cst_6 = arith.constant 0.000000e+00 : bf16
    %5 = vector.broadcast %cst_6 : bf16 to vector<10x1x128xbf16>
    %c0_7 = arith.constant 0 : index
    %c17 = arith.constant 17 : index
    %c0_8 = arith.constant 0 : index
    %6 = vector.load %arg12[%c0_7, %c17, %c0_8] : memref<10x18x128xbf16, #tpu.memory_space<vmem>>, vector<10x1x128xbf16>
    tpu.vector_store %arg12[%c0_7, %c17, %c0_8], %5 {strides = array<i32>} : memref<10x18x128xbf16, #tpu.memory_space<vmem>>, vector<10x1x128xbf16>,
    %c0_9 = arith.constant 0 : index
    %7 = arith.index_cast %0 : i32 to index
    %c0_10 = arith.constant 0 : index
    %c0_11 = arith.constant 0 : index
    %8 = vector.load %arg2[%c0_9, %7, %c0_10, %c0_11] : memref<1x16x16x4xbf16, #tpu.memory_space<vmem>>, vector<1x8x16x4xbf16>
    %9 = vector.shape_cast %8 : vector<1x8x16x4xbf16> to vector<8x16x4xbf16>
    %10 = vector.shape_cast %9 : vector<8x16x4xbf16> to vector<128x4xbf16>
    %cst_12 = arith.constant dense<0.000000e+00> : vector<128x128xf32>
    %11 = tpu.matmul %10, %1, %cst_12 {dimension_numbers = #tpu.dot_dimension_numbers<[1], [0], [0], [1], [0, 0, 1, 1], [], []>} : vector<128x4xbf16>, vector<4x128xbf16>, vector<128x128xf32> -> vector<128x128xf32>
    %12 = vector.broadcast %2 : vector<1x128xf32> to vector<128x128xf32>
    %13 = arith.addf %11, %12 : vector<128x128xf32>
    %cst_13 = arith.constant 0.000000e+00 : f32
    %14 = vector.broadcast %cst_13 : f32 to vector<128x128xf32>
    %15 = arith.maximumf %13, %14 : vector<128x128xf32>
    %16 = arith.truncf %15 : vector<128x128xf32> to vector<128x128xbf16>
    %17 = vector.shape_cast %16 : vector<128x128xbf16> to vector<8x16x128xbf16>
    %c1 = arith.constant 1 : index
    %c1_14 = arith.constant 1 : index
    %c0_15 = arith.constant 0 : index
    %18 = vector.load %arg12[%c1, %c1_14, %c0_15] : memref<10x18x128xbf16, #tpu.memory_space<vmem>>, vector<8x16x128xbf16>
    tpu.vector_store %arg12[%c1, %c1_14, %c0_15], %17 {strides = array<i32>} : memref<10x18x128xbf16, #tpu.memory_space<vmem>>, vector<8x16x128xbf16>,
    %c1_i32 = arith.constant 1 : i32
    %19 = arith.subi %0, %c1_i32 : i32
    %c0_i32 = arith.constant 0 : i32
    %20 = arith.maxsi %19, %c0_i32 : i32
    %c0_16 = arith.constant 0 : index
    %21 = arith.index_cast %20 : i32 to index
    %c0_17 = arith.constant 0 : index
    %c0_18 = arith.constant 0 : index
    %22 = vector.load %arg2[%c0_16, %21, %c0_17, %c0_18] : memref<1x16x16x4xbf16, #tpu.memory_space<vmem>>, vector<1x1x16x4xbf16>
    %23 = vector.shape_cast %22 : vector<1x1x16x4xbf16> to vector<1x16x4xbf16>
    %24 = vector.shape_cast %23 : vector<1x16x4xbf16> to vector<16x4xbf16>
    %cst_19 = arith.constant dense<0.000000e+00> : vector<16x128xf32>
    %25 = tpu.matmul %24, %1, %cst_19 {dimension_numbers = #tpu.dot_dimension_numbers<[1], [0], [0], [1], [0, 0, 1, 1], [], []>} : vector<16x4xbf16>, vector<4x128xbf16>, vector<16x128xf32> -> vector<16x128xf32>
    %26 = vector.broadcast %2 : vector<1x128xf32> to vector<16x128xf32>
    %27 = arith.addf %25, %26 : vector<16x128xf32>
    %cst_20 = arith.constant 0.000000e+00 : f32
    %28 = vector.broadcast %cst_20 : f32 to vector<16x128xf32>
    %29 = arith.maximumf %27, %28 : vector<16x128xf32>
    %30 = arith.truncf %29 : vector<16x128xf32> to vector<16x128xbf16>
    %c0_i32_21 = arith.constant 0 : i32
    %31 = arith.cmpi sgt, %arg1, %c0_i32_21 : i32
    %cst_22 = arith.constant 0.000000e+00 : bf16
    %32 = vector.broadcast %cst_22 : bf16 to vector<16x128xbf16>
    %33 = arith.select %31, %30, %32 : vector<16x128xbf16>
    %34 = vector.shape_cast %33 : vector<16x128xbf16> to vector<1x16x128xbf16>
    %c0_23 = arith.constant 0 : index
    %c1_24 = arith.constant 1 : index
    %c0_25 = arith.constant 0 : index
    %35 = vector.load %arg12[%c0_23, %c1_24, %c0_25] : memref<10x18x128xbf16, #tpu.memory_space<vmem>>, vector<1x16x128xbf16>
    tpu.vector_store %arg12[%c0_23, %c1_24, %c0_25], %34 {strides = array<i32>} : memref<10x18x128xbf16, #tpu.memory_space<vmem>>, vector<1x16x128xbf16>,
    %c8_i32_26 = arith.constant 8 : i32
    %36 = arith.addi %0, %c8_i32_26 : i32
    %c15_i32 = arith.constant 15 : i32
    %37 = arith.minsi %36, %c15_i32 : i32
    %c0_27 = arith.constant 0 : index
    %38 = arith.index_cast %37 : i32 to index
    %c0_28 = arith.constant 0 : index
    %c0_29 = arith.constant 0 : index
    %39 = vector.load %arg2[%c0_27, %38, %c0_28, %c0_29] : memref<1x16x16x4xbf16, #tpu.memory_space<vmem>>, vector<1x1x16x4xbf16>
    %40 = vector.shape_cast %39 : vector<1x1x16x4xbf16> to vector<1x16x4xbf16>
    %41 = vector.shape_cast %40 : vector<1x16x4xbf16> to vector<16x4xbf16>
    %cst_30 = arith.constant dense<0.000000e+00> : vector<16x128xf32>
    %42 = tpu.matmul %41, %1, %cst_30 {dimension_numbers = #tpu.dot_dimension_numbers<[1], [0], [0], [1], [0, 0, 1, 1], [], []>} : vector<16x4xbf16>, vector<4x128xbf16>, vector<16x128xf32> -> vector<16x128xf32>
    %43 = vector.broadcast %2 : vector<1x128xf32> to vector<16x128xf32>
    %44 = arith.addf %42, %43 : vector<16x128xf32>
    %cst_31 = arith.constant 0.000000e+00 : f32
    %45 = vector.broadcast %cst_31 : f32 to vector<16x128xf32>
    %46 = arith.maximumf %44, %45 : vector<16x128xf32>
    %47 = arith.truncf %46 : vector<16x128xf32> to vector<16x128xbf16>
    %c16_i32 = arith.constant 16 : i32
    %48 = arith.cmpi slt, %36, %c16_i32 : i32
    %cst_32 = arith.constant 0.000000e+00 : bf16
    %49 = vector.broadcast %cst_32 : bf16 to vector<16x128xbf16>
    %50 = arith.select %48, %47, %49 : vector<16x128xbf16>
    %51 = vector.shape_cast %50 : vector<16x128xbf16> to vector<1x16x128xbf16>
    %c9 = arith.constant 9 : index
    %c1_33 = arith.constant 1 : index
    %c0_34 = arith.constant 0 : index
    %52 = vector.load %arg12[%c9, %c1_33, %c0_34] : memref<10x18x128xbf16, #tpu.memory_space<vmem>>, vector<1x16x128xbf16>
    tpu.vector_store %arg12[%c9, %c1_33, %c0_34], %51 {strides = array<i32>} : memref<10x18x128xbf16, #tpu.memory_space<vmem>>, vector<1x16x128xbf16>,
    %c0_35 = arith.constant 0 : index
    %c0_36 = arith.constant 0 : index
    %c0_37 = arith.constant 0 : index
    %53 = vector.load %arg12[%c0_35, %c0_36, %c0_37] : memref<10x18x128xbf16, #tpu.memory_space<vmem>>, vector<8x16x128xbf16>
    %54 = vector.shape_cast %53 : vector<8x16x128xbf16> to vector<128x128xbf16>
    %c0_38 = arith.constant 0 : index
    %c0_39 = arith.constant 0 : index
    %55 = vector.load %arg13[%c0_38, %c0_39] : memref<128x1152xbf16, #tpu.memory_space<vmem>>, vector<128x128xbf16>
    tpu.vector_store %arg13[%c0_38, %c0_39], %54 {strides = array<i32>} : memref<128x1152xbf16, #tpu.memory_space<vmem>>, vector<128x128xbf16>,
    %c0_40 = arith.constant 0 : index
    %c1_41 = arith.constant 1 : index
    %c0_42 = arith.constant 0 : index
    %56 = vector.load %arg12[%c0_40, %c1_41, %c0_42] : memref<10x18x128xbf16, #tpu.memory_space<vmem>>, vector<8x16x128xbf16>
    %57 = vector.shape_cast %56 : vector<8x16x128xbf16> to vector<128x128xbf16>
    %c0_43 = arith.constant 0 : index
    %c128 = arith.constant 128 : index
    %58 = vector.load %arg13[%c0_43, %c128] : memref<128x1152xbf16, #tpu.memory_space<vmem>>, vector<128x128xbf16>
    tpu.vector_store %arg13[%c0_43, %c128], %57 {strides = array<i32>} : memref<128x1152xbf16, #tpu.memory_space<vmem>>, vector<128x128xbf16>,
    %c0_44 = arith.constant 0 : index
    %c2 = arith.constant 2 : index
    %c0_45 = arith.constant 0 : index
    %59 = vector.load %arg12[%c0_44, %c2, %c0_45] : memref<10x18x128xbf16, #tpu.memory_space<vmem>>, vector<8x16x128xbf16>
    %60 = vector.shape_cast %59 : vector<8x16x128xbf16> to vector<128x128xbf16>
    %c0_46 = arith.constant 0 : index
    %c256 = arith.constant 256 : index
    %61 = vector.load %arg13[%c0_46, %c256] : memref<128x1152xbf16, #tpu.memory_space<vmem>>, vector<128x128xbf16>
    tpu.vector_store %arg13[%c0_46, %c256], %60 {strides = array<i32>} : memref<128x1152xbf16, #tpu.memory_space<vmem>>, vector<128x128xbf16>,
    %c1_47 = arith.constant 1 : index
    %c0_48 = arith.constant 0 : index
    %c0_49 = arith.constant 0 : index
    %62 = vector.load %arg12[%c1_47, %c0_48, %c0_49] : memref<10x18x128xbf16, #tpu.memory_space<vmem>>, vector<8x16x128xbf16>
    %63 = vector.shape_cast %62 : vector<8x16x128xbf16> to vector<128x128xbf16>
    %c0_50 = arith.constant 0 : index
    %c384 = arith.constant 384 : index
    %64 = vector.load %arg13[%c0_50, %c384] : memref<128x1152xbf16, #tpu.memory_space<vmem>>, vector<128x128xbf16>
    tpu.vector_store %arg13[%c0_50, %c384], %63 {strides = array<i32>} : memref<128x1152xbf16, #tpu.memory_space<vmem>>, vector<128x128xbf16>,
    %c1_51 = arith.constant 1 : index
    %c1_52 = arith.constant 1 : index
    %c0_53 = arith.constant 0 : index
    %65 = vector.load %arg12[%c1_51, %c1_52, %c0_53] : memref<10x18x128xbf16, #tpu.memory_space<vmem>>, vector<8x16x128xbf16>
    %66 = vector.shape_cast %65 : vector<8x16x128xbf16> to vector<128x128xbf16>
    %c0_54 = arith.constant 0 : index
    %c512 = arith.constant 512 : index
    %67 = vector.load %arg13[%c0_54, %c512] : memref<128x1152xbf16, #tpu.memory_space<vmem>>, vector<128x128xbf16>
    tpu.vector_store %arg13[%c0_54, %c512], %66 {strides = array<i32>} : memref<128x1152xbf16, #tpu.memory_space<vmem>>, vector<128x128xbf16>,
    %c1_55 = arith.constant 1 : index
    %c2_56 = arith.constant 2 : index
    %c0_57 = arith.constant 0 : index
    %68 = vector.load %arg12[%c1_55, %c2_56, %c0_57] : memref<10x18x128xbf16, #tpu.memory_space<vmem>>, vector<8x16x128xbf16>
    %69 = vector.shape_cast %68 : vector<8x16x128xbf16> to vector<128x128xbf16>
    %c0_58 = arith.constant 0 : index
    %c640 = arith.constant 640 : index
    %70 = vector.load %arg13[%c0_58, %c640] : memref<128x1152xbf16, #tpu.memory_space<vmem>>, vector<128x128xbf16>
    tpu.vector_store %arg13[%c0_58, %c640], %69 {strides = array<i32>} : memref<128x1152xbf16, #tpu.memory_space<vmem>>, vector<128x128xbf16>,
    %c2_59 = arith.constant 2 : index
    %c0_60 = arith.constant 0 : index
    %c0_61 = arith.constant 0 : index
    %71 = vector.load %arg12[%c2_59, %c0_60, %c0_61] : memref<10x18x128xbf16, #tpu.memory_space<vmem>>, vector<8x16x128xbf16>
    %72 = vector.shape_cast %71 : vector<8x16x128xbf16> to vector<128x128xbf16>
    %c0_62 = arith.constant 0 : index
    %c768 = arith.constant 768 : index
    %73 = vector.load %arg13[%c0_62, %c768] : memref<128x1152xbf16, #tpu.memory_space<vmem>>, vector<128x128xbf16>
    tpu.vector_store %arg13[%c0_62, %c768], %72 {strides = array<i32>} : memref<128x1152xbf16, #tpu.memory_space<vmem>>, vector<128x128xbf16>,
    %c2_63 = arith.constant 2 : index
    %c1_64 = arith.constant 1 : index
    %c0_65 = arith.constant 0 : index
    %74 = vector.load %arg12[%c2_63, %c1_64, %c0_65] : memref<10x18x128xbf16, #tpu.memory_space<vmem>>, vector<8x16x128xbf16>
    %75 = vector.shape_cast %74 : vector<8x16x128xbf16> to vector<128x128xbf16>
    %c0_66 = arith.constant 0 : index
    %c896 = arith.constant 896 : index
    %76 = vector.load %arg13[%c0_66, %c896] : memref<128x1152xbf16, #tpu.memory_space<vmem>>, vector<128x128xbf16>
    tpu.vector_store %arg13[%c0_66, %c896], %75 {strides = array<i32>} : memref<128x1152xbf16, #tpu.memory_space<vmem>>, vector<128x128xbf16>,
    %c2_67 = arith.constant 2 : index
    %c2_68 = arith.constant 2 : index
    %c0_69 = arith.constant 0 : index
    %77 = vector.load %arg12[%c2_67, %c2_68, %c0_69] : memref<10x18x128xbf16, #tpu.memory_space<vmem>>, vector<8x16x128xbf16>
    %78 = vector.shape_cast %77 : vector<8x16x128xbf16> to vector<128x128xbf16>
    %c0_70 = arith.constant 0 : index
    %c1024 = arith.constant 1024 : index
    %79 = vector.load %arg13[%c0_70, %c1024] : memref<128x1152xbf16, #tpu.memory_space<vmem>>, vector<128x128xbf16>
    tpu.vector_store %arg13[%c0_70, %c1024], %78 {strides = array<i32>} : memref<128x1152xbf16, #tpu.memory_space<vmem>>, vector<128x128xbf16>,
    %c0_71 = arith.constant 0 : index
    %c0_72 = arith.constant 0 : index
    %80 = vector.load %arg13[%c0_71, %c0_72] : memref<128x1152xbf16, #tpu.memory_space<vmem>>, vector<128x1152xbf16>
    %c0_73 = arith.constant 0 : index
    %c0_74 = arith.constant 0 : index
    %81 = vector.load %arg5[%c0_73, %c0_74] : memref<1152x128xbf16, #tpu.memory_space<vmem>>, vector<1152x128xbf16>
    %cst_75 = arith.constant dense<0.000000e+00> : vector<128x128xf32>
    %82 = tpu.matmul %80, %81, %cst_75 {dimension_numbers = #tpu.dot_dimension_numbers<[1], [0], [0], [1], [0, 0, 1, 1], [], []>} : vector<128x1152xbf16>, vector<1152x128xbf16>, vector<128x128xf32> -> vector<128x128xf32>
    %c0_76 = arith.constant 0 : index
    %c0_77 = arith.constant 0 : index
    %83 = vector.load %arg6[%c0_76, %c0_77] : memref<1x128xf32, #tpu.memory_space<vmem>>, vector<1x128xf32>
    %84 = vector.broadcast %83 : vector<1x128xf32> to vector<128x128xf32>
    %85 = arith.addf %82, %84 : vector<128x128xf32>
    %cst_78 = arith.constant 0.000000e+00 : f32
    %86 = vector.broadcast %cst_78 : f32 to vector<128x128xf32>
    %87 = arith.maximumf %85, %86 : vector<128x128xf32>
    %88 = arith.truncf %87 : vector<128x128xf32> to vector<128x128xbf16>
    %c0_79 = arith.constant 0 : index
    %c0_80 = arith.constant 0 : index
    %89 = vector.load %arg7[%c0_79, %c0_80] : memref<128x16xbf16, #tpu.memory_space<vmem>>, vector<128x16xbf16>
    %cst_81 = arith.constant dense<0.000000e+00> : vector<128x16xf32>
    %90 = tpu.matmul %88, %89, %cst_81 {dimension_numbers = #tpu.dot_dimension_numbers<[1], [0], [0], [1], [0, 0, 1, 1], [], []>} : vector<128x128xbf16>, vector<128x16xbf16>, vector<128x16xf32> -> vector<128x16xf32>
    %c0_82 = arith.constant 0 : index
    %c0_83 = arith.constant 0 : index
    %91 = vector.load %arg8[%c0_82, %c0_83] : memref<1x16xf32, #tpu.memory_space<vmem>>, vector<1x16xf32>
    %92 = vector.broadcast %91 : vector<1x16xf32> to vector<128x16xf32>
    %93 = arith.addf %90, %92 : vector<128x16xf32>
    %c0_84 = arith.constant 0 : index
    %94 = arith.index_cast %0 : i32 to index
    %c0_85 = arith.constant 0 : index
    %c0_86 = arith.constant 0 : index
    %95 = vector.load %arg2[%c0_84, %94, %c0_85, %c0_86] : memref<1x16x16x4xbf16, #tpu.memory_space<vmem>>, vector<1x8x16x4xbf16>
    %96 = vector.shape_cast %95 : vector<1x8x16x4xbf16> to vector<8x16x4xbf16>
    %97 = vector.shape_cast %96 : vector<8x16x4xbf16> to vector<128x4xbf16>
    %c0_87 = arith.constant 0 : index
    %c0_88 = arith.constant 0 : index
    %98 = vector.load %arg9[%c0_87, %c0_88] : memref<4x16xbf16, #tpu.memory_space<vmem>>, vector<4x16xbf16>
    %cst_89 = arith.constant dense<0.000000e+00> : vector<128x16xf32>
    %99 = tpu.matmul %97, %98, %cst_89 {dimension_numbers = #tpu.dot_dimension_numbers<[1], [0], [0], [1], [0, 0, 1, 1], [], []>} : vector<128x4xbf16>, vector<4x16xbf16>, vector<128x16xf32> -> vector<128x16xf32>
    %c0_90 = arith.constant 0 : index
    %c0_91 = arith.constant 0 : index
    %100 = vector.load %arg10[%c0_90, %c0_91] : memref<1x16xf32, #tpu.memory_space<vmem>>, vector<1x16xf32>
    %101 = vector.broadcast %100 : vector<1x16xf32> to vector<128x16xf32>
    %102 = arith.addf %99, %101 : vector<128x16xf32>
    %103 = arith.addf %93, %102 : vector<128x16xf32>
    %cst_92 = arith.constant 0.000000e+00 : f32
    %104 = vector.broadcast %cst_92 : f32 to vector<128x16xf32>
    %105 = arith.maximumf %103, %104 : vector<128x16xf32>
    %106 = vector.shape_cast %105 : vector<128x16xf32> to vector<8x16x16xf32>
    %c0_93 = arith.constant 0 : index
    %c0_94 = arith.constant 0 : index
    %c0_95 = arith.constant 0 : index
    %c0_96 = arith.constant 0 : index
    %107 = vector.load %arg11[%c0_93, %c0_94, %c0_95, %c0_96] : memref<1x8x16x16xf32, #tpu.memory_space<vmem>>, vector<1x8x16x16xf32>
    %108 = vector.shape_cast %107 : vector<1x8x16x16xf32> to vector<8x16x16xf32>
    %109 = vector.shape_cast %106 : vector<8x16x16xf32> to vector<1x8x16x16xf32>
    tpu.vector_store %arg11[%c0_93, %c0_94, %c0_95, %c0_96], %109 {strides = array<i32>} : memref<1x8x16x16xf32, #tpu.memory_space<vmem>>, vector<1x8x16x16xf32>,
    return
  }
  func.func @transform_0(%arg0: i32, %arg1: i32) -> (i32, i32, i32, i32) {
    %c0_i32 = arith.constant 0 : i32
    %c0_i32_0 = arith.constant 0 : i32
    %c0_i32_1 = arith.constant 0 : i32
    %c0_i32_2 = arith.constant 0 : i32
    return %arg0, %c0_i32, %c0_i32_0, %c0_i32_1 : i32, i32, i32, i32
  }
  func.func @transform_1(%arg0: i32, %arg1: i32) -> (i32, i32) {
    %c0_i32 = arith.constant 0 : i32
    %c0_i32_0 = arith.constant 0 : i32
    %c0_i32_1 = arith.constant 0 : i32
    return %c0_i32, %c0_i32_0 : i32, i32
  }
  func.func @transform_2(%arg0: i32, %arg1: i32) -> (i32, i32) {
    %c0_i32 = arith.constant 0 : i32
    %c0_i32_0 = arith.constant 0 : i32
    %c0_i32_1 = arith.constant 0 : i32
    return %c0_i32, %c0_i32_0 : i32, i32
  }
  func.func @transform_3(%arg0: i32, %arg1: i32) -> (i32, i32) {
    %c0_i32 = arith.constant 0 : i32
    %c0_i32_0 = arith.constant 0 : i32
    %c0_i32_1 = arith.constant 0 : i32
    return %c0_i32, %c0_i32_0 : i32, i32
  }
  func.func @transform_4(%arg0: i32, %arg1: i32) -> (i32, i32) {
    %c0_i32 = arith.constant 0 : i32
    %c0_i32_0 = arith.constant 0 : i32
    %c0_i32_1 = arith.constant 0 : i32
    return %c0_i32, %c0_i32_0 : i32, i32
  }
  func.func @transform_5(%arg0: i32, %arg1: i32) -> (i32, i32) {
    %c0_i32 = arith.constant 0 : i32
    %c0_i32_0 = arith.constant 0 : i32
    %c0_i32_1 = arith.constant 0 : i32
    return %c0_i32, %c0_i32_0 : i32, i32
  }
  func.func @transform_6(%arg0: i32, %arg1: i32) -> (i32, i32) {
    %c0_i32 = arith.constant 0 : i32
    %c0_i32_0 = arith.constant 0 : i32
    %c0_i32_1 = arith.constant 0 : i32
    return %c0_i32, %c0_i32_0 : i32, i32
  }
  func.func @transform_7(%arg0: i32, %arg1: i32) -> (i32, i32) {
    %c0_i32 = arith.constant 0 : i32
    %c0_i32_0 = arith.constant 0 : i32
    %c0_i32_1 = arith.constant 0 : i32
    return %c0_i32, %c0_i32_0 : i32, i32
  }
  func.func @transform_8(%arg0: i32, %arg1: i32) -> (i32, i32) {
    %c0_i32 = arith.constant 0 : i32
    %c0_i32_0 = arith.constant 0 : i32
    %c0_i32_1 = arith.constant 0 : i32
    return %c0_i32, %c0_i32_0 : i32, i32
  }
  func.func @transform_9(%arg0: i32, %arg1: i32) -> (i32, i32, i32, i32) {
    %c0_i32 = arith.constant 0 : i32
    %c0_i32_0 = arith.constant 0 : i32
    %c0_i32_1 = arith.constant 0 : i32
    return %arg0, %arg1, %c0_i32, %c0_i32_0 : i32, i32, i32, i32
  }
}

</mosaic_0001>

<bundles_post_ra>
// kernel: tpu_custom_call.1
= control target key start
LH: loop header
LB: loop body
LE: loop exit
PB: predicated region body
PF: predicated region fallthrough
CT: control target
= control target key end

     0   :  { %s6763_s0 = inlined_call_operand.vmem [shape: bf16[2,16,16,4], index: 0, kind: input, shape index: {}]   ;;  %s6764_s1 = inlined_call_operand.vmem [shape: bf16[4,128], index: 1, kind: input, shape index: {}]   ;;  %s6765_s2 = inlined_call_operand.vmem [shape: f32[1,128], index: 2, kind: input, shape index: {}]   ;;  %s6766_s3 = inlined_call_operand.hbm [shape: bf16[1152,128], index: 3, kind: input, shape index: {}]   ;;  %s6767_s4 = inlined_call_operand.vmem [shape: f32[1,128], index: 4, kind: input, shape index: {}]   ;;  %s6768_s5 = inlined_call_operand.vmem [shape: bf16[128,16], index: 5, kind: input, shape index: {}]   ;;  %s6769_s6 = inlined_call_operand.vmem [shape: f32[1,16], index: 6, kind: input, shape index: {}]   ;;  %s6770_s7 = inlined_call_operand.vmem [shape: bf16[4,16], index: 7, kind: input, shape index: {}]   ;;  %s6771_s8 = inlined_call_operand.vmem [shape: f32[1,16], index: 8, kind: input, shape index: {}]   ;;  %s6772_s9 = inlined_call_operand.hbm [shape: f32[2,16,16,16], index: 9, kind: output, shape index: {}]  }
   0x1   :  { %6777 = sst [smem:[#allocation33_spill]] %s6766_s3 }
   0x2   :  { %14 = vsyncpa [#allocation5], 0 }
   0x3   :  { %15 = vsyncpa [#allocation6], 0 }
   0x4   :  { %17 = vsyncpa [#allocation6 + $0x1], 0  ;;  %s5593_s30 = smov 0   ;;  %s5595_s10 = smov 0  }
   0x5   :  { %s5597_s11 = smov 0   ;;  %s5599_s12 = smov 0  }
   0x6   :  { %s5601_s13 = smov 0   ;;  %s5603_s14 = smov 0  }
   0x7   :  { %s5605_s15 = smov 0   ;;  %s5607_s16 = smov 0  }
   0x8 LB: > { %s4412_s17 = sadd.s32 4294967295, %s5533_s16   ;;  %s4413_s18 = sadd.s32 4294967294, %s5533_s16   ;;  %s5533_s16 = sphi %s5607_s16, %s23_s16   ;;  %s5529_s15 = sphi %s5605_s15, %s6855_s15   ;;  %s5525_s14 = sphi %s5603_s14, %s6854_s14   ;;  %s5521_s13 = sphi %s5601_s13, %s6853_s13   ;;  %s5517_s12 = sphi %s5599_s12, %s6852_s12   ;;  %s5513_s11 = sphi %s5597_s11, %s6851_s11   ;;  %s5509_s10 = sphi %s5595_s10, %s6850_s10   ;;  %s5505_s30 = sphi %s5593_s30, %s6849_s30  }
   0x9   : > { %s32_s19 = sadd.s32 1, %s5525_s14  ;;  %s35_s20 = sadd.s32 1, %s5529_s15 }
   0xa   : > { %p33_p0 = scmp.ge.s32.totalorder %s32_s19, 2  ;;  %s238_s21 = sadd.s32 1, %s5513_s11 }
   0xb   : > { %p248_p1 = scmp.ne.s32.totalorder %s5513_s11, %s5509_s10  ;;  %p249_p2 = scmp.eq.s32.totalorder %s4412_s17, 3 }
   0xc   : > { %s6857_s19 = smov (%p33_p0, %s32_s19), 0  ;;  %s6859_s20 = smov (!%p33_p0, %s35_s20), %s5529_s15 }
   0xd   : > { %6778 = sst [smem:[#allocation10_spill]] %s6857_s19  ;;  %s234_s22 = ssub.s32 %s5525_s14, %s6857_s19 }
   0xe   : > { %p5645_p3 = por %p249_p2, %p248_p1  ;;  %p37_p4 = scmp.ge.s32.totalorder %s6859_s20, 2 }
   0xf   : > { %p254_p5 = scmp.ne.s32.totalorder %s5509_s10, %s5505_s30  ;;  %p255_p6 = scmp.eq.s32.totalorder %s4413_s18, 3 }
  0x10   : > { %p4414_p7 = scmp.ge.s32.totalorder %s5533_s16, 1  ;;  %s6861_s20 = smov (%p37_p4, %s6859_s20), 0 }
  0x11   : > { %6780 = sst [smem:[#allocation11_spill]] %s6861_s20  ;;  %p5654_p8 = por %p255_p6, %p254_p5 }
  0x12   : > { %p262_p9 = scmp.lt.s32.totalorder %s5533_s16, 5  ;;  %s233_s25 = ssub.s32 %s5529_s15, %s6861_s20 }
  0x13   : > { %s235_s26 = sor.u32 %s234_s22, %s233_s25  ;;  %p5665_p12 = scmp.eq.s32.totalorder %s4412_s17, 0 }
  0x14   : > { %p5661_p10 = pnand %p4414_p7, %p262_p9  ;;  %p236_p11 = scmp.eq.s32.totalorder %s235_s26, 0 }
  0x15   : > { %s5535_s18 = smov [#allocation4]  }
  0x16   : > { %p5128_p13 = pneg %p5661_p10  ;;  %s280_s19 = sshll.u32 %s5535_s18, 4  ;;  %s281_s19 = int_to_ptr.vmem [resolvable:$true] %s280_s19 }
  0x17   : > { %s5672_s29 = scalar_select %p236_p11, %s5513_s11, %s238_s21  }
  0x18   : > { %p5676_p0 = pnand %p5665_p12, %p5128_p13  ;;  %s5422_s17 = scalar_lea.vmem %s281_s19, 9216 }
  0x19   : > { %p5423_p2 = scmp.ne.s32.totalorder %s281_s19, %s5422_s17  ;;  %p5430_p6 = scmp.lt.s32.totalorder %s281_s19, %s281_s19 }
  0x1a   : > { %p5413_p1 = pneg %p5676_p0  ;;  %p5431_p7 = scmp.lt.s32.totalorder %s5422_s17, %s5422_s17 }
  0x1c   : > { %p5425_p4 = pnand %p5423_p2, %p5413_p1  ;;  %p5432_p9 = por %p5431_p7, %p5430_p6 }
  0x1e   : > { %p5426_p5 = pneg %p5425_p4 }
  0x20   : > { %p5433_p11 = pnand %p5432_p9, %p5426_p5 }
  0x22   : > { %5436 = shalt.err (!%p5433_p11)
}
  0x23   : > { %s5536_s21 = smov 64   ;;  %s5537_s25 = smov 4  }
  0x24   : > { %s6785_s3 = sld [smem:[#allocation33_spill]] }
  0x26   : > { %319 = sbr.rel (%p5661_p10) target bundleno = 963 (0x3c3), region = 56 }
  0x2a   : > { %5131 = dma.hbm_to_vmem [thread:$0]  (!%p5676_p0), %s6785_s3, 9216, %s281_s19, [#allocation5], %s5536_s21, %s5536_s21, %s5537_s25  }
  0x2b   : > { %5496 = dma.done.wait (%p5665_p12), [#allocation5], 9216  }
  0x2c   : > { %5498 = vsyncadd (%p5665_p12), [#allocation5], 4294958080  ;;  %p355_p13 = scmp.lt.s32.totalorder %s5521_s13, 1  ;;  %v5538_v0 = vmov 0.0   ;;  %s4675_s22 = sshll.u32 %s5517_s12, 6  ;;  %vm5539_vm0 = vmmov 0  }
  0x2d   : > { %5023 = vmatprep.subr.bf16.mxu1 %v5538_v0  ;;  %s4422_s17 = sshll.u32 %s5517_s12, 3  ;;  %5025 = vmatprep.mubr.msk.bf16.mxu1 %vm5539_vm0, %v5538_v0  ;;  %vm520_vm1 = vcmask 1041408   ;;  %vm495_vm2 = vcmask 31744   ;;  %vm366_vm3 = vsmask.f32 256  ;;  %vm365_vm4 = vcmask 1040384  }
  0x2e   : > { %s356_s26 = scalar_select %p355_p13, %s5521_s13, 1  ;;  %v363_v1 = vld [vmem:[%s6764_s1] sm:$0x3]  ;;  %vm5721_vm5 = vmand %vm365_vm4, %vm366_vm3  ;;  %v374_v10 = vld [vmem:[#allocation2 + $0x18] sm:$0x1]  ;;  %vm848_vm8 = vcmask 1043456  }
  0x2f   : > { %s4458_s19 = sadd.s32 4294967295, %s4422_s17  ;;  %s5698_s27 = sadd.s32 8, %s4422_s17  ;;  %v522_v2 = vsel %vm520_vm1, %v363_v1, 0  ;;  %5119 = vmatprep.subr.msk.bf16.mxu0 %vm520_vm1, %v363_v1  ;;  %v375_v12 = vsel %vm5721_vm5, 0, %v374_v10  ;;  %vm398_vm6 = vsmask.f32 7938 }
  0x30   : > { %s4673_s21 = sshll.u32 %s356_s26, 7  ;;  %p907_p10 = scmp.gt.s32.totalorder %s4458_s19, 0  ;;  %5006 = vmatpush3.bf16.msra.mxu0 %v522_v2  ;;  %5024 = vmatpush3.bf16.msra.mxu1 %v522_v2  ;;  %376 = vst [vmem:[#allocation2 + $0x18] sm:$0x1] %v375_v12  ;;  %v371_v16 = vld [vmem:[#allocation2 + $0xc] sm:$0x1]  ;;  %vm5743_vm7 = vmand %vm365_vm4, %vm398_vm6 }
  0x31   : > { %s359_s18 = scalar_lea.vmem %s6763_s0, %s4673_s21  ;;  %p1004_p12 = scmp.lt.s32.totalorder %s5698_s27, 15  ;;  %5029 = vmatprep.subr.bf16.mxu1 %v5538_v0  ;;  %v372_v17 = vsel %vm5721_vm5, 0, %v371_v16  ;;  %v406_v19 = vld [vmem:[#allocation2 + $0x20] sm:$0x1]  ;;  %v400_v21 = vld [vmem:[#allocation2 + $0x8] sm:$0x1]  ;;  %vm5797_vm11 = vmand %vm848_vm8, %vm398_vm6 }
  0x32   : > { %s5703_s3 = scalar_lea.vmem %s359_s18, %s4675_s22  ;;  %s6863_s19 = smov (!%p907_p10, %s4458_s19), 0  ;;  %373 = vst [vmem:[#allocation2 + $0xc] sm:$0x1] %v372_v17  ;;  %v368_v20 = vld [vmem:[#allocation2] sm:$0x1]  ;;  %v407_v22 = vsel %vm5743_vm7, 0, %v406_v19 }
  0x33   : > { %v5210_v3 = vld [vmem:[%s5703_s3] sm:$0xff]   ;;  %v5211_v4 = vld [vmem:[%s5703_s3 + $0x8] sm:$0xff]   ;;  %v5213_v5 = vld [vmem:[%s5703_s3 + $0x10] sm:$0xff]   ;;  %s1005_s22 = scalar_select %p1004_p12, %s5698_s27, 15  ;;  %v369_v23 = vsel %vm5721_vm5, 0, %v368_v20  ;;  %v401_v24 = vsel %vm5743_vm7, 0, %v400_v21 }
  0x34   : > { %5007 = vmatprep.mubr.msk.bf16.mxu0 %vm495_vm2, %v5210_v3  ;;  %s4692_s26 = sshll.u32 %s6863_s19, 3  ;;  %v5214_v8 = vld [vmem:[%s5703_s3 + $0x18] sm:$0xff]   ;;  %v5215_v9 = vld [vmem:[%s5703_s3 + $0x20] sm:$0xff]   ;;  %v5216_v13 = vld [vmem:[%s5703_s3 + $0x28] sm:$0xff]   ;;  %408 = vst [vmem:[#allocation2 + $0x20] sm:$0x1] %v407_v22 }
  0x35   : > { %5008 = vmatmul.mubr.msk.bf16.vlgmr.msra.gmra.mxu0 %vm495_vm2, %v5211_v4  ;;  %s911_s20 = scalar_lea.vmem %s359_s18, %s4692_s26  ;;  %s4693_s21 = sshll.u32 %s1005_s22, 3  ;;  %v5217_v14 = vld [vmem:[%s5703_s3 + $0x30] sm:$0xff]   ;;  %v5218_v15 = vld [vmem:[%s5703_s3 + $0x38] sm:$0xff]   ;;  %370 = vst [vmem:[#allocation2] sm:$0x1] %v369_v23  ;;  %v5224_v35 = vld [vmem:[#allocation4 + $0xf0] sm:$0xff]  }
  0x36   : > { %v5212_v6 = vld [vmem:[%s911_s20] sm:$0xff]   ;;  %5011 = vmatprep.mubr.msk.bf16.mxu0 %vm495_vm2, %v5213_v5  ;;  %s1008_s28 = scalar_lea.vmem %s359_s18, %s4693_s21  ;;  %402 = vst [vmem:[#allocation2 + $0x8] sm:$0x1] %v401_v24  ;;  %v403_v25 = vld [vmem:[#allocation2 + $0x14] sm:$0x1]  ;;  %v5225_v36 = vld [vmem:[#allocation4 + $0xb0] sm:$0xff]  }
  0x37   : > { %5026 = vmatmul.mubr.msk.bf16.vlgmr.msra.gmra.mxu1 %vm495_vm2, %v5212_v6  ;;  %v5219_v11 = vld [vmem:[%s1008_s28] sm:$0xff]   ;;  %v404_v26 = vsel %vm5743_vm7, 0, %v403_v25  ;;  %v5220_v29 = vld [vmem:[#allocation4 + $0xf8] sm:$0xff]   ;;  %v5226_v37 = vld [vmem:[#allocation4 + $0x70] sm:$0xff]   ;;  %p966_p0 = scmp.gt.s32.totalorder %s5517_s12, 0  ;;  %vm1432_vm13 = vcmask 1042432  }
  0x38   : > { %5030 = vmatpush3.bf16.msra.mxu1 %v522_v2  ;;  %5031 = vmatprep.mubr.msk.bf16.mxu1 %vm5539_vm0, %v5538_v0  ;;  %405 = vst [vmem:[#allocation2 + $0x14] sm:$0x1] %v404_v26  ;;  %v377_v27 = vld [vmem:[#allocation2 + $0x24] sm:$0x1]  ;;  %v5221_v30 = vld [vmem:[#allocation4 + $0xb8] sm:$0xff]   ;;  %v5227_v39 = vld [vmem:[#allocation4 + $0x30] sm:$0xff]  }
  0x39   : > { %v378_v28 = vsel %vm5721_vm5, 0, %v377_v27  ;;  %v380_v31 = vld [vmem:[#allocation2 + $0x30] sm:$0x1]  ;;  %4772 = vmatprep.subr.bf16.mxu1 %v5220_v29  ;;  %v5228_v38 = vld [vmem:[#allocation4 + $0xe8] sm:$0xff]   ;;  %v412_v41 = vld [vmem:[#allocation2 + $0x38] sm:$0x1] }
  0x3a   : > { %379 = vst [vmem:[#allocation2 + $0x24] sm:$0x1] %v378_v28  ;;  %v381_v32 = vsel %vm5721_vm5, 0, %v380_v31  ;;  %v5222_v33 = vld [vmem:[#allocation4 + $0x78] sm:$0xff]   ;;  %v5229_v40 = vld [vmem:[#allocation4 + $0xa8] sm:$0xff]   ;;  %v413_v43 = vsel %vm5743_vm7, 0, %v412_v41 }
  0x3b   : > { %382 = vst [vmem:[#allocation2 + $0x30] sm:$0x1] %v381_v32  ;;  %v5223_v34 = vld [vmem:[#allocation4 + $0x38] sm:$0xff]   ;;  %4708 = vmatprep.subr.bf16.mxu0 %v5222_v33  ;;  %v409_v42 = vld [vmem:[#allocation2 + $0x2c] sm:$0x1]  ;;  %v5230_v45 = vld [vmem:[#allocation4 + $0x68] sm:$0xff]  }
  0x3c   : > { %4709 = vmatpush3.bf16.msra.mxu0 %v5223_v34  ;;  %v410_v44 = vsel %vm5743_vm7, 0, %v409_v42  ;;  %v5232_v46 = vld [vmem:[#allocation4 + $0xe0] sm:$0xff]   ;;  %414 = vst [vmem:[#allocation2 + $0x38] sm:$0x1] %v413_v43  ;;  %v5231_v47 = vld [vmem:[#allocation4 + $0x28] sm:$0xff]   ;;  %v5236_v51 = vld [vmem:[#allocation4 + $0xd8] sm:$0xff]  }
  0x3d   : > { %5012 = vmatmul.mubr.msk.bf16.gmra.mxu0 %vm495_vm2, %v5214_v8  ;;  %4710 = vmatprep.subr.bf16.mxu0 %v5226_v37  ;;  %411 = vst [vmem:[#allocation2 + $0x2c] sm:$0x1] %v410_v44  ;;  %v5233_v48 = vld [vmem:[#allocation4 + $0xa0] sm:$0xff]   ;;  %v5237_v54 = vld [vmem:[#allocation4 + $0x98] sm:$0xff]   ;;  %v386_v55 = vld [vmem:[#allocation2 + $0x48] sm:$0x1] }
  0x3e   : > { %5015 = vmatprep.mubr.msk.bf16.mxu0 %vm495_vm2, %v5215_v9  ;;  %v383_v49 = vld [vmem:[#allocation2 + $0x3c] sm:$0x1]  ;;  %v5238_v56 = vld [vmem:[#allocation4 + $0x58] sm:$0xff]   ;;  %v5240_v57 = vld [vmem:[#allocation4 + $0xd0] sm:$0xff]   ;;  %v387_v58 = vsel %vm5721_vm5, 0, %v386_v55  ;;  %vm1433_vm14 = vcmask 1046532  }
  0x3f   : > { %5032 = vmatmul.mubr.msk.bf16.vlgmr.msra.gmra.mxu1 %vm495_vm2, %v5219_v11  ;;  %v5234_v50 = vld [vmem:[#allocation4 + $0x60] sm:$0xff]   ;;  %v384_v52 = vsel %vm5721_vm5, 0, %v383_v49  ;;  %v5239_v59 = vld [vmem:[#allocation4 + $0x18] sm:$0xff]   ;;  %v5241_v60 = vld [vmem:[#allocation4 + $0x90] sm:$0xff]   ;;  %388 = vst [vmem:[#allocation2 + $0x48] sm:$0x1] %v387_v58 }
  0x40   : > { %4773 = vmatpush3.bf16.msra.mxu1 %v5221_v30  ;;  %4711 = vmatpush3.bf16.msra.mxu0 %v5227_v39  ;;  %v5235_v53 = vld [vmem:[#allocation4 + $0x20] sm:$0xff]   ;;  %385 = vst [vmem:[#allocation2 + $0x3c] sm:$0x1] %v384_v52  ;;  %v418_v61 = vld [vmem:[#allocation2 + $0x50] sm:$0x1]  ;;  %v5242_v63 = vld [vmem:[#allocation4 + $0x50] sm:$0xff]  }
  0x41   : > { %4774 = vmatprep.subr.bf16.mxu1 %v5224_v35  ;;  %4712 = vmatprep.subr.bf16.mxu0 %v5230_v45  ;;  %v415_v62 = vld [vmem:[#allocation2 + $0x44] sm:$0x1]  ;;  %v419_v0 = vsel %vm5743_vm7, 0, %v418_v61  ;;  %v5243_v2 = vld [vmem:[#allocation4 + $0x10] sm:$0xff]   ;;  %v5248_v6 = vld [vmem:[#allocation4 + $0xc0] sm:$0xff]   ;;  %p1063_p1 = scmp.lt.s32.totalorder %s5698_s27, 16 }
  0x42   : > { %v416_v1 = vsel %vm5743_vm7, 0, %v415_v62  ;;  %v5244_v3 = vld [vmem:[#allocation4 + $0xc8] sm:$0xff]   ;;  %420 = vst [vmem:[#allocation2 + $0x50] sm:$0x1] %v419_v0  ;;  %v5249_v9 = vld [vmem:[#allocation4 + $0x80] sm:$0xff]   ;;  %v5260_v21 = vld [vmem:[#allocation4 + $0x178] sm:$0xff]  }
  0x43   : > { %417 = vst [vmem:[#allocation2 + $0x44] sm:$0x1] %v416_v1  ;;  %v5245_v4 = vld [vmem:[#allocation4 + $0x88] sm:$0xff]   ;;  %v5250_v10 = vld [vmem:[#allocation4 + $0x40] sm:$0xff]   ;;  %v389_v11 = vld [vmem:[#allocation2 + $0x54] sm:$0x1] }
  0x44   : > { %4775 = vmatpush3.bf16.msra.mxu1 %v5225_v36  ;;  %4713 = vmatpush3.bf16.msra.mxu0 %v5231_v47  ;;  %v5246_v5 = vld [vmem:[#allocation4 + $0x48] sm:$0xff]   ;;  %v390_v12 = vsel %vm5721_vm5, 0, %v389_v11  ;;  %v421_v17 = vld [vmem:[#allocation2 + $0x5c] sm:$0x1]  ;;  %v5285_v22 = vld [vmem:[#allocation4 + $0x1f8] sm:$0xff]   ;;  %s352_s21 = sand.u32 1, %s5509_s10  }
  0x45   : > { %5016 = vmatmul.mubr.msk.bf16.gmra.mxu0 %vm495_vm2, %v5216_v13  ;;  %4776 = vmatprep.subr.bf16.mxu1 %v5228_v38  ;;  %v5247_v8 = vld [vmem:[#allocation4 + $0x8] sm:$0xff]   ;;  %391 = vst [vmem:[#allocation2 + $0x54] sm:$0x1] %v390_v12  ;;  %v422_v19 = vsel %vm5743_vm7, 0, %v421_v17  ;;  %v5254_v20 = vld [vmem:[#allocation4] sm:$0xff]   ;;  %vm5930_vm15 = vmor %vm1432_vm13, %vm1433_vm14  ;;  %s4694_s19 = sshll.u32 %s5517_s12, 4 }
  0x46   : > { %5019 = vmatprep.mubr.msk.bf16.mxu0 %vm495_vm2, %v5217_v14  ;;  %4714 = vmatprep.subr.bf16.mxu0 %v5234_v50  ;;  %v392_v13 = vld [vmem:[#allocation2 + $0x60] sm:$0x1]  ;;  %423 = vst [vmem:[#allocation2 + $0x5c] sm:$0x1] %v422_v19  ;;  %s967_s18 = scalar_select %p966_p0, 1, 0 }
  0x47   : > { %v393_v14 = vsel %vm5721_vm5, 0, %v392_v13  ;;  %v5783_v23 = vld [vmem:[%s6765_s2] ss:$0 sm:$0xff]  ;;  %vm685_vm9 = vsmask.f32 4368  ;;  %s4669_s25 = sshll.u32 %s5521_s13, 5 }
  0x48   : > { %4777 = vmatpush3.bf16.msra.mxu1 %v5229_v40  ;;  %4715 = vmatpush3.bf16.msra.mxu0 %v5235_v53  ;;  %394 = vst [vmem:[#allocation2 + $0x60] sm:$0x1] %v393_v14  ;;  %v968_v35 = vstv %s967_s18  ;;  %v857_v53 = vld [vmem:[#allocation2 + $0x18] sm:$0xf]  ;;  %vm5806_vm12 = vmor %vm366_vm3, %vm685_vm9  ;;  %v861_v11 = vld [vmem:[#allocation2 + $0x20] sm:$0x1]  ;;  %s4315_s18 = sadd.s32 %s4694_s19, %s4669_s25 }
  0x49   : > { %4778 = vmatprep.subr.bf16.mxu1 %v5232_v46  ;;  %4716 = vmatprep.subr.bf16.mxu0 %v5238_v56  ;;  %vm5790_vm10 = vcmp.eq.s32.totalorder %v968_v35, 1  ;;  %vm1157_vm0 = vsmask.f32 3328  ;;  %vm1158_vm3 = vsmask.f32 7440  ;;  %s4670_s12 = sshll.u32 %s4315_s18, 7 }
  0x4a   : > { %vm5997_vm4 = vmor %vm1157_vm0, %vm1158_vm3  ;;  %s6223_s17 = scalar_select %p1063_p1, 1, 0 }
  0x4b   : > { %s6702_s22 = scalar_lea.hbm %s6772_s9, %s4670_s12  ;;  %s6712_s26 = scalar_lea.sflag [#allocation6], %s352_s21 }
  0x4c   : > { %4779 = vmatpush3.bf16.msra.mxu1 %v5233_v48  ;;  %4717 = vmatpush3.bf16.msra.mxu0 %v5239_v59 }
  0x4d   : > { %5020 = vmatmul.mubr.msk.bf16.gmra.mxu0 %vm495_vm2, %v5218_v15  ;;  %4780 = vmatprep.subr.bf16.mxu1 %v5236_v51  ;;  %v424_v15 = vld [vmem:[#allocation2 + $0x68] sm:$0x1] }
  0x4e   : > { %4718 = vmatprep.subr.bf16.mxu0 %v5242_v63  ;;  %v425_v16 = vsel %vm5743_vm7, 0, %v424_v15  ;;  %v850_v63 = vld [vmem:[#allocation2 + $0xc] sm:$0xf] }
  0x4f   : > { %426 = vst [vmem:[#allocation2 + $0x68] sm:$0x1] %v425_v16 }
  0x50   : > { %4781 = vmatpush3.bf16.msra.mxu1 %v5237_v54  ;;  %4719 = vmatpush3.bf16.msra.mxu0 %v5243_v2 }
  0x51   : > { %4782 = vmatprep.subr.bf16.mxu1 %v5240_v57  ;;  %4720 = vmatprep.subr.bf16.mxu0 %v5246_v5 }
  0x54   : > { %4783 = vmatpush3.bf16.msra.mxu1 %v5241_v60  ;;  %4721 = vmatpush3.bf16.msra.mxu0 %v5247_v8 }
  0x55   : > { %4784 = vmatprep.subr.bf16.mxu1 %v5244_v3  ;;  %4722 = vmatprep.subr.bf16.mxu0 %v5250_v10 }
  0x58   : > { %4785 = vmatpush3.bf16.msra.mxu1 %v5245_v4  ;;  %4723 = vmatpush3.bf16.msra.mxu0 %v5254_v20 }
  0x59   : > { %4786 = vmatprep.subr.bf16.mxu1 %v5248_v6  ;;  %4836 = vmatprep.subr.bf16.mxu0 %v5260_v21 }
  0x5c   : > { %4787 = vmatpush3.bf16.msra.mxu1 %v5249_v9 }
  0x5d   : > { %4900 = vmatprep.subr.bf16.mxu1 %v5285_v22 }
  0xf5   : > { %v5009_v24 = vpop.f32.mrf.mxu0 }
  0xf6   : > { %v567_v25 = vadd.f32 %v5009_v24, %v5783_v23 }
  0xf7   : > { %v558_v26 = vpop.f32.mrf.mxu0  ;;  %v956_v28 = vpop.f32.mrf.mxu1 }
  0xf8   : > { %v623_v27 = vmax.f32 %v567_v25, 0.0  ;;  %v559_v29 = vadd.f32 %v5783_v23, %v558_v26  ;;  %v957_v36 = vadd.f32 %v5783_v23, %v956_v28 }
  0xf9   : > { %v5010_v30 = vpop.f32.mrf.mxu0  ;;  %v5027_v33 = vpop.f32.mrf.mxu1 }
  0xfa   : > { %v4678_v31 = vpack.c.bf16 %v623_v27, %v623_v27  ;;  %v621_v32 = vmax.f32 %v559_v29, 0.0  ;;  %v570_v34 = vadd.f32 %v5010_v30, %v5783_v23  ;;  %v963_v54 = vmax.f32 %v957_v36, 0.0 }
  0xfb   : > { %v561_v37 = vpop.f32.mrf.mxu0  ;;  %v959_v42 = vpop.f32.mrf.mxu1 }
  0xfc   : > { %v705_v38 = vshrl.u32 %v4678_v31, 16  ;;  %v708_v39 = vshll.u32 %v4678_v31, 16  ;;  %v4676_v40 = vpack.c.bf16 %v621_v32, %v621_v32  ;;  %v624_v41 = vmax.f32 %v570_v34, 0.0  ;;  %v854_v32 = vld [vmem:[#allocation2 + $0x14] sm:$0x1] }
  0xfd   : > { %v960_v43 = vadd.f32 %v5783_v23, %v959_v42  ;;  %v562_v45 = vadd.f32 %v5783_v23, %v561_v37  ;;  %v5013_v46 = vpop.f32.mrf.mxu0  ;;  %v5028_v51 = vpop.f32.mrf.mxu1 }
  0xfe   : > { %v707_v47 = vrot.slane %v705_v38, 7  ;;  %v688_v48 = vshrl.u32 %v4676_v40, 16  ;;  %v691_v49 = vshll.u32 %v4676_v40, 16  ;;  %v4679_v50 = vpack.c.bf16 %v624_v41, %v624_v41 }
  0xff   : > { %v964_v55 = vmax.f32 %v960_v43, 0.0  ;;  %v622_v56 = vmax.f32 %v562_v45, 0.0  ;;  %v583_v57 = vadd.f32 %v5013_v46, %v5783_v23  ;;  %v574_v58 = vpop.f32.mrf.mxu0  ;;  %v996_v43 = vld [vmem:[#allocation2] sm:$0xf]  ;;  %v871_v46 = vld [vmem:[#allocation2 + $0x30] sm:$0xf] }
 0x100   : > { %v710_v59 = vor.u32 %v708_v39, %v707_v47  ;;  %v711_v60 = vrot.slane %v707_v47, 4  ;;  %v690_v61 = vrot.slane %v688_v48, 7  ;;  %v713_v62 = vshrl.u32 %v4679_v50, 16 }
 0x101   : > { %v716_v0 = vshll.u32 %v4679_v50, 16  ;;  %v965_v1 = vpack.c.bf16 %v964_v55, %v963_v54  ;;  %v4677_v2 = vpack.c.bf16 %v622_v56, %v622_v56  ;;  %v627_v3 = vmax.f32 %v583_v57, 0.0  ;;  %v5014_v4 = vpop.f32.mrf.mxu0  ;;  %v1000_v50 = vld [vmem:[#allocation2 + $0x8] sm:$0x1] }
 0x102   : > { %v858_v5 = vsel %vm5797_vm11, %v710_v59, %v857_v53  ;;  %v693_v6 = vor.u32 %v691_v49, %v690_v61  ;;  %v694_v8 = vrot.slane %v690_v61, 4  ;;  %v715_v9 = vrot.slane %v713_v62, 7 }
 0x103   : > { %859 = vst [vmem:[#allocation2 + $0x18] sm:$0xf] %v858_v5  ;;  %v970_v12 = vsel %vm5790_vm10, %v965_v1, 0  ;;  %v696_v13 = vshrl.u32 %v4677_v2, 16  ;;  %v699_v14 = vshll.u32 %v4677_v2, 16  ;;  %v4682_v15 = vpack.c.bf16 %v627_v3, %v627_v3  ;;  %v577_v16 = vpop.f32.mrf.mxu0 }
 0x104   : > { %v851_v17 = vsel %vm5797_vm11, %v693_v6, %v850_v63  ;;  %v718_v19 = vor.u32 %v716_v0, %v715_v9  ;;  %v720_v20 = vrot.slane %v715_v9, 4  ;;  %v4463_v21 = vcombine.low %v970_v12, %v970_v12 }
 0x105   : > { %852 = vst [vmem:[#allocation2 + $0xc] sm:$0xf] %v851_v17  ;;  %v4464_v22 = vcombine.high %v970_v12, %v970_v12  ;;  %v698_v24 = vrot.slane %v696_v13, 7  ;;  %v739_v25 = vshrl.u32 %v4682_v15, 16  ;;  %v742_v26 = vshll.u32 %v4682_v15, 16  ;;  %v5017_v27 = vpop.f32.mrf.mxu0 }
 0x106   : > { %v719_v28 = vsel %vm5806_vm12, %v711_v60, %v718_v19  ;;  %v862_v29 = vsel %vm5721_vm5, %v720_v20, %v861_v11  ;;  %v977_v30 = vshrl.u32 %v4463_v21, 16  ;;  %v980_v31 = vshll.u32 %v4463_v21, 16  ;;  %v864_v20 = vld [vmem:[#allocation2 + $0x24] sm:$0xf] }
 0x107   : > { %860 = vst [vmem:[#allocation2 + $0x1c] sm:$0xf] %v719_v28  ;;  %863 = vst [vmem:[#allocation2 + $0x20] sm:$0x1] %v862_v29  ;;  %v985_v33 = vshrl.u32 %v4464_v22, 16  ;;  %v988_v34 = vshll.u32 %v4464_v22, 16  ;;  %v701_v35 = vor.u32 %v699_v14, %v698_v24  ;;  %v590_v37 = vpop.f32.mrf.mxu0  ;;  %v575_v40 = vadd.f32 %v5783_v23, %v574_v58 }
 0x108   : > { %v703_v36 = vrot.slane %v698_v24, 4  ;;  %v979_v38 = vrot.slane %v977_v30, 7  ;;  %v5818_v39 = vrot.slane %v739_v25, 7  ;;  %v586_v41 = vadd.f32 %v5014_v4, %v5783_v23  ;;  %v875_v29 = vld [vmem:[#allocation2 + $0x38] sm:$0x1] }
 0x109   : > { %v987_v42 = vrot.slane %v985_v33, 7  ;;  %v702_v44 = vsel %vm5806_vm12, %v694_v8, %v701_v35  ;;  %v578_v47 = vadd.f32 %v5783_v23, %v577_v16  ;;  %v5018_v53 = vpop.f32.mrf.mxu0  ;;  %v625_v57 = vmax.f32 %v575_v40, 0.0 }
 0x10a   : > { %v855_v45 = vsel %vm5721_vm5, %v703_v36, %v854_v32  ;;  %v982_v48 = vor.u32 %v980_v31, %v979_v38  ;;  %v983_v49 = vrot.slane %v979_v38, 4  ;;  %853 = vst [vmem:[#allocation2 + $0x10] sm:$0xf] %v702_v44  ;;  %v744_v51 = vor.u32 %v742_v26, %v5818_v39  ;;  %v1525_v54 = vld [vmem:[#allocation2 + $0x18] sm:$0xf]  ;;  %v5839_v26 = vpop.f32.mrf.mxu1 }
 0x10b   : > { %856 = vst [vmem:[#allocation2 + $0x14] sm:$0x1] %v855_v45  ;;  %v990_v55 = vor.u32 %v988_v34, %v987_v42  ;;  %v992_v56 = vrot.slane %v987_v42, 4  ;;  %v628_v58 = vmax.f32 %v586_v41, 0.0  ;;  %1541 = vst [vmem:[#allocation3 + $0x54] sm:$0xf] %v1525_v54  ;;  %v4680_v2 = vpack.c.bf16 %v625_v57, %v625_v57  ;;  %v593_v6 = vpop.f32.mrf.mxu0 }
 0x10c   : > { %v1105_v59 = vld [vmem:[#allocation2 + $0x18] sm:$0xf]  ;;  %v997_v60 = vsel %vm5797_vm11, %v982_v48, %v996_v43  ;;  %v872_v61 = vsel %vm5797_vm11, %v744_v51, %v871_v46  ;;  %v626_v62 = vmax.f32 %v578_v47, 0.0  ;;  %v1523_v63 = vld [vmem:[#allocation2 + $0xc] sm:$0xf]  ;;  %v599_v9 = vadd.f32 %v5017_v27, %v5783_v23  ;;  %v5033_v40 = vpop.f32.mrf.mxu1 }
 0x10d   : > { %1121 = vst [vmem:[#allocation3 + $0x90] sm:$0xf] %v1105_v59  ;;  %v991_v0 = vsel %vm5806_vm12, %v983_v49, %v990_v55  ;;  %998 = vst [vmem:[#allocation2] sm:$0xf] %v997_v60  ;;  %v1001_v1 = vsel %vm5721_vm5, %v992_v56, %v1000_v50  ;;  %v4683_v3 = vpack.c.bf16 %v628_v58, %v628_v58  ;;  %v1103_v4 = vld [vmem:[#allocation2 + $0xc] sm:$0xf]  ;;  %v5021_v16 = vpop.f32.mrf.mxu0 }
 0x10e   : > { %873 = vst [vmem:[#allocation2 + $0x30] sm:$0xf] %v872_v61  ;;  %1539 = vst [vmem:[#allocation3 + $0xc] sm:$0xf] %v1523_v63  ;;  %v4681_v5 = vpack.c.bf16 %v626_v62, %v626_v62  ;;  %v722_v8 = vshrl.u32 %v4680_v2, 16  ;;  %v725_v12 = vshll.u32 %v4680_v2, 16  ;;  %v591_v25 = vadd.f32 %v5783_v23, %v590_v37  ;;  %v5853_v50 = vpop.f32.mrf.mxu1 }
 0x10f   : > { %999 = vst [vmem:[#allocation2 + $0x4] sm:$0xf] %v991_v0  ;;  %1002 = vst [vmem:[#allocation2 + $0x8] sm:$0x1] %v1001_v1  ;;  %v1526_v11 = vld [vmem:[#allocation2 + $0x1c] sm:$0xf]  ;;  %v602_v31 = vadd.f32 %v5018_v53, %v5783_v23  ;;  %v594_v38 = vadd.f32 %v5783_v23, %v593_v6  ;;  %v615_v60 = vadd.f32 %v5021_v16, %v5783_v23 }
 0x110   : > { %1119 = vst [vmem:[#allocation3 + $0x48] sm:$0xf] %v1103_v4  ;;  %v747_v13 = vshrl.u32 %v4683_v3, 16  ;;  %v750_v14 = vshll.u32 %v4683_v3, 16  ;;  %v730_v15 = vshrl.u32 %v4681_v5, 16  ;;  %v745_v17 = vrot.slane %v5818_v39, 4  ;;  %v606_v39 = vpop.f32.mrf.mxu0  ;;  %v5034_v62 = vpop.f32.mrf.mxu1 }
 0x111   : > { %1542 = vst [vmem:[#allocation3 + $0x78] sm:$0xf] %v1526_v11  ;;  %v724_v19 = vrot.slane %v722_v8, 7  ;;  %v733_v24 = vshll.u32 %v4681_v5, 16  ;;  %v631_v30 = vmax.f32 %v599_v9, 0.0  ;;  %v629_v48 = vmax.f32 %v591_v25, 0.0 }
 0x112   : > { %v749_v21 = vrot.slane %v747_v13, 7  ;;  %v732_v22 = vrot.slane %v730_v15, 7  ;;  %v1524_v32 = vld [vmem:[#allocation2 + $0x10] sm:$0xf]  ;;  %v868_v36 = vld [vmem:[#allocation2 + $0x2c] sm:$0x1]  ;;  %v5022_v61 = vpop.f32.mrf.mxu0  ;;  %v607_v2 = vadd.f32 %v5783_v23, %v606_v39 }
 0x113   : > { %v727_v28 = vor.u32 %v725_v12, %v724_v19  ;;  %v728_v27 = vrot.slane %v724_v19, 4  ;;  %1540 = vst [vmem:[#allocation3 + $0x30] sm:$0xf] %v1524_v32  ;;  %v5843_v41 = vld [vmem:[#allocation2 + $0x1c] sm:$0xf]  ;;  %v4686_v43 = vpack.c.bf16 %v631_v30, %v631_v30  ;;  %v632_v55 = vmax.f32 %v602_v31, 0.0 }
 0x114   : > { %v752_v33 = vor.u32 %v750_v14, %v749_v21  ;;  %v754_v34 = vrot.slane %v749_v21, 4  ;;  %v735_v35 = vor.u32 %v733_v24, %v732_v22  ;;  %v737_v42 = vrot.slane %v732_v22, 4  ;;  %v1559_v44 = vld [vmem:[#allocation2 + $0x1c] sm:$0xf]  ;;  %v1101_v49 = vld [vmem:[#allocation2] sm:$0xf] }
 0x115   : > { %v865_v37 = vsel %vm5797_vm11, %v727_v28, %v864_v20  ;;  %v773_v53 = vshrl.u32 %v4686_v43, 16  ;;  %v776_v54 = vshll.u32 %v4686_v43, 16  ;;  %1117 = vst [vmem:[#allocation3] sm:$0xf] %v1101_v49  ;;  %v1973_v57 = vld [vmem:[#allocation2 + $0x1c] sm:$0xf]  ;;  %v4684_v58 = vpack.c.bf16 %v629_v48, %v629_v48 }
 0x116   : > { %866 = vst [vmem:[#allocation2 + $0x24] sm:$0xf] %v865_v37  ;;  %v753_v45 = vsel %vm5806_vm12, %v745_v17, %v752_v33  ;;  %v876_v46 = vsel %vm5721_vm5, %v754_v34, %v875_v29  ;;  %v736_v47 = vsel %vm5806_vm12, %v728_v27, %v735_v35  ;;  %v869_v51 = vsel %vm5721_vm5, %v737_v42, %v868_v36  ;;  %v1102_v56 = vld [vmem:[#allocation2 + $0x4] sm:$0xf]  ;;  %v5858_v63 = vld [vmem:[#allocation2 + $0x10] sm:$0xf]  ;;  %v609_v42 = vpop.f32.mrf.mxu0 }
 0x117   : > { %874 = vst [vmem:[#allocation2 + $0x34] sm:$0xf] %v753_v45  ;;  %877 = vst [vmem:[#allocation2 + $0x38] sm:$0x1] %v876_v46  ;;  %v630_v59 = vmax.f32 %v594_v38, 0.0  ;;  %v775_v0 = vrot.slane %v773_v53, 7  ;;  %v4687_v1 = vpack.c.bf16 %v632_v55, %v632_v55  ;;  %v618_v3 = vadd.f32 %v5022_v61, %v5783_v23 }
 0x118   : > { %867 = vst [vmem:[#allocation2 + $0x28] sm:$0xf] %v736_v47  ;;  %870 = vst [vmem:[#allocation2 + $0x2c] sm:$0x1] %v869_v51  ;;  %v1104_v4 = vld [vmem:[#allocation2 + $0x10] sm:$0xf]  ;;  %v5871_v33 = vadd.f32 %v5783_v23, %v5839_v26 }
 0x119   : > { %1118 = vst [vmem:[#allocation3 + $0x24] sm:$0xf] %v1102_v56  ;;  %v1222_v5 = vshrl.u32 %v5843_v41, 16  ;;  %v1617_v6 = vshrl.u32 %v1559_v44, 16  ;;  %v885_v8 = vld [vmem:[#allocation2 + $0x48] sm:$0xf]  ;;  %v778_v14 = vor.u32 %v776_v54, %v775_v0  ;;  %v4685_v20 = vpack.c.bf16 %v630_v59, %v630_v59 }
 0x11a   : > { %v756_v9 = vshrl.u32 %v4684_v58, 16  ;;  %v759_v11 = vshll.u32 %v4684_v58, 16  ;;  %1120 = vst [vmem:[#allocation3 + $0x6c] sm:$0xf] %v1104_v4  ;;  %v2010_v12 = vshrl.u32 %v1973_v57, 16  ;;  %v781_v15 = vshrl.u32 %v4687_v1, 16 }
 0x11b   : > { %v1556_v13 = vld [vmem:[#allocation2 + $0x10] sm:$0xf]  ;;  %v784_v16 = vshll.u32 %v4687_v1, 16  ;;  %v1198_v17 = vshrl.u32 %v5858_v63, 16  ;;  %v635_v21 = vmax.f32 %v615_v60, 0.0  ;;  %v886_v24 = vsel %vm5797_vm11, %v778_v14, %v885_v8  ;;  %v5295_v48 = vld [vmem:[#allocation4 + $0x1b0] sm:$0xff]  }
 0x11c   : > { %v5864_v19 = vrot.slane %v756_v9, 7  ;;  %v1106_v22 = vld [vmem:[#allocation2 + $0x1c] sm:$0xf]  ;;  %v783_v28 = vrot.slane %v781_v15, 7  ;;  %v633_v27 = vmax.f32 %v607_v2, 0.0  ;;  %v636_v29 = vmax.f32 %v618_v3, 0.0 }
 0x11d   : > { %v878_v25 = vld [vmem:[#allocation2 + $0x3c] sm:$0xf]  ;;  %1122 = vst [vmem:[#allocation3 + $0xb4] sm:$0xf] %v1106_v22  ;;  %v1593_v30 = vshrl.u32 %v1556_v13, 16  ;;  %v779_v31 = vrot.slane %v775_v0, 4  ;;  %v4690_v37 = vpack.c.bf16 %v635_v21, %v635_v21  ;;  %v610_v58 = vadd.f32 %v5783_v23, %v609_v42 }
 0x11e   : > { %887 = vst [vmem:[#allocation2 + $0x48] sm:$0xf] %v886_v24  ;;  %v761_v32 = vor.u32 %v759_v11, %v5864_v19  ;;  %v5873_v34 = vrot.slane %v1222_v5, 4  ;;  %v5875_v35 = vld [vmem:[#allocation2 + $0x24] sm:$0xe]  ;;  %v786_v36 = vor.u32 %v784_v16, %v783_v28  ;;  %v5877_v38 = vrot.slane %v1617_v6, 4 }
 0x11f   : > { %v764_v40 = vshrl.u32 %v4685_v20, 16  ;;  %v5881_v43 = vrot.slane %v2010_v12, 4  ;;  %v5883_v44 = vrot.slane %v1198_v17, 4  ;;  %v5885_v45 = vld [vmem:[#allocation2 + $0x34] sm:$0xf]  ;;  %v4688_v26 = vpack.c.bf16 %v633_v27, %v633_v27 }
 0x120   : > { %v879_v39 = vsel %vm5797_vm11, %v761_v32, %v878_v25  ;;  %v4691_v46 = vpack.c.bf16 %v636_v29, %v636_v29  ;;  %v5887_v47 = vrot.slane %v1593_v30, 4  ;;  %v787_v49 = vsel %vm5806_vm12, %v779_v31, %v786_v36  ;;  %v889_v51 = vld [vmem:[#allocation2 + $0x50] sm:$0x1]  ;;  %v1565_v54 = vld [vmem:[#allocation2 + $0x34] sm:$0xf] }
 0x121   : > { %880 = vst [vmem:[#allocation2 + $0x3c] sm:$0xf] %v879_v39  ;;  %v767_v53 = vshll.u32 %v4685_v20, 16  ;;  %v762_v55 = vrot.slane %v5864_v19, 4  ;;  %v788_v56 = vrot.slane %v783_v28, 4  ;;  %v1270_v60 = vshrl.u32 %v5885_v45, 16 }
 0x122   : > { %888 = vst [vmem:[#allocation2 + $0x4c] sm:$0xf] %v787_v49  ;;  %v882_v57 = vld [vmem:[#allocation2 + $0x44] sm:$0x1]  ;;  %v766_v61 = vrot.slane %v764_v40, 7  ;;  %v807_v62 = vshrl.u32 %v4690_v37, 16 }
 0x123   : > { %v1527_v59 = vld [vmem:[#allocation2 + $0x24] sm:$0xf]  ;;  %v810_v0 = vshll.u32 %v4690_v37, 16  ;;  %v1528_v1 = vld [vmem:[#allocation2 + $0x28] sm:$0xf]  ;;  %v890_v2 = vsel %vm5721_vm5, %v788_v56, %v889_v51  ;;  %v790_v4 = vshrl.u32 %v4688_v26, 16 }
 0x124   : > { %1543 = vst [vmem:[#allocation3 + $0x9c] sm:$0xf] %v1527_v59  ;;  %v899_v3 = vld [vmem:[#allocation2 + $0x60] sm:$0xf]  ;;  %v793_v5 = vshll.u32 %v4688_v26, 16  ;;  %v815_v6 = vshrl.u32 %v4691_v46, 16  ;;  %v769_v9 = vor.u32 %v767_v53, %v766_v61 }
 0x125   : > { %1544 = vst [vmem:[#allocation3 + $0xc0] sm:$0xf] %v1528_v1  ;;  %v1979_v8 = vld [vmem:[#allocation2 + $0x34] sm:$0xf]  ;;  %891 = vst [vmem:[#allocation2 + $0x50] sm:$0x1] %v890_v2 }
 0x126   : > { %v771_v11 = vrot.slane %v766_v61, 4  ;;  %v809_v12 = vrot.slane %v807_v62, 7  ;;  %v892_v13 = vld [vmem:[#allocation2 + $0x54] sm:$0xf]  ;;  %v818_v14 = vshll.u32 %v4691_v46, 16  ;;  %v1665_v16 = vshrl.u32 %v1565_v54, 16 }
 0x127   : > { %v5897_v15 = vld [vmem:[#allocation2] sm:$0xe]  ;;  %v5899_v17 = vld [vmem:[#allocation2 + $0x28] sm:$0xf]  ;;  %v5901_v19 = vrot.slane %v790_v4, 7  ;;  %v817_v20 = vrot.slane %v815_v6, 7  ;;  %v770_v24 = vsel %vm5806_vm12, %v762_v55, %v769_v9  ;;  %v5915_v55 = vadd.f32 %v5783_v23, %v5853_v50 }
 0x128   : > { %v903_v21 = vld [vmem:[#allocation2 + $0x68] sm:$0x1]  ;;  %v634_v22 = vmax.f32 %v610_v58, 0.0  ;;  %v883_v25 = vsel %vm5721_vm5, %v771_v11, %v882_v57  ;;  %v812_v28 = vor.u32 %v810_v0, %v809_v12  ;;  %v813_v27 = vrot.slane %v809_v12, 4  ;;  %v1385_v29 = vld [vmem:[#allocation2 + $0x4] sm:$0xf] }
 0x129   : > { %v1529_v30 = vld [vmem:[#allocation2 + $0x30] sm:$0xf]  ;;  %v2058_v31 = vshrl.u32 %v1979_v8, 16  ;;  %881 = vst [vmem:[#allocation2 + $0x40] sm:$0xf] %v770_v24  ;;  %v795_v32 = vor.u32 %v793_v5, %v5901_v19  ;;  %v820_v36 = vor.u32 %v818_v14, %v817_v20  ;;  %v822_v39 = vrot.slane %v817_v20, 4 }
 0x12a   : > { %884 = vst [vmem:[#allocation2 + $0x44] sm:$0x1] %v883_v25  ;;  %v1387_v40 = vld [vmem:[#allocation2 + $0xc] sm:$0xe]  ;;  %v1388_v37 = vld [vmem:[#allocation2 + $0x10] sm:$0xf]  ;;  %v900_v53 = vsel %vm5797_vm11, %v812_v28, %v899_v3  ;;  %v4689_v54 = vpack.c.bf16 %v634_v22, %v634_v22 }
 0x12b   : > { %v1530_v42 = vld [vmem:[#allocation2 + $0x34] sm:$0xf]  ;;  %1545 = vst [vmem:[#allocation3 + $0xe4] sm:$0xf] %v1529_v30  ;;  %v1107_v26 = vld [vmem:[#allocation2 + $0x24] sm:$0xf]  ;;  %v893_v58 = vsel %vm5797_vm11, %v795_v32, %v892_v13  ;;  %v821_v62 = vsel %vm5806_vm12, %v813_v27, %v820_v36  ;;  %v904_v0 = vsel %vm5721_vm5, %v822_v39, %v903_v21 }
 0x12c   : > { %v1246_v46 = vshrl.u32 %v5899_v17, 16  ;;  %v1562_v49 = vld [vmem:[#allocation2 + $0x28] sm:$0xf]  ;;  %1546 = vst [vmem:[#allocation3 + $0x108] sm:$0xf] %v1530_v42  ;;  %v5917_v56 = vrot.slane %v1270_v60, 4 }
 0x12d   : > { %v5909_v51 = vld [vmem:[#allocation2 + $0x28] sm:$0xf]  ;;  %1123 = vst [vmem:[#allocation3 + $0xd8] sm:$0xf] %v1107_v26  ;;  %v5919_v57 = vrot.slane %v1665_v16, 4  ;;  %v4471_v59 = vrot.slane %v5897_v15, 9 }
 0x12e   : > { %901 = vst [vmem:[#allocation2 + $0x60] sm:$0xf] %v900_v53  ;;  %v1108_v61 = vld [vmem:[#allocation2 + $0x28] sm:$0xf]  ;;  %894 = vst [vmem:[#allocation2 + $0x54] sm:$0xf] %v893_v58 }
 0x12f   : > { %v798_v23 = vshrl.u32 %v4689_v54, 16  ;;  %v801_v50 = vshll.u32 %v4689_v54, 16  ;;  %v1386_v60 = vld [vmem:[#allocation2 + $0x8] sm:$0x1]  ;;  %v1389_v2 = vld [vmem:[#allocation2 + $0x14] sm:$0x1] }
 0x130   : > { %1124 = vst [vmem:[#allocation3 + $0xfc] sm:$0xf] %v1108_v61  ;;  %v5934_v3 = vrot.slane %v2058_v31, 4  ;;  %v1641_v4 = vshrl.u32 %v1562_v49, 16  ;;  %v2034_v5 = vshrl.u32 %v5909_v51, 16  ;;  %v1437_v6 = vrot.slane %v1385_v29, 5 }
 0x131   : > { %902 = vst [vmem:[#allocation2 + $0x64] sm:$0xf] %v821_v62  ;;  %905 = vst [vmem:[#allocation2 + $0x68] sm:$0x1] %v904_v0  ;;  %v1133_v8 = vld [vmem:[#allocation2] sm:$0xf] }
 0x132   : > { %v5937_v9 = vld [vmem:[#allocation2 + $0x28] sm:$0xf]  ;;  %v796_v11 = vrot.slane %v5901_v19, 4  ;;  %v800_v12 = vrot.slane %v798_v23, 7  ;;  %v4472_v13 = vrot.slane %v1387_v40, 9  ;;  %v1444_v14 = vrot.slane %v1388_v37, 5 }
 0x133   : > { %v5940_v15 = vrot.slane %v1246_v46, 4  ;;  %v896_v16 = vld [vmem:[#allocation2 + $0x5c] sm:$0x1]  ;;  %v1438_v20 = vsel %vm5930_vm15, %v4471_v59, %v1437_v6  ;;  %v1439_v21 = vrot.slane %v1437_v6, 4  ;;  %v1440_v22 = vrot.slane %v1386_v60, 5  ;;  %v5384_v1 = vld [vmem:[%s6768_s5 + $0x30] sm:$0xff]  }
 0x134   : > { %v5944_v24 = vld [vmem:[#allocation2 + $0x4c] sm:$0xf]  ;;  %v803_v25 = vor.u32 %v801_v50, %v800_v12  ;;  %1507 = vst [vmem:[#allocation3 + $0x8] sm:$0xf] %v1438_v20  ;;  %v1445_v28 = vsel %vm5930_vm15, %v4472_v13, %v1444_v14  ;;  %v1447_v27 = vrot.slane %v1389_v2, 5  ;;  %v1161_v29 = vshrl.u32 %v1133_v8, 16 }
 0x135   : > { %v1134_v19 = vld [vmem:[#allocation2 + $0x4] sm:$0xf]  ;;  %v6775_v30 = vrot.slane %v5937_v9, 5  ;;  %v5949_v31 = vld [vmem:[#allocation2 + $0x4c] sm:$0xf]  ;;  %v805_v32 = vrot.slane %v800_v12, 4  ;;  %v1441_v42 = vsel %vm5930_vm15, %v1439_v21, %v1440_v22 }
 0x136   : > { %1509 = vst [vmem:[#allocation3 + $0x50] sm:$0xf] %v1445_v28  ;;  %v1136_v36 = vld [vmem:[#allocation2 + $0xc] sm:$0xf]  ;;  %v1531_v39 = vld [vmem:[#allocation2 + $0x3c] sm:$0xf]  ;;  %v804_v37 = vsel %vm5806_vm12, %v796_v11, %v803_v25 }
 0x137   : > { %v5951_v40 = vrot.slane %v1641_v4, 4  ;;  %v1446_v26 = vrot.slane %v1444_v14, 4  ;;  %v1532_v46 = vld [vmem:[#allocation2 + $0x40] sm:$0xf]  ;;  %1547 = vst [vmem:[#allocation3 + $0x12c] sm:$0xf] %v1531_v39  ;;  %v897_v54 = vsel %vm5721_vm5, %v805_v32, %v896_v16 }
 0x138   : > { %v1109_v49 = vld [vmem:[#allocation2 + $0x30] sm:$0xf]  ;;  %v1985_v51 = vld [vmem:[#allocation2 + $0x4c] sm:$0xf]  ;;  %v5957_v53 = vld [vmem:[#allocation2 + $0x40] sm:$0xf] }
 0x139   : > { %895 = vst [vmem:[#allocation2 + $0x58] sm:$0xf] %v804_v37  ;;  %1508 = vst [vmem:[#allocation3 + $0x2c] sm:$0xf] %v1441_v42  ;;  %v1110_v58 = vld [vmem:[#allocation2 + $0x34] sm:$0xf]  ;;  %v1448_v61 = vsel %vm5930_vm15, %v1446_v26, %v1447_v27 }
 0x13a   : > { %1548 = vst [vmem:[#allocation3 + $0x150] sm:$0xf] %v1532_v46  ;;  %1125 = vst [vmem:[#allocation3 + $0x120] sm:$0xf] %v1109_v49  ;;  %v1568_v59 = vld [vmem:[#allocation2 + $0x40] sm:$0xf] }
 0x13b   : > { %898 = vst [vmem:[#allocation2 + $0x5c] sm:$0x1] %v897_v54  ;;  %v1135_v62 = vld [vmem:[#allocation2 + $0x8] sm:$0x1]  ;;  %v1163_v0 = vrot.slane %v1161_v29, 4  ;;  %v1164_v23 = vshll.u32 %v1133_v8, 16 }
 0x13c   : > { %v1170_v50 = vshll.u32 %v1134_v19, 16  ;;  %v1390_v60 = vld [vmem:[#allocation2 + $0x18] sm:$0xe]  ;;  %v5963_v2 = vld [vmem:[#allocation2 + $0x1c] sm:$0xf]  ;;  %v5965_v4 = vrot.slane %v2034_v5, 4 }
 0x13d   : > { %1126 = vst [vmem:[#allocation3 + $0x144] sm:$0xf] %v1110_v58  ;;  %v1318_v6 = vshrl.u32 %v5944_v24, 16  ;;  %v1713_v11 = vshrl.u32 %v5949_v31, 16  ;;  %v1982_v12 = vld [vmem:[#allocation2 + $0x40] sm:$0xf] }
 0x13e   : > { %1510 = vst [vmem:[#allocation3 + $0x74] sm:$0xf] %v1448_v61  ;;  %v1174_v13 = vshrl.u32 %v1134_v19, 16  ;;  %v1138_v14 = vld [vmem:[#allocation2 + $0x14] sm:$0x1]  ;;  %v1166_v20 = vrot.slane %v1164_v23, 5 }
 0x13f   : > { %v5969_v16 = vld [vmem:[#allocation2 + $0x2c] sm:$0x1]  ;;  %v1172_v21 = vrot.slane %v1170_v50, 5  ;;  %v1185_v8 = vshrl.u32 %v1136_v36, 16  ;;  %v1188_v22 = vshll.u32 %v1136_v36, 16  ;;  %v2106_v25 = vshrl.u32 %v1985_v51, 16 }
 0x140   : > { %v1294_v28 = vshrl.u32 %v5957_v53, 16  ;;  %v1689_v27 = vshrl.u32 %v1568_v59, 16  ;;  %v1176_v5 = vrot.slane %v1174_v13, 4  ;;  %v2082_v29 = vshrl.u32 %v1982_v12, 16  ;;  %v1392_v51 = vld [vmem:[#allocation2 + $0x20] sm:$0x1] }
 0x141   : > { %v1167_v32 = vor.u32 %v1166_v20, %v1163_v0  ;;  %v1187_v39 = vrot.slane %v1185_v8, 4  ;;  %v1190_v37 = vrot.slane %v1188_v22, 5  ;;  %v1180_v42 = vshll.u32 %v1135_v62, 16  ;;  %v5288_v58 = vld [vmem:[#allocation4 + $0x1b8] sm:$0xff]   ;;  %v5251_v62 = vld [vmem:[#allocation3 + $0x8] ss:$36 sps:$4 sm:$0xff]  }
 0x142   : > { %v1177_v31 = vor.u32 %v1176_v5, %v1172_v21  ;;  %v4473_v26 = vrot.slane %v1390_v60, 9  ;;  %v1451_v19 = vrot.slane %v5963_v2, 5  ;;  %v1194_v54 = vshll.u32 %v5858_v63, 16  ;;  %v1139_v50 = vld [vmem:[#allocation2 + $0x18] sm:$0xf]  ;;  %v5292_v60 = vld [vmem:[#allocation4 + $0x1f0] sm:$0xff]  }
 0x143   : > { %v1191_v49 = vor.u32 %v1190_v37, %v1187_v39  ;;  %v1204_v36 = vshll.u32 %v1138_v14, 16  ;;  %v5977_v59 = vrot.slane %v6775_v30, 4  ;;  %v5979_v61 = vrot.slane %v1318_v6, 4  ;;  %v5253_v12 = vld [vmem:[#allocation3 + $0xc] ss:$36 sps:$4 sm:$0xff]  }
 0x144   : > { %v5981_v0 = vrot.slane %v1713_v11, 4  ;;  %v1452_v23 = vsel %vm5930_vm15, %v4473_v26, %v1451_v19  ;;  %v5985_v2 = vrot.slane %v2106_v25, 4  ;;  %v5987_v63 = vrot.slane %v1294_v28, 4  ;;  %v1141_v20 = vld [vmem:[#allocation2 + $0x20] sm:$0x1]  ;;  %3516 = vmatprep.mubr.bf16.mxu1 %v5253_v12  ;;  %v6001_v37 = vld [vmem:[#allocation3 + $0x50] sm:$0xff] }
 0x145   : > { %v5989_v13 = vld [vmem:[#allocation3 + $0x74] sm:$0xff]  ;;  %v1168_v14 = vrot.slane %v1167_v32, 4  ;;  %1511 = vst [vmem:[#allocation3 + $0x98] sm:$0xf] %v1452_v23  ;;  %v1393_v6 = vld [vmem:[#allocation2 + $0x24] sm:$0xe]  ;;  %3517 = vmatmul.mubr.bf16.vlgmr.msra.gmra.mxu1 %v5251_v62 }
 0x146   : > { %6798 = vst [vmem:[#allocation12_spill] sm:$0xff] %v5981_v0  ;;  %v5991_v8 = vrot.slane %v1689_v27, 4  ;;  %v5993_v11 = vrot.slane %v2082_v29, 4  ;;  %v5255_v22 = vld [vmem:[#allocation3 + $0x54] ss:$36 sps:$4 sm:$0xff]   ;;  %v1178_v25 = vrot.slane %v1177_v31, 4  ;;  %v4507_v31 = vcombine.low %v6001_v37, %v5989_v13  ;;  %4901 = vmatpush3.bf16.msra.mxu1 %v5288_v58 }
 0x147   : > { %v1182_v28 = vrot.slane %v1180_v42, 5  ;;  %v1394_v39 = vld [vmem:[#allocation2 + $0x28] sm:$0xf]  ;;  %v1173_v32 = vsel %vm5997_vm4, %v1168_v14, %v1172_v21  ;;  %v1192_v27 = vrot.slane %v1191_v49, 4  ;;  %v1196_v26 = vrot.slane %v1194_v54, 5  ;;  %3524 = vmatprep.mubr.bf16.mxu1 %v5255_v22  ;;  %4902 = vmatprep.subr.bf16.mxu1 %v5292_v60  ;;  %v5296_v22 = vld [vmem:[#allocation4 + $0x1e8] sm:$0xff]  }
 0x148   : > { %v1206_v29 = vrot.slane %v1204_v36, 5  ;;  %v6005_v23 = vld [vmem:[#allocation2 + $0x2c] sm:$0x1]  ;;  %v1533_v46 = vld [vmem:[#allocation2 + $0x48] sm:$0xf]  ;;  %v1453_v42 = vrot.slane %v1451_v19, 4 }
 0x149   : > { %v1183_v30 = vsel %vm5997_vm4, %v1178_v25, %v1182_v28  ;;  %1368 = vst [vmem:[#allocation3 + $0x4] sm:$0xf] %v1173_v32  ;;  %v1454_v12 = vrot.slane %v1392_v51, 5  ;;  %v1534_v0 = vld [vmem:[#allocation2 + $0x4c] sm:$0xf]  ;;  %v1197_v49 = vsel %vm5997_vm4, %v1192_v27, %v1196_v26  ;;  %v1201_v54 = vor.u32 %v5883_v44, %v1196_v26 }
 0x14a   : > { %1549 = vst [vmem:[#allocation3 + $0x174] sm:$0xf] %v1533_v46  ;;  %v1111_v21 = vld [vmem:[#allocation2 + $0x3c] sm:$0xf]  ;;  %1369 = vst [vmem:[#allocation3 + $0x28] sm:$0xf] %v1183_v30  ;;  %4903 = vmatpush3.bf16.msra.mxu1 %v5295_v48 }
 0x14b   : > { %v1209_v36 = vshrl.u32 %v1139_v50, 16  ;;  %v1212_v62 = vshll.u32 %v1139_v50, 16  ;;  %v6014_v14 = vld [vmem:[#allocation2 + $0x24] sm:$0xf]  ;;  %1550 = vst [vmem:[#allocation3 + $0x198] sm:$0xf] %v1534_v0  ;;  %v1455_v19 = vsel %vm5930_vm15, %v1453_v42, %v1454_v12  ;;  %4904 = vmatprep.subr.bf16.mxu1 %v5296_v22 }
 0x14c   : > { %v1112_v25 = vld [vmem:[#allocation2 + $0x40] sm:$0xf]  ;;  %1127 = vst [vmem:[#allocation3 + $0x168] sm:$0xf] %v1111_v21  ;;  %1370 = vst [vmem:[#allocation3 + $0x4c] sm:$0xf] %v1197_v49 }
 0x14d   : > { %v1218_v46 = vshll.u32 %v5843_v41, 16  ;;  %v1228_v30 = vshll.u32 %v1141_v20, 16  ;;  %v4474_v51 = vrot.slane %v1393_v6, 9  ;;  %1128 = vst [vmem:[#allocation3 + $0x18c] sm:$0xf] %v1112_v25  ;;  %v1202_v44 = vrot.slane %v1201_v54, 4  ;;  %3525 = vmatmul.mubr.bf16.gmra.mxu1 %v4507_v31 }
 0x14e   : > { %1512 = vst [vmem:[#allocation3 + $0xbc] sm:$0xf] %v1455_v19  ;;  %v1211_v50 = vrot.slane %v1209_v36, 4  ;;  %v1214_v28 = vrot.slane %v1212_v62, 5  ;;  %v1458_v32 = vrot.slane %v1394_v39, 5  ;;  %v1461_v26 = vrot.slane %v6005_v23, 5 }
 0x14f   : > { %v6019_v0 = vld [vmem:[#allocation2 + $0x2c] sm:$0x1]  ;;  %v1220_v58 = vrot.slane %v1218_v46, 5  ;;  %v6021_v27 = vrot.slane %v1228_v30, 5  ;;  %v1233_v42 = vshrl.u32 %v6014_v14, 16  ;;  %v1207_v60 = vsel %vm5997_vm4, %v1202_v44, %v1206_v29  ;;  %v5299_v23 = vld [vmem:[#allocation4 + $0x1a8] sm:$0xff]  }
 0x150   : > { %v6025_v41 = vld [vmem:[#allocation2 + $0x30] sm:$0xe]  ;;  %v6027_v20 = vld [vmem:[#allocation2 + $0x58] sm:$0xf]  ;;  %v1215_v6 = vor.u32 %v1214_v28, %v1211_v50  ;;  %v1459_v39 = vsel %vm5930_vm15, %v4474_v51, %v1458_v32  ;;  %v1460_v12 = vrot.slane %v1458_v32, 4  ;;  %v1236_v29 = vshll.u32 %v6014_v14, 16  ;;  %4905 = vmatpush3.bf16.msra.mxu1 %v5299_v23 }
 0x151   : > { %v6033_v21 = vld [vmem:[#allocation2 + $0x34] sm:$0xf]  ;;  %v6035_v49 = vld [vmem:[#allocation2 + $0x38] sm:$0x1]  ;;  %v6037_v54 = vld [vmem:[#allocation2 + $0x30] sm:$0xf]  ;;  %v1225_v62 = vor.u32 %v5873_v34, %v1220_v58 }
 0x152   : > { %v5261_v36 = vld [vmem:[#allocation4 + $0x138] sm:$0xff]   ;;  %1371 = vst [vmem:[#allocation3 + $0x70] sm:$0xf] %v1207_v60  ;;  %1513 = vst [vmem:[#allocation3 + $0xe0] sm:$0xf] %v1459_v39  ;;  %v6040_v25 = vrot.slane %v1233_v42, 4  ;;  %v1462_v48 = vsel %vm5930_vm15, %v1460_v12, %v1461_v26 }
 0x153   : > { %v1242_v19 = vshll.u32 %v5899_v17, 16  ;;  %v1535_v46 = vld [vmem:[#allocation2 + $0x54] sm:$0xf]  ;;  %v5303_v30 = vld [vmem:[#allocation4 + $0x1e0] sm:$0xff]   ;;  %v5266_v51 = vld [vmem:[#allocation4 + $0x170] sm:$0xff]   ;;  %v1216_v44 = vrot.slane %v1215_v6, 4 }
 0x154   : > { %v1252_v50 = vshll.u32 %v6019_v0, 16  ;;  %v4475_v28 = vrot.slane %v6025_v41, 9  ;;  %v1536_v34 = vld [vmem:[#allocation2 + $0x58] sm:$0xf]  ;;  %1551 = vst [vmem:[#allocation3 + $0x1bc] sm:$0xf] %v1535_v46  ;;  %4906 = vmatprep.subr.bf16.mxu1 %v5303_v30 }
 0x155   : > { %v5306_v32 = vld [vmem:[#allocation4 + $0x1a0] sm:$0xff]   ;;  %v1226_v17 = vrot.slane %v1225_v62, 4  ;;  %1514 = vst [vmem:[#allocation3 + $0x104] sm:$0xf] %v1462_v48  ;;  %1552 = vst [vmem:[#allocation3 + $0x1e0] sm:$0xf] %v1536_v34  ;;  %v1221_v37 = vsel %vm5997_vm4, %v1216_v44, %v1220_v58 }
 0x156   : > { %v5257_v42 = vld [vmem:[#allocation3] ss:$36 sps:$4 sm:$0xff]   ;;  %v5307_v14 = vld [vmem:[#allocation4 + $0x1d8] sm:$0xff]   ;;  %v6801_v22 = vrot.slane %v5937_v9, 5  ;;  %v6802_v26 = vrot.slane %v5875_v35, 9  ;;  %v6803_v41 = vrot.slane %v5969_v16, 5  ;;  %4907 = vmatpush3.bf16.msra.mxu1 %v5306_v32 }
 0x157   : > { %v5259_v60 = vld [vmem:[#allocation3 + $0x4] ss:$36 sps:$4 sm:$0xff]   ;;  %v1342_v13 = vshrl.u32 %v6027_v20, 16  ;;  %v1238_v31 = vrot.slane %v1236_v29, 5  ;;  %v6065_v39 = vrot.slane %v1242_v19, 5  ;;  %v2382_v35 = vld [vmem:[#allocation3 + $0xbc] sm:$0xff]  ;;  %4908 = vmatprep.subr.bf16.mxu1 %v5307_v14 }
 0x158   : > { %v2278_v0 = vsel %vm5930_vm15, %v6802_v26, %v6801_v22  ;;  %v2281_v6 = vsel %vm5930_vm15, %v5977_v59, %v6803_v41  ;;  %v1113_v9 = vld [vmem:[#allocation2 + $0x48] sm:$0xf]  ;;  %3419 = vmatprep.mubr.bf16.mxu0 %v5259_v60  ;;  %v5264_v12 = vld [vmem:[#allocation3 + $0x9c] ss:$36 sps:$4 sm:$0xff]   ;;  %v1231_v59 = vsel %vm5997_vm4, %v1226_v17, %v6021_v27  ;;  %1372 = vst [vmem:[#allocation3 + $0x94] sm:$0xf] %v1221_v37 }
 0x159   : > { %2342 = vst [vmem:[#allocation3 + $0x68] sm:$0xf] %v2278_v0  ;;  %2343 = vst [vmem:[#allocation3 + $0x8c] sm:$0xf] %v2281_v6  ;;  %v5268_v16 = vld [vmem:[#allocation4 + $0x130] sm:$0xff]   ;;  %v1465_v62 = vrot.slane %v6033_v21, 5  ;;  %3420 = vmatmul.mubr.bf16.vlgmr.msra.gmra.mxu0 %v5257_v42  ;;  %v1239_v44 = vor.u32 %v1238_v31, %v6040_v25  ;;  %v1249_v27 = vor.u32 %v5940_v15, %v6065_v39  ;;  %3532 = vmatprep.mubr.bf16.mxu1 %v5264_v12 }
 0x15a   : > { %v1468_v58 = vrot.slane %v6035_v49, 5  ;;  %v6072_v29 = vld [vmem:[#allocation2 + $0x38] sm:$0x1]  ;;  %v1257_v23 = vshrl.u32 %v6037_v54, 16  ;;  %1129 = vst [vmem:[#allocation3 + $0x1b0] sm:$0xf] %v1113_v9  ;;  %4837 = vmatpush3.bf16.msra.mxu0 %v5261_v36 }
 0x15b   : > { %v6075_v19 = vld [vmem:[#allocation2 + $0x64] sm:$0xf]  ;;  %1373 = vst [vmem:[#allocation3 + $0xb8] sm:$0xf] %v1231_v59  ;;  %v1254_v48 = vrot.slane %v1252_v50, 5  ;;  %v1260_v21 = vshll.u32 %v6037_v54, 16  ;;  %v1466_v30 = vsel %vm5930_vm15, %v4475_v28, %v1465_v62  ;;  %4838 = vmatprep.subr.bf16.mxu0 %v5266_v51 }
 0x15c   : > { %v5273_v46 = vld [vmem:[#allocation4 + $0x168] sm:$0xff]   ;;  %v1399_v49 = vld [vmem:[#allocation2 + $0x3c] sm:$0xe]  ;;  %v1114_v34 = vld [vmem:[#allocation2 + $0x4c] sm:$0xf]  ;;  %v1467_v17 = vrot.slane %v1465_v62, 4 }
 0x15d   : > { %v2377_v60 = vld [vmem:[#allocation3 + $0x98] sm:$0xff]  ;;  %v1259_v42 = vrot.slane %v1257_v23, 4  ;;  %v1266_v22 = vshll.u32 %v5885_v45, 16  ;;  %v1400_v26 = vld [vmem:[#allocation2 + $0x40] sm:$0xf]  ;;  %v1240_v50 = vrot.slane %v1239_v44, 4 }
 0x15e   : > { %1130 = vst [vmem:[#allocation3 + $0x1d4] sm:$0xf] %v1114_v34  ;;  %v5262_v25 = vld [vmem:[#allocation3 + $0x4c] ss:$36 sps:$4 sm:$0xff]   ;;  %v4516_v15 = vcombine.low %v2377_v60, %v2382_v35  ;;  %1515 = vst [vmem:[#allocation3 + $0x128] sm:$0xf] %v1466_v30  ;;  %v1469_v41 = vsel %vm5930_vm15, %v1467_v17, %v1468_v58  ;;  %4839 = vmatpush3.bf16.msra.mxu0 %v5268_v16 }
 0x15f   : > { %v1401_v54 = vld [vmem:[#allocation2 + $0x44] sm:$0x1]  ;;  %v1250_v36 = vrot.slane %v1249_v27, 4  ;;  %v1262_v6 = vrot.slane %v1260_v21, 5  ;;  %v6086_v28 = vrot.slane %v1266_v22, 5  ;;  %v5310_v45 = vld [vmem:[#allocation4 + $0x198] sm:$0xff]   ;;  %3427 = vmatprep.mubr.bf16.mxu0 %v5262_v25  ;;  %v1245_v51 = vsel %vm5997_vm4, %v1240_v50, %v6065_v39  ;;  %4840 = vmatprep.subr.bf16.mxu0 %v5273_v46 }
 0x160   : > { %v5275_v0 = vld [vmem:[#allocation4 + $0x128] sm:$0xff]   ;;  %v6088_v37 = vld [vmem:[#allocation2 + $0x3c] sm:$0xf]  ;;  %1516 = vst [vmem:[#allocation3 + $0x14c] sm:$0xf] %v1469_v41  ;;  %v1276_v9 = vshll.u32 %v6072_v29, 16  ;;  %3533 = vmatmul.mubr.bf16.gmra.mxu1 %v4516_v15 }
 0x161   : > { %v5271_v31 = vld [vmem:[#allocation3 + $0xe4] ss:$36 sps:$4 sm:$0xff]   ;;  %v4476_v35 = vrot.slane %v1399_v49, 9  ;;  %v1472_v12 = vrot.slane %v1400_v26, 5  ;;  %v6094_v59 = vld [vmem:[#allocation2 + $0x44] sm:$0x1]  ;;  %v1255_v44 = vsel %vm5997_vm4, %v1250_v36, %v1254_v48  ;;  %v1263_v39 = vor.u32 %v1262_v6, %v1259_v42  ;;  %4909 = vmatpush3.bf16.msra.mxu1 %v5310_v45 }
 0x162   : > { %v5280_v32 = vld [vmem:[#allocation4 + $0x160] sm:$0xff]   ;;  %v6096_v62 = vld [vmem:[#allocation2 + $0x48] sm:$0xe]  ;;  %v1761_v14 = vshrl.u32 %v6075_v19, 16  ;;  %v5267_v23 = vld [vmem:[#allocation3 + $0x48] ss:$36 sps:$4 sm:$0xff]   ;;  %3540 = vmatprep.mubr.bf16.mxu1 %v5271_v31  ;;  %v1273_v49 = vor.u32 %v5917_v56, %v6086_v28  ;;  %4841 = vmatpush3.bf16.msra.mxu0 %v5275_v0 }
 0x163   : > { %v5314_v58 = vld [vmem:[#allocation4 + $0x1d0] sm:$0xff]   ;;  %1374 = vst [vmem:[#allocation3 + $0xdc] sm:$0xf] %v1245_v51  ;;  %v1475_v27 = vrot.slane %v1401_v54, 5  ;;  %1375 = vst [vmem:[#allocation3 + $0x100] sm:$0xf] %v1255_v44  ;;  %v1473_v16 = vsel %vm5930_vm15, %v4476_v35, %v1472_v12  ;;  %3428 = vmatmul.mubr.bf16.gmra.mxu0 %v5267_v23  ;;  %4842 = vmatprep.subr.bf16.mxu0 %v5280_v32 }
 0x164   : > { %v6101_v21 = vld [vmem:[#allocation2 + $0x4c] sm:$0xf]  ;;  %v1278_v34 = vrot.slane %v1276_v9, 5  ;;  %v1474_v60 = vrot.slane %v1472_v12, 4  ;;  %v6107_v30 = vld [vmem:[#allocation2 + $0x50] sm:$0x1]  ;;  %4910 = vmatprep.subr.bf16.mxu1 %v5314_v58 }
 0x165   : > { %v5317_v29 = vld [vmem:[#allocation4 + $0x190] sm:$0xff]   ;;  %v1537_v48 = vld [vmem:[#allocation2 + $0x60] sm:$0xf]  ;;  %v6111_v42 = vrot.slane %v1342_v13, 4  ;;  %v2387_v26 = vld [vmem:[#allocation3 + $0xe0] sm:$0xff]  ;;  %v1264_v25 = vrot.slane %v1263_v39, 4 }
 0x166   : > { %v5318_v17 = vld [vmem:[#allocation4 + $0x1c8] sm:$0xff]   ;;  %v5269_v22 = vld [vmem:[#allocation3 + $0x94] ss:$36 sps:$4 sm:$0xff]   ;;  %v5282_v46 = vld [vmem:[#allocation4 + $0x120] sm:$0xff]   ;;  %1517 = vst [vmem:[#allocation3 + $0x170] sm:$0xf] %v1473_v16  ;;  %v1476_v50 = vsel %vm5930_vm15, %v1474_v60, %v1475_v27  ;;  %4911 = vmatpush3.bf16.msra.mxu1 %v5317_v29 }
 0x167   : > { %1553 = vst [vmem:[#allocation3 + $0x204] sm:$0xf] %v1537_v48  ;;  %v2392_v56 = vld [vmem:[#allocation3 + $0x104] sm:$0xff]  ;;  %v1274_v15 = vrot.slane %v1273_v49, 4  ;;  %v5289_v54 = vld [vmem:[#allocation4 + $0x158] sm:$0xff]   ;;  %v1281_v36 = vshrl.u32 %v6088_v37, 16  ;;  %3435 = vmatprep.mubr.bf16.mxu0 %v5269_v22  ;;  %v1269_v45 = vsel %vm5997_vm4, %v1264_v25, %v6086_v28  ;;  %4912 = vmatprep.subr.bf16.mxu1 %v5318_v17 }
 0x168   : > { %v1284_v41 = vshll.u32 %v6088_v37, 16  ;;  %v6117_v13 = vld [vmem:[#allocation2 + $0x48] sm:$0xf]  ;;  %v1538_v6 = vld [vmem:[#allocation2 + $0x64] sm:$0xf]  ;;  %v1290_v31 = vshll.u32 %v5957_v53, 16  ;;  %v4525_v39 = vcombine.low %v2387_v26, %v2392_v56  ;;  %4843 = vmatpush3.bf16.msra.mxu0 %v5282_v46 }
 0x169   : > { %1518 = vst [vmem:[#allocation3 + $0x194] sm:$0xf] %v1476_v50  ;;  %v1300_v51 = vshll.u32 %v6094_v59, 16  ;;  %v4477_v9 = vrot.slane %v6096_v62, 9  ;;  %1554 = vst [vmem:[#allocation3 + $0x228] sm:$0xf] %v1538_v6  ;;  %v1279_v12 = vsel %vm5997_vm4, %v1274_v15, %v1278_v34  ;;  %4844 = vmatprep.subr.bf16.mxu0 %v5289_v54 }
 0x16a   : > { %v1115_v35 = vld [vmem:[#allocation2 + $0x54] sm:$0xf]  ;;  %v5319_v37 = vld [vmem:[#allocation4 + $0x188] sm:$0xff]   ;;  %1376 = vst [vmem:[#allocation3 + $0x124] sm:$0xf] %v1269_v45  ;;  %v1283_v0 = vrot.slane %v1281_v36, 4  ;;  %3541 = vmatmul.mubr.bf16.gmra.mxu1 %v4525_v39 }
 0x16b   : > { %v1286_v58 = vrot.slane %v1284_v41, 5  ;;  %v1479_v23 = vrot.slane %v6101_v21, 5  ;;  %v1153_v28 = vld [vmem:[#allocation2 + $0x50] sm:$0x1]  ;;  %v1116_v44 = vld [vmem:[#allocation2 + $0x58] sm:$0xf]  ;;  %4913 = vmatpush3.bf16.msra.mxu1 %v5319_v37 }
 0x16c   : > { %1131 = vst [vmem:[#allocation3 + $0x1f8] sm:$0xf] %v1115_v35  ;;  %v5326_v53 = vld [vmem:[#allocation4 + $0x1c0] sm:$0xff]   ;;  %1377 = vst [vmem:[#allocation3 + $0x148] sm:$0xf] %v1279_v12  ;;  %v5291_v59 = vld [vmem:[#allocation4 + $0x118] sm:$0xff]  }
 0x16d   : > { %v1292_v62 = vrot.slane %v1290_v31, 5  ;;  %v1482_v27 = vrot.slane %v6107_v30, 5  ;;  %v1405_v49 = vld [vmem:[#allocation2 + $0x54] sm:$0xe]  ;;  %v1406_v32 = vld [vmem:[#allocation2 + $0x58] sm:$0xf]  ;;  %v1287_v60 = vor.u32 %v1286_v58, %v1283_v0  ;;  %v1480_v21 = vsel %vm5930_vm15, %v4477_v9, %v1479_v23  ;;  %4914 = vmatprep.subr.bf16.mxu1 %v5326_v53  ;;  %4845 = vmatpush3.bf16.msra.mxu0 %v5291_v59 }
 0x16e   : > { %1132 = vst [vmem:[#allocation3 + $0x21c] sm:$0xf] %v1116_v44  ;;  %v5274_v34 = vld [vmem:[#allocation3 + $0x90] ss:$36 sps:$4 sm:$0xff]   ;;  %v1481_v48 = vrot.slane %v1479_v23, 4  ;;  %v6133_v56 = vld [vmem:[#allocation3 + $0x128] sm:$0xff] }
 0x16f   : > { %v5278_v16 = vld [vmem:[#allocation3 + $0x12c] ss:$36 sps:$4 sm:$0xff]   ;;  %v6131_v25 = vld [vmem:[#allocation2 + $0x5c] sm:$0x1]  ;;  %v5276_v26 = vld [vmem:[#allocation3 + $0xdc] ss:$36 sps:$4 sm:$0xff]   ;;  %v1297_v30 = vor.u32 %v5987_v63, %v1292_v62  ;;  %3436 = vmatmul.mubr.bf16.gmra.mxu0 %v5274_v34 }
 0x170   : > { %v5300_v22 = vld [vmem:[#allocation4 + $0x150] sm:$0xff]   ;;  %v1302_v15 = vrot.slane %v1300_v51, 5  ;;  %1519 = vst [vmem:[#allocation3 + $0x1b8] sm:$0xf] %v1480_v21  ;;  %v1305_v29 = vshrl.u32 %v6117_v13, 16  ;;  %v5330_v50 = vld [vmem:[#allocation4 + $0x180] sm:$0xff]   ;;  %3548 = vmatprep.mubr.bf16.mxu1 %v5278_v16  ;;  %v1483_v6 = vsel %vm5930_vm15, %v1481_v48, %v1482_v27  ;;  %3443 = vmatprep.mubr.bf16.mxu0 %v5276_v26 }
 0x171   : > { %v2402_v36 = vld [vmem:[#allocation3 + $0x14c] sm:$0xff]  ;;  %v1288_v41 = vrot.slane %v1287_v60, 4  ;;  %v1308_v17 = vshll.u32 %v6117_v13, 16  ;;  %v1314_v45 = vshll.u32 %v5944_v24, 16  ;;  %v1154_v31 = vld [vmem:[#allocation2 + $0x54] sm:$0xf]  ;;  %4846 = vmatprep.subr.bf16.mxu0 %v5300_v22  ;;  %4915 = vmatpush3.bf16.msra.mxu1 %v5330_v50 }
 0x172   : > { %v1940_v46 = vld [vmem:[#allocation2 + $0x18] sm:$0xf]  ;;  %v1298_v9 = vrot.slane %v1297_v30, 4  ;;  %1520 = vst [vmem:[#allocation3 + $0x1dc] sm:$0xf] %v1483_v6  ;;  %v1307_v63 = vrot.slane %v1305_v29, 4  ;;  %v4534_v24 = vcombine.low %v6133_v56, %v2402_v36 }
 0x173   : > { %v1324_v51 = vshll.u32 %v1153_v28, 16  ;;  %v4478_v35 = vrot.slane %v1405_v49, 9  ;;  %v1941_v12 = vld [vmem:[#allocation2 + $0x1c] sm:$0xf]  ;;  %1956 = vst [vmem:[#allocation3 + $0x18] sm:$0xf] %v1940_v46  ;;  %v1293_v54 = vsel %vm5997_vm4, %v1288_v41, %v1292_v62 }
 0x174   : > { %v1310_v0 = vrot.slane %v1308_v17, 5  ;;  %v1316_v58 = vrot.slane %v1314_v45, 5  ;;  %v1486_v23 = vrot.slane %v1406_v32, 5  ;;  %v1156_v13 = vld [vmem:[#allocation2 + $0x5c] sm:$0x1]  ;;  %v1303_v28 = vsel %vm5997_vm4, %v1298_v9, %v1302_v15  ;;  %v5302_v37 = vld [vmem:[#allocation4 + $0x110] sm:$0xff]   ;;  %3549 = vmatmul.mubr.bf16.gmra.mxu1 %v4534_v24 }
 0x175   : > { %1957 = vst [vmem:[#allocation3 + $0x3c] sm:$0xf] %v1941_v12  ;;  %1378 = vst [vmem:[#allocation3 + $0x16c] sm:$0xf] %v1293_v54  ;;  %v1326_v44 = vrot.slane %v1324_v51, 5  ;;  %v1489_v39 = vrot.slane %v6131_v25, 5  ;;  %4847 = vmatpush3.bf16.msra.mxu0 %v5302_v37 }
 0x176   : > { %v1972_v27 = vld [vmem:[#allocation2 + $0x18] sm:$0xf]  ;;  %v6147_v62 = vld [vmem:[#allocation2 + $0x64] sm:$0xf]  ;;  %1379 = vst [vmem:[#allocation3 + $0x190] sm:$0xf] %v1303_v28  ;;  %v1311_v49 = vor.u32 %v1310_v0, %v1307_v63  ;;  %v1321_v53 = vor.u32 %v5979_v61, %v1316_v58  ;;  %v1487_v32 = vsel %vm5930_vm15, %v4478_v35, %v1486_v23 }
 0x177   : > { %v1488_v59 = vrot.slane %v1486_v23, 4  ;;  %v5311_v34 = vld [vmem:[#allocation4 + $0x148] sm:$0xff]   ;;  %v5286_v16 = vld [vmem:[#allocation3 + $0x174] ss:$36 sps:$4 sm:$0xff]   ;;  %1521 = vst [vmem:[#allocation3 + $0x200] sm:$0xf] %v1487_v32 }
 0x178   : > { %v5313_v60 = vld [vmem:[#allocation4 + $0x108] sm:$0xff]   ;;  %v1329_v21 = vshrl.u32 %v1154_v31, 16  ;;  %v1332_v48 = vshll.u32 %v1154_v31, 16  ;;  %v1338_v25 = vshll.u32 %v6027_v20, 16  ;;  %v1348_v26 = vshll.u32 %v1156_v13, 16  ;;  %v5323_v29 = vld [vmem:[#allocation4 + $0x140] sm:$0xff]   ;;  %3556 = vmatprep.mubr.bf16.mxu1 %v5286_v16  ;;  %4848 = vmatprep.subr.bf16.mxu0 %v5311_v34 }
 0x179   : > { %v1312_v56 = vrot.slane %v1311_v49, 4  ;;  %v1322_v30 = vrot.slane %v1321_v53, 4  ;;  %v1490_v22 = vsel %vm5930_vm15, %v1488_v59, %v1489_v39  ;;  %v1974_v61 = vld [vmem:[#allocation2 + $0x20] sm:$0x1]  ;;  %v1997_v15 = vshrl.u32 %v1972_v27, 16  ;;  %v2407_v31 = vld [vmem:[#allocation3 + $0x170] sm:$0xff]  ;;  %4849 = vmatpush3.bf16.msra.mxu0 %v5313_v60 }
 0x17a   : > { %v2154_v36 = vshrl.u32 %v6147_v62, 16  ;;  %1522 = vst [vmem:[#allocation3 + $0x224] sm:$0xf] %v1490_v22  ;;  %v1331_v41 = vrot.slane %v1329_v21, 4  ;;  %v1334_v6 = vrot.slane %v1332_v48, 5  ;;  %v1340_v17 = vrot.slane %v1338_v25, 5  ;;  %4850 = vmatprep.subr.bf16.mxu0 %v5323_v29 }
 0x17b   : > { %v1555_v45 = vld [vmem:[#allocation2 + $0xc] sm:$0xf]  ;;  %v5281_v20 = vld [vmem:[#allocation3 + $0xd8] ss:$36 sps:$4 sm:$0xff]   ;;  %v1317_v46 = vsel %vm5997_vm4, %v1312_v56, %v1316_v58  ;;  %v1327_v9 = vsel %vm5997_vm4, %v1322_v30, %v1326_v44  ;;  %v1999_v63 = vrot.slane %v1997_v15, 4  ;;  %v2000_v51 = vshll.u32 %v1972_v27, 16 }
 0x17c   : > { %v2412_v50 = vld [vmem:[#allocation3 + $0x194] sm:$0xff]  ;;  %v5283_v35 = vld [vmem:[#allocation3 + $0x124] ss:$36 sps:$4 sm:$0xff]   ;;  %1380 = vst [vmem:[#allocation3 + $0x1b4] sm:$0xf] %v1317_v46  ;;  %v1335_v12 = vor.u32 %v1334_v6, %v1331_v41  ;;  %v1345_v54 = vor.u32 %v6111_v42, %v1340_v17  ;;  %v1350_v0 = vrot.slane %v1348_v26, 5  ;;  %3444 = vmatmul.mubr.bf16.gmra.mxu0 %v5281_v20 }
 0x17d   : > { %1381 = vst [vmem:[#allocation3 + $0x1d8] sm:$0xf] %v1327_v9  ;;  %v5399_v23 = vld [vmem:[#allocation2 + $0x1c] sm:$0xf]  ;;  %v2002_v28 = vrot.slane %v2000_v51, 5  ;;  %v2016_v37 = vshll.u32 %v1974_v61, 16  ;;  %3451 = vmatprep.mubr.bf16.mxu0 %v5283_v35  ;;  %v4543_v53 = vcombine.low %v2407_v31, %v2412_v50 }
 0x17e   : > { %v2006_v13 = vshll.u32 %v5399_v23, 16  ;;  %v5325_v24 = vld [vmem:[#allocation4 + $0x100] sm:$0xff]   ;;  %v1580_v58 = vshrl.u32 %v1555_v45, 16  ;;  %v1583_v39 = vshll.u32 %v1555_v45, 16  ;;  %v6161_v49 = vld [vmem:[#allocation4 + $0x238] sm:$0xff]   ;;  %v6165_v44 = vrot.slane %v1761_v14, 4 }
 0x17f   : > { %v6167_v27 = vrot.slane %v2154_v36, 4  ;;  %v1336_v42 = vrot.slane %v1335_v12, 4  ;;  %v1557_v32 = vld [vmem:[#allocation2 + $0x14] sm:$0x1]  ;;  %v1346_v16 = vrot.slane %v1345_v54, 4  ;;  %v2003_v21 = vor.u32 %v2002_v28, %v1999_v63  ;;  %3557 = vmatmul.mubr.bf16.gmra.mxu1 %v4543_v53  ;;  %4851 = vmatpush3.bf16.msra.mxu0 %v5325_v24 }
 0x180   : > { %v6169_v59 = vld [vmem:[#allocation3 + $0x1b8] sm:$0xff]  ;;  %v2008_v48 = vrot.slane %v2006_v13, 5  ;;  %v2018_v25 = vrot.slane %v2016_v37, 5  ;;  %v1803_v26 = vld [vmem:[#allocation2 + $0xc] sm:$0xe]  ;;  %v1582_v14 = vrot.slane %v1580_v58, 4  ;;  %5035 = vmatprep.subr.bf16.mxu0 %v6161_v49 }
 0x181   : > { %v5297_v34 = vld [vmem:[#allocation3 + $0x1bc] ss:$36 sps:$4 sm:$0xff]   ;;  %v1341_v19 = vsel %vm5997_vm4, %v1336_v42, %v1340_v17  ;;  %v1585_v30 = vrot.slane %v1583_v39, 5  ;;  %v5400_v22 = vld [vmem:[#allocation2 + $0x10] sm:$0xf]  ;;  %v1351_v15 = vsel %vm5997_vm4, %v1346_v16, %v1350_v0  ;;  %v2004_v36 = vrot.slane %v2003_v21, 4 }
 0x182   : > { %v6171_v56 = vld [vmem:[#allocation3 + $0x1dc] sm:$0xff]  ;;  %v1589_v60 = vshll.u32 %v5400_v22, 16  ;;  %v1942_v61 = vld [vmem:[#allocation2 + $0x24] sm:$0xf]  ;;  %1382 = vst [vmem:[#allocation3 + $0x1fc] sm:$0xf] %v1341_v19  ;;  %v2013_v41 = vor.u32 %v5881_v43, %v2008_v48  ;;  %3564 = vmatprep.mubr.bf16.mxu1 %v5297_v34 }
 0x183   : > { %v1599_v6 = vshll.u32 %v1557_v32, 16  ;;  %v1804_v29 = vld [vmem:[#allocation2 + $0x10] sm:$0xf]  ;;  %v1805_v45 = vld [vmem:[#allocation2 + $0x14] sm:$0x1]  ;;  %v1586_v17 = vor.u32 %v1585_v30, %v1582_v14  ;;  %v4479_v31 = vrot.slane %v1803_v26, 9  ;;  %v4552_v63 = vcombine.low %v6169_v59, %v6171_v56 }
 0x184   : > { %1958 = vst [vmem:[#allocation3 + $0x60] sm:$0xf] %v1942_v61  ;;  %1383 = vst [vmem:[#allocation3 + $0x220] sm:$0xf] %v1351_v15  ;;  %v1591_v20 = vrot.slane %v1589_v60, 5  ;;  %v2009_v43 = vsel %vm5997_vm4, %v2004_v36, %v2008_v48  ;;  %v2014_v51 = vrot.slane %v2013_v41, 4 }
 0x185   : > { %v1943_v50 = vld [vmem:[#allocation2 + $0x28] sm:$0xf]  ;;  %v1975_v46 = vld [vmem:[#allocation2 + $0x24] sm:$0xf]  ;;  %v5290_v9 = vld [vmem:[#allocation3 + $0x120] ss:$36 sps:$4 sm:$0xff]  }
 0x186   : > { %v1601_v35 = vrot.slane %v1599_v6, 5  ;;  %1959 = vst [vmem:[#allocation3 + $0x84] sm:$0xf] %v1943_v50  ;;  %v5293_v12 = vld [vmem:[#allocation3 + $0x16c] ss:$36 sps:$4 sm:$0xff]   ;;  %v1587_v54 = vrot.slane %v1586_v17, 4  ;;  %v1596_v0 = vor.u32 %v5887_v47, %v1591_v20  ;;  %3452 = vmatmul.mubr.bf16.gmra.mxu0 %v5290_v9  ;;  %v2019_v24 = vsel %vm5997_vm4, %v2014_v51, %v2018_v25 }
 0x187   : > { %2204 = vst [vmem:[#allocation3 + $0x1c] sm:$0xf] %v2009_v43  ;;  %v1853_v23 = vrot.slane %v1804_v29, 5  ;;  %v1856_v13 = vrot.slane %v1805_v45, 5  ;;  %v1977_v28 = vld [vmem:[#allocation2 + $0x2c] sm:$0x1]  ;;  %3459 = vmatprep.mubr.bf16.mxu0 %v5293_v12  ;;  %3565 = vmatmul.mubr.bf16.gmra.mxu1 %v4552_v63 }
 0x188   : > { %v2021_v37 = vshrl.u32 %v1975_v46, 16  ;;  %v2024_v58 = vshll.u32 %v1975_v46, 16  ;;  %v5401_v39 = vld [vmem:[#allocation2 + $0x28] sm:$0xf]  ;;  %2205 = vst [vmem:[#allocation3 + $0x40] sm:$0xf] %v2019_v24  ;;  %v1592_v42 = vsel %vm5997_vm4, %v1587_v54, %v1591_v20 }
 0x189   : > { %v2030_v53 = vshll.u32 %v5401_v39, 16  ;;  %v1597_v32 = vrot.slane %v1596_v0, 4  ;;  %v1854_v47 = vsel %vm5930_vm15, %v4479_v31, %v1853_v23  ;;  %v1855_v59 = vrot.slane %v1853_v23, 4  ;;  %v1558_v34 = vld [vmem:[#allocation2 + $0x18] sm:$0xf]  ;;  %v2432_v24 = vld [vmem:[#allocation3 + $0x224] sm:$0xff] }
 0x18a   : > { %v1560_v16 = vld [vmem:[#allocation2 + $0x20] sm:$0x1]  ;;  %1787 = vst [vmem:[#allocation3 + $0x10] sm:$0xf] %v1592_v42  ;;  %1923 = vst [vmem:[#allocation3 + $0x14] sm:$0xf] %v1854_v47 }
 0x18b   : > { %v2023_v21 = vrot.slane %v2021_v37, 4  ;;  %v2026_v48 = vrot.slane %v2024_v58, 5  ;;  %v2032_v25 = vrot.slane %v2030_v53, 5  ;;  %v2040_v26 = vshll.u32 %v1977_v28, 16  ;;  %v1806_v56 = vld [vmem:[#allocation2 + $0x18] sm:$0xe] }
 0x18c   : > { %v1602_v19 = vsel %vm5997_vm4, %v1597_v32, %v1601_v35  ;;  %v1857_v14 = vsel %vm5930_vm15, %v1855_v59, %v1856_v13  ;;  %v1604_v30 = vshrl.u32 %v1558_v34, 16  ;;  %v1607_v22 = vshll.u32 %v1558_v34, 16  ;;  %v1807_v60 = vld [vmem:[#allocation2 + $0x1c] sm:$0xf]  ;;  %v5301_v61 = vld [vmem:[#allocation3 + $0x168] ss:$36 sps:$4 sm:$0xff]  }
 0x18d   : > { %v5308_v15 = vld [vmem:[#allocation3 + $0x204] ss:$36 sps:$4 sm:$0xff]   ;;  %1788 = vst [vmem:[#allocation3 + $0x34] sm:$0xf] %v1602_v19  ;;  %1924 = vst [vmem:[#allocation3 + $0x38] sm:$0xf] %v1857_v14  ;;  %v2027_v36 = vor.u32 %v2026_v48, %v2023_v21  ;;  %v2037_v41 = vor.u32 %v5965_v4, %v2032_v25 }
 0x18e   : > { %v2042_v6 = vrot.slane %v2040_v26, 5  ;;  %v5304_v29 = vld [vmem:[#allocation3 + $0x1b4] ss:$36 sps:$4 sm:$0xff]   ;;  %v1606_v45 = vrot.slane %v1604_v30, 4  ;;  %v1609_v17 = vrot.slane %v1607_v22, 5  ;;  %v1623_v50 = vshll.u32 %v1560_v16, 16  ;;  %3572 = vmatprep.mubr.bf16.mxu1 %v5308_v15  ;;  %3460 = vmatmul.mubr.bf16.gmra.mxu0 %v5301_v61 }
 0x18f   : > { %v5402_v20 = vld [vmem:[#allocation2 + $0x1c] sm:$0xf]  ;;  %v1808_v46 = vld [vmem:[#allocation2 + $0x20] sm:$0x1]  ;;  %v6195_v9 = vld [vmem:[#allocation2 + $0x58] sm:$0xf]  ;;  %3467 = vmatprep.mubr.bf16.mxu0 %v5304_v29 }
 0x190   : > { %v1613_v31 = vshll.u32 %v5402_v20, 16  ;;  %v2028_v43 = vrot.slane %v2027_v36, 4  ;;  %v2038_v51 = vrot.slane %v2037_v41, 4  ;;  %v4480_v35 = vrot.slane %v1806_v56, 9  ;;  %v1944_v13 = vld [vmem:[#allocation2 + $0x30] sm:$0xf] }
 0x191   : > { %v1860_v12 = vrot.slane %v1807_v60, 5  ;;  %v1610_v54 = vor.u32 %v1609_v17, %v1606_v45  ;;  %v1625_v23 = vrot.slane %v1623_v50, 5  ;;  %v1863_v4 = vrot.slane %v1808_v46, 5  ;;  %v2427_v63 = vld [vmem:[#allocation3 + $0x200] sm:$0xff]  ;;  %1960 = vst [vmem:[#allocation3 + $0xa8] sm:$0xf] %v1944_v13 }
 0x192   : > { %v1615_v0 = vrot.slane %v1613_v31, 5  ;;  %v2033_v28 = vsel %vm5997_vm4, %v2028_v43, %v2032_v25  ;;  %v2043_v37 = vsel %vm5997_vm4, %v2038_v51, %v2042_v6  ;;  %v1945_v32 = vld [vmem:[#allocation2 + $0x34] sm:$0xf]  ;;  %v1978_v47 = vld [vmem:[#allocation2 + $0x30] sm:$0xf]  ;;  %v1737_v56 = vshrl.u32 %v6195_v9, 16 }
 0x193   : > { %v1861_v58 = vsel %vm5930_vm15, %v4480_v35, %v1860_v12  ;;  %v1862_v39 = vrot.slane %v1860_v12, 4  ;;  %2206 = vst [vmem:[#allocation3 + $0x64] sm:$0xf] %v2033_v28  ;;  %2207 = vst [vmem:[#allocation3 + $0x88] sm:$0xf] %v2043_v37  ;;  %v1611_v53 = vrot.slane %v1610_v54, 4  ;;  %v4561_v19 = vcombine.low %v2427_v63, %v2432_v24 }
 0x194   : > { %v1620_v42 = vor.u32 %v5877_v38, %v1615_v0  ;;  %1925 = vst [vmem:[#allocation3 + $0x5c] sm:$0xf] %v1861_v58  ;;  %v6204_v59 = vld [vmem:[#allocation2 + $0x58] sm:$0xf]  ;;  %1961 = vst [vmem:[#allocation3 + $0xcc] sm:$0xf] %v1945_v32 }
 0x195   : > { %v1864_v34 = vsel %vm5930_vm15, %v1862_v39, %v1863_v4  ;;  %v1980_v16 = vld [vmem:[#allocation2 + $0x38] sm:$0x1]  ;;  %v2045_v21 = vshrl.u32 %v1978_v47, 16  ;;  %v2048_v48 = vshll.u32 %v1978_v47, 16  ;;  %v5403_v25 = vld [vmem:[#allocation2 + $0x34] sm:$0xf]  ;;  %v1616_v38 = vsel %vm5997_vm4, %v1611_v53, %v1615_v0  ;;  %3573 = vmatmul.mubr.bf16.gmra.mxu1 %v4561_v19 }
 0x196   : > { %v2054_v26 = vshll.u32 %v5403_v25, 16  ;;  %v5322_v14 = vld [vmem:[#allocation3 + $0x1c] ss:$36 sps:$4 sm:$0xff]   ;;  %v1621_v30 = vrot.slane %v1620_v42, 4  ;;  %1926 = vst [vmem:[#allocation3 + $0x80] sm:$0xf] %v1864_v34 }
 0x197   : > { %v5312_v22 = vld [vmem:[#allocation3 + $0x1b0] ss:$36 sps:$4 sm:$0xff]   ;;  %1789 = vst [vmem:[#allocation3 + $0x58] sm:$0xf] %v1616_v38  ;;  %v2047_v60 = vrot.slane %v2045_v21, 4  ;;  %v2050_v61 = vrot.slane %v2048_v48, 5  ;;  %3710 = vmatprep.mubr.bf16.mxu1 %v5322_v14 }
 0x198   : > { %v2056_v15 = vrot.slane %v2054_v26, 5  ;;  %v2064_v36 = vshll.u32 %v1980_v16, 16  ;;  %v1561_v41 = vld [vmem:[#allocation2 + $0x24] sm:$0xf]  ;;  %v5315_v6 = vld [vmem:[#allocation3 + $0x1fc] ss:$36 sps:$4 sm:$0xff]   ;;  %v1626_v29 = vsel %vm5997_vm4, %v1621_v30, %v1625_v23  ;;  %3468 = vmatmul.mubr.bf16.gmra.mxu0 %v5312_v22 }
 0x199   : > { %v1563_v45 = vld [vmem:[#allocation2 + $0x2c] sm:$0x1]  ;;  %v1628_v17 = vshrl.u32 %v1561_v41, 16  ;;  %v1631_v20 = vshll.u32 %v1561_v41, 16  ;;  %1790 = vst [vmem:[#allocation3 + $0x7c] sm:$0xf] %v1626_v29  ;;  %v2051_v31 = vor.u32 %v2050_v61, %v2047_v60  ;;  %3475 = vmatprep.mubr.bf16.mxu0 %v5315_v6  ;;  %v1065_v61 = vstv %s6223_s17 }
 0x19a   : > { %v2061_v50 = vor.u32 %v5934_v3, %v2056_v15  ;;  %v2066_v46 = vrot.slane %v2064_v36, 5  ;;  %v5404_v43 = vld [vmem:[#allocation2 + $0x28] sm:$0xf]  ;;  %v1809_v35 = vld [vmem:[#allocation2 + $0x24] sm:$0xe]  ;;  %v2130_v54 = vshrl.u32 %v6204_v59, 16 }
 0x19b   : > { %v1637_v51 = vshll.u32 %v5404_v43, 16  ;;  %v1810_v12 = vld [vmem:[#allocation2 + $0x28] sm:$0xf]  ;;  %v1630_v0 = vrot.slane %v1628_v17, 4  ;;  %v1633_v4 = vrot.slane %v1631_v20, 5  ;;  %v1647_v13 = vshll.u32 %v1563_v45, 16 }
 0x19c   : > { %v1811_v63 = vld [vmem:[#allocation2 + $0x2c] sm:$0x1]  ;;  %v2052_v23 = vrot.slane %v2051_v31, 4  ;;  %v2062_v24 = vrot.slane %v2061_v50, 4  ;;  %v1060_v28 = vmax.f32 %v5871_v33, 0.0  ;;  %v4481_v37 = vrot.slane %v1809_v35, 9 }
 0x19d   : > { %v5320_v3 = vld [vmem:[#allocation3 + $0x18] ss:$36 sps:$4 sm:$0xff]   ;;  %v1634_v58 = vor.u32 %v1633_v4, %v1630_v0  ;;  %v1639_v39 = vrot.slane %v1637_v51, 5  ;;  %v1649_v53 = vrot.slane %v1647_v13, 5  ;;  %v395_v42 = vld [vmem:[#allocation2 + $0x6c] sm:$0x1] }
 0x19e   : > { %v427_v32 = vld [vmem:[#allocation2 + $0x74] sm:$0x1]  ;;  %v5331_v47 = vld [vmem:[#allocation3 + $0x64] ss:$36 sps:$4 sm:$0xff]   ;;  %v2057_v34 = vsel %vm5997_vm4, %v2052_v23, %v2056_v15  ;;  %v2067_v16 = vsel %vm5997_vm4, %v2062_v24, %v2066_v46  ;;  %v1867_v21 = vrot.slane %v1810_v12, 5  ;;  %v1870_v48 = vrot.slane %v1811_v63, 5  ;;  %3711 = vmatmul.mubr.bf16.vlgmr.msra.gmra.mxu1 %v5320_v3 }
 0x19f   : > { %v1946_v33 = vld [vmem:[#allocation2 + $0x3c] sm:$0xf]  ;;  %2208 = vst [vmem:[#allocation3 + $0xac] sm:$0xf] %v2057_v34  ;;  %2209 = vst [vmem:[#allocation3 + $0xd0] sm:$0xf] %v2067_v16  ;;  %v1644_v26 = vor.u32 %v5951_v40, %v1639_v39  ;;  %3718 = vmatprep.mubr.bf16.mxu1 %v5331_v47 }
 0x1a0   : > { %v1635_v25 = vrot.slane %v1634_v58, 4  ;;  %v396_v19 = vsel %vm5721_vm5, 0, %v395_v42  ;;  %v428_v14 = vsel %vm5743_vm7, 0, %v427_v32  ;;  %v1947_v38 = vld [vmem:[#allocation2 + $0x40] sm:$0xf]  ;;  %v1868_v30 = vsel %vm5930_vm15, %v4481_v37, %v1867_v21  ;;  %v2369_v31 = vld [vmem:[#allocation3 + $0x60] sm:$0xff] }
 0x1a1   : > { %1962 = vst [vmem:[#allocation3 + $0xf0] sm:$0xf] %v1946_v33  ;;  %v1869_v22 = vrot.slane %v1867_v21, 4  ;;  %397 = vst [vmem:[#allocation2 + $0x6c] sm:$0x1] %v396_v19  ;;  %v1061_v60 = vmax.f32 %v5915_v55, 0.0 }
 0x1a2   : > { %429 = vst [vmem:[#allocation2 + $0x74] sm:$0x1] %v428_v14  ;;  %1963 = vst [vmem:[#allocation3 + $0x114] sm:$0xf] %v1947_v38  ;;  %v1981_v15 = vld [vmem:[#allocation2 + $0x3c] sm:$0xf]  ;;  %v1640_v6 = vsel %vm5997_vm4, %v1635_v25, %v1639_v39 }
 0x1a3   : > { %v1983_v40 = vld [vmem:[#allocation2 + $0x44] sm:$0x1]  ;;  %v6236_v36 = vrot.slane %v1737_v56, 4  ;;  %v6238_v18 = vrot.slane %v2130_v54, 4  ;;  %v5324_v41 = vld [vmem:[#allocation3 + $0x1f8] ss:$36 sps:$4 sm:$0xff]   ;;  %v1871_v55 = vsel %vm5930_vm15, %v1869_v22, %v1870_v48  ;;  %v1062_v17 = vpack.c.bf16 %v1061_v60, %v1060_v28 }
 0x1a4   : > { %v1645_v29 = vrot.slane %v1644_v26, 4  ;;  %1927 = vst [vmem:[#allocation3 + $0xa4] sm:$0xf] %v1868_v30  ;;  %v5329_v45 = vld [vmem:[#allocation3 + $0x14] ss:$36 sps:$4 sm:$0xff]   ;;  %vm1066_vm6 = vcmp.eq.s32.totalorder %v1065_v61, 1  ;;  %3476 = vmatmul.mubr.bf16.gmra.mxu0 %v5324_v41 }
 0x1a5   : > { %1791 = vst [vmem:[#allocation3 + $0xa0] sm:$0xf] %v1640_v6  ;;  %v2069_v20 = vshrl.u32 %v1981_v15, 16  ;;  %v1564_v56 = vld [vmem:[#allocation2 + $0x30] sm:$0xf]  ;;  %v2374_v50 = vld [vmem:[#allocation3 + $0x84] sm:$0xff]  ;;  %3613 = vmatprep.mubr.bf16.mxu0 %v5329_v45 }
 0x1a6   : > { %v1650_v46 = vsel %vm5997_vm4, %v1645_v29, %v1649_v53  ;;  %1928 = vst [vmem:[#allocation3 + $0xc8] sm:$0xf] %v1871_v55  ;;  %v2072_v43 = vshll.u32 %v1981_v15, 16  ;;  %v5405_v51 = vld [vmem:[#allocation2 + $0x40] sm:$0xf]  ;;  %v2088_v12 = vshll.u32 %v1983_v40, 16  ;;  %v4511_v58 = vcombine.low %v2369_v31, %v2374_v50 }
 0x1a7   : > { %v2078_v35 = vshll.u32 %v5405_v51, 16  ;;  %1792 = vst [vmem:[#allocation3 + $0xc4] sm:$0xf] %v1650_v46  ;;  %v1067_v54 = vsel %vm1066_vm6, %v1062_v17, 0  ;;  %v2071_v0 = vrot.slane %v2069_v20, 4  ;;  %v1652_v4 = vshrl.u32 %v1564_v56, 16 }
 0x1a8   : > { %v1655_v13 = vshll.u32 %v1564_v56, 16  ;;  %v4469_v63 = vcombine.low %v1067_v54, %v1067_v54  ;;  %v4470_v23 = vcombine.high %v1067_v54, %v1067_v54  ;;  %v2074_v24 = vrot.slane %v2072_v43, 5  ;;  %v1566_v37 = vld [vmem:[#allocation2 + $0x38] sm:$0x1]  ;;  %v1948_v3 = vld [vmem:[#allocation2 + $0x48] sm:$0xf]  ;;  %3719 = vmatmul.mubr.bf16.gmra.mxu1 %v4511_v58 }
 0x1a9   : > { %v2080_v28 = vrot.slane %v2078_v35, 5  ;;  %v6246_v39 = vld [vmem:[#allocation3 + $0xa8] sm:$0xff]  ;;  %v2090_v42 = vrot.slane %v2088_v12, 5  ;;  %v1654_v32 = vrot.slane %v1652_v4, 4  ;;  %v6250_v47 = vld [vmem:[#allocation2 + $0x30] sm:$0xe] }
 0x1aa   : > { %v6248_v53 = vld [vmem:[#allocation3 + $0xcc] sm:$0xff]  ;;  %1964 = vst [vmem:[#allocation3 + $0x138] sm:$0xf] %v1948_v3  ;;  %v1074_v21 = vshrl.u32 %v4469_v63, 16  ;;  %v1077_v48 = vshll.u32 %v4469_v63, 16  ;;  %v1082_v33 = vshrl.u32 %v4470_v23, 16  ;;  %v2075_v14 = vor.u32 %v2074_v24, %v2071_v0 }
 0x1ab   : > { %v5336_v34 = vld [vmem:[#allocation3 + $0xac] ss:$36 sps:$4 sm:$0xff]   ;;  %v4520_v16 = vcombine.low %v6246_v39, %v6248_v53  ;;  %v1085_v26 = vshll.u32 %v4470_v23, 16  ;;  %v1094_v19 = vld [vmem:[#allocation2 + $0x6c] sm:$0xf]  ;;  %v2085_v38 = vor.u32 %v5993_v11, %v2080_v28  ;;  %v1657_v30 = vrot.slane %v1655_v13, 5 }
 0x1ac   : > { %v5327_v25 = vld [vmem:[#allocation3 + $0x10] ss:$36 sps:$4 sm:$0xff]   ;;  %v5334_v60 = vld [vmem:[#allocation3 + $0x5c] ss:$36 sps:$4 sm:$0xff]   ;;  %v1076_v61 = vrot.slane %v1074_v21, 7  ;;  %v1084_v15 = vrot.slane %v1082_v33, 7  ;;  %3726 = vmatprep.mubr.bf16.mxu1 %v5336_v34 }
 0x1ad   : > { %v1949_v22 = vld [vmem:[#allocation2 + $0x4c] sm:$0xf]  ;;  %v5406_v40 = vld [vmem:[#allocation2 + $0x34] sm:$0xf]  ;;  %v1671_v6 = vshll.u32 %v1566_v37, 16  ;;  %v2076_v17 = vrot.slane %v2075_v14, 4  ;;  %v1658_v56 = vor.u32 %v1657_v30, %v1654_v32  ;;  %3614 = vmatmul.mubr.bf16.vlgmr.msra.gmra.mxu0 %v5327_v25 }
 0x1ae   : > { %v1661_v41 = vshll.u32 %v5406_v40, 16  ;;  %v1813_v29 = vld [vmem:[#allocation2 + $0x34] sm:$0xf]  ;;  %1965 = vst [vmem:[#allocation3 + $0x15c] sm:$0xf] %v1949_v22  ;;  %v5338_v45 = vld [vmem:[#allocation4 + $0x230] sm:$0xff]   ;;  %v1079_v11 = vor.u32 %v1077_v48, %v1076_v61  ;;  %v1087_v46 = vor.u32 %v1085_v26, %v1084_v15  ;;  %5036 = vmatpush3.bf16.msra.mxu0 %v6161_v49  ;;  %3621 = vmatprep.mubr.bf16.mxu0 %v5334_v60 }
 0x1af   : > { %v1098_v55 = vld [vmem:[#allocation2 + $0x74] sm:$0x1]  ;;  %v2086_v20 = vrot.slane %v2085_v38, 4  ;;  %v4482_v31 = vrot.slane %v6250_v47, 9  ;;  %v1080_v50 = vrot.slane %v1076_v61, 4  ;;  %v1089_v43 = vrot.slane %v1084_v15, 4  ;;  %5037 = vmatprep.subr.bf16.mxu0 %v5338_v45 }
 0x1b0   : > { %v1814_v51 = vld [vmem:[#allocation2 + $0x38] sm:$0x1]  ;;  %v2081_v35 = vsel %vm5997_vm4, %v2076_v17, %v2080_v28  ;;  %v1659_v54 = vrot.slane %v1658_v56, 4  ;;  %v1663_v0 = vrot.slane %v1661_v41, 5  ;;  %v1984_v4 = vld [vmem:[#allocation2 + $0x48] sm:$0xf]  ;;  %v1095_v23 = vsel %vm5797_vm11, %v1079_v11, %v1094_v19  ;;  %3727 = vmatmul.mubr.bf16.gmra.mxu1 %v4520_v16 }
 0x1b1   : > { %v2091_v12 = vsel %vm5997_vm4, %v2086_v20, %v2090_v42  ;;  %v1986_v13 = vld [vmem:[#allocation2 + $0x50] sm:$0x1]  ;;  %v1088_v63 = vsel %vm5806_vm12, %v1080_v50, %v1087_v46  ;;  %v1099_v24 = vsel %vm5721_vm5, %v1089_v43, %v1098_v55  ;;  %2210 = vst [vmem:[#allocation3 + $0xf4] sm:$0xf] %v2081_v35  ;;  %v1673_v28 = vrot.slane %v1671_v6, 5  ;;  %v5344_v3 = vld [vmem:[#allocation4 + $0x228] sm:$0xff]  }
 0x1b2   : > { %2211 = vst [vmem:[#allocation3 + $0x118] sm:$0xf] %v2091_v12  ;;  %v1567_v37 = vld [vmem:[#allocation2 + $0x3c] sm:$0xf]  ;;  %1096 = vst [vmem:[#allocation2 + $0x6c] sm:$0xf] %v1095_v23  ;;  %v1664_v49 = vsel %vm5997_vm4, %v1659_v54, %v1663_v0  ;;  %v1668_v10 = vor.u32 %v5919_v57, %v1663_v0  ;;  %5038 = vmatpush3.bf16.msra.mxu0 %v5338_v45 }
 0x1b3   : > { %1097 = vst [vmem:[#allocation2 + $0x70] sm:$0xf] %v1088_v63  ;;  %1100 = vst [vmem:[#allocation2 + $0x74] sm:$0x1] %v1099_v24  ;;  %v1874_v58 = vrot.slane %v1813_v29, 5  ;;  %v1877_v52 = vrot.slane %v1814_v51, 5  ;;  %5039 = vmatprep.subr.bf16.mxu0 %v5344_v3 }
 0x1b4   : > { %v1569_v42 = vld [vmem:[#allocation2 + $0x44] sm:$0x1]  ;;  %1793 = vst [vmem:[#allocation3 + $0xe8] sm:$0xf] %v1664_v49  ;;  %v2093_v7 = vshrl.u32 %v1984_v4, 16  ;;  %v2096_v32 = vshll.u32 %v1984_v4, 16 }
 0x1b5   : > { %v5407_v47 = vld [vmem:[#allocation2 + $0x4c] sm:$0xf]  ;;  %v2112_v21 = vshll.u32 %v1986_v13, 16  ;;  %v6270_v48 = vld [vmem:[#allocation2 + $0x3c] sm:$0xe]  ;;  %v1669_v25 = vrot.slane %v1668_v10, 4  ;;  %v1875_v26 = vsel %vm5930_vm15, %v4482_v31, %v1874_v58 }
 0x1b6   : > { %v2102_v34 = vshll.u32 %v5407_v47, 16  ;;  %v5339_v33 = vld [vmem:[#allocation3 + $0x58] ss:$36 sps:$4 sm:$0xff]   ;;  %v1876_v19 = vrot.slane %v1874_v58, 4  ;;  %v6274_v14 = vld [vmem:[#allocation4 + $0x220] sm:$0xff]   ;;  %v1676_v57 = vshrl.u32 %v1567_v37, 16  ;;  %5040 = vmatpush3.bf16.msra.mxu0 %v5344_v3 }
 0x1b7   : > { %v1950_v38 = vld [vmem:[#allocation2 + $0x54] sm:$0xf]  ;;  %1929 = vst [vmem:[#allocation3 + $0xec] sm:$0xf] %v1875_v26  ;;  %v2095_v30 = vrot.slane %v2093_v7, 4  ;;  %v2098_v22 = vrot.slane %v2096_v32, 5  ;;  %v1674_v41 = vsel %vm5997_vm4, %v1669_v25, %v1673_v28  ;;  %3622 = vmatmul.mubr.bf16.gmra.mxu0 %v5339_v33  ;;  %5041 = vmatprep.subr.bf16.mxu0 %v6274_v14 }
 0x1b8   : > { %v2104_v60 = vrot.slane %v2102_v34, 5  ;;  %v2114_v61 = vrot.slane %v2112_v21, 5  ;;  %v1951_v15 = vld [vmem:[#allocation2 + $0x58] sm:$0xf]  ;;  %1966 = vst [vmem:[#allocation3 + $0x180] sm:$0xf] %v1950_v38  ;;  %v1878_v6 = vsel %vm5930_vm15, %v1876_v19, %v1877_v52 }
 0x1b9   : > { %v5340_v40 = vld [vmem:[#allocation3 + $0xa4] ss:$36 sps:$4 sm:$0xff]   ;;  %v1678_v29 = vrot.slane %v1676_v57, 4  ;;  %v1679_v45 = vshll.u32 %v1567_v37, 16  ;;  %1967 = vst [vmem:[#allocation3 + $0x1a4] sm:$0xf] %v1951_v15  ;;  %v2099_v39 = vor.u32 %v2098_v22, %v2095_v30 }
 0x1ba   : > { %v1816_v55 = vld [vmem:[#allocation2 + $0x40] sm:$0xf]  ;;  %1794 = vst [vmem:[#allocation3 + $0x10c] sm:$0xf] %v1674_v41  ;;  %1930 = vst [vmem:[#allocation3 + $0x110] sm:$0xf] %v1878_v6  ;;  %v2109_v53 = vor.u32 %v5985_v2, %v2104_v60  ;;  %3629 = vmatprep.mubr.bf16.mxu0 %v5340_v40  ;;  %5042 = vmatpush3.bf16.msra.mxu0 %v6274_v14 }
 0x1bb   : > { %v5408_v16 = vld [vmem:[#allocation2 + $0x40] sm:$0xf]  ;;  %v1695_v20 = vshll.u32 %v1569_v42, 16  ;;  %v1817_v56 = vld [vmem:[#allocation2 + $0x44] sm:$0x1]  ;;  %v2389_v11 = vld [vmem:[#allocation3 + $0xf0] sm:$0xff] }
 0x1bc   : > { %v1685_v17 = vshll.u32 %v5408_v16, 16  ;;  %v1987_v31 = vld [vmem:[#allocation2 + $0x54] sm:$0xf]  ;;  %v2394_v50 = vld [vmem:[#allocation3 + $0x114] sm:$0xff]  ;;  %v1681_v43 = vrot.slane %v1679_v45, 5  ;;  %v4483_v51 = vrot.slane %v6270_v48, 9 }
 0x1bd   : > { %v5342_v46 = vld [vmem:[#allocation3 + $0xf4] ss:$36 sps:$4 sm:$0xff]   ;;  %v4529_v35 = vcombine.low %v2389_v11, %v2394_v50  ;;  %v2100_v12 = vrot.slane %v2099_v39, 4  ;;  %v2110_v54 = vrot.slane %v2109_v53, 4  ;;  %v1697_v4 = vrot.slane %v1695_v20, 5 }
 0x1be   : > { %v1687_v0 = vrot.slane %v1685_v17, 5  ;;  %3734 = vmatprep.mubr.bf16.mxu1 %v5342_v46  ;;  %v1682_v2 = vor.u32 %v1681_v43, %v1678_v29  ;;  %v1881_v13 = vrot.slane %v1816_v55, 5  ;;  %v1884_v63 = vrot.slane %v1817_v56, 5  ;;  %v1989_v23 = vld [vmem:[#allocation2 + $0x5c] sm:$0x1]  ;;  %v5356_v24 = vld [vmem:[#allocation4 + $0x218] sm:$0xff]  }
 0x1bf   : > { %v2105_v28 = vsel %vm5997_vm4, %v2100_v12, %v2104_v60  ;;  %v2115_v37 = vsel %vm5997_vm4, %v2110_v54, %v2114_v61  ;;  %v2117_v49 = vshrl.u32 %v1987_v31, 16  ;;  %v1570_v10 = vld [vmem:[#allocation2 + $0x48] sm:$0xf]  ;;  %v1952_v58 = vld [vmem:[#allocation2 + $0x60] sm:$0xf]  ;;  %v2120_v47 = vshll.u32 %v1987_v31, 16  ;;  %3735 = vmatmul.mubr.bf16.gmra.mxu1 %v4529_v35  ;;  %5043 = vmatprep.subr.bf16.mxu0 %v5356_v24 }
 0x1c0   : > { %v1692_v3 = vor.u32 %v5991_v8, %v1687_v0  ;;  %v5345_v52 = vld [vmem:[#allocation3 + $0xa0] ss:$36 sps:$4 sm:$0xff]   ;;  %2212 = vst [vmem:[#allocation3 + $0x13c] sm:$0xf] %v2105_v28  ;;  %2213 = vst [vmem:[#allocation3 + $0x160] sm:$0xf] %v2115_v37  ;;  %v1882_v7 = vsel %vm5930_vm15, %v4483_v51, %v1881_v13  ;;  %5044 = vmatpush3.bf16.msra.mxu0 %v5356_v24 }
 0x1c1   : > { %v1683_v42 = vrot.slane %v1682_v2, 4  ;;  %v1883_v32 = vrot.slane %v1881_v13, 4  ;;  %v1953_v34 = vld [vmem:[#allocation2 + $0x64] sm:$0xf]  ;;  %1968 = vst [vmem:[#allocation3 + $0x1c8] sm:$0xf] %v1952_v58  ;;  %3630 = vmatmul.mubr.bf16.gmra.mxu0 %v5345_v52 }
 0x1c2   : > { %v6293_v21 = vld [vmem:[#allocation4 + $0x210] sm:$0xff]   ;;  %v1693_v8 = vrot.slane %v1692_v3, 4  ;;  %1931 = vst [vmem:[#allocation3 + $0x134] sm:$0xf] %v1882_v7  ;;  %v2119_v48 = vrot.slane %v2117_v49, 4  ;;  %v2126_v33 = vshll.u32 %v6204_v59, 16 }
 0x1c3   : > { %v2136_v25 = vshll.u32 %v1989_v23, 16  ;;  %v1572_v26 = vld [vmem:[#allocation2 + $0x50] sm:$0x1]  ;;  %1969 = vst [vmem:[#allocation3 + $0x1ec] sm:$0xf] %v1953_v34  ;;  %v1688_v19 = vsel %vm5997_vm4, %v1683_v42, %v1687_v0  ;;  %v1885_v57 = vsel %vm5930_vm15, %v1883_v32, %v1884_v63  ;;  %v2122_v38 = vrot.slane %v2120_v47, 5  ;;  %5045 = vmatprep.subr.bf16.mxu0 %v6293_v21 }
 0x1c4   : > { %v1818_v30 = vld [vmem:[#allocation2 + $0x48] sm:$0xe]  ;;  %v1819_v22 = vld [vmem:[#allocation2 + $0x4c] sm:$0xf]  ;;  %v1698_v14 = vsel %vm5997_vm4, %v1693_v8, %v1697_v4  ;;  %1795 = vst [vmem:[#allocation3 + $0x130] sm:$0xf] %v1688_v19  ;;  %5046 = vmatpush3.bf16.msra.mxu0 %v6293_v21 }
 0x1c5   : > { %v5346_v60 = vld [vmem:[#allocation3 + $0xec] ss:$36 sps:$4 sm:$0xff]   ;;  %1932 = vst [vmem:[#allocation3 + $0x158] sm:$0xf] %v1885_v57  ;;  %v2128_v59 = vrot.slane %v2126_v33, 5  ;;  %v2138_v61 = vrot.slane %v2136_v25, 5  ;;  %v2123_v40 = vor.u32 %v2122_v38, %v2119_v48 }
 0x1c6   : > { %v1700_v15 = vshrl.u32 %v1570_v10, 16  ;;  %1796 = vst [vmem:[#allocation3 + $0x154] sm:$0xf] %v1698_v14  ;;  %v1703_v41 = vshll.u32 %v1570_v10, 16  ;;  %v5409_v6 = vld [vmem:[#allocation2 + $0x4c] sm:$0xf]  ;;  %3637 = vmatprep.mubr.bf16.mxu0 %v5346_v60 }
 0x1c7   : > { %v1709_v29 = vshll.u32 %v5409_v6, 16  ;;  %v1719_v45 = vshll.u32 %v1572_v26, 16  ;;  %v1820_v55 = vld [vmem:[#allocation2 + $0x50] sm:$0x1]  ;;  %v2133_v39 = vor.u32 %v6238_v18, %v2128_v59  ;;  %v4484_v16 = vrot.slane %v1818_v30, 9  ;;  %v5366_v56 = vld [vmem:[#allocation4 + $0x208] sm:$0xff]  }
 0x1c8   : > { %v1702_v53 = vrot.slane %v1700_v15, 4  ;;  %v1888_v17 = vrot.slane %v1819_v22, 5  ;;  %v1990_v20 = vld [vmem:[#allocation2 + $0x60] sm:$0xf]  ;;  %v2124_v31 = vrot.slane %v2123_v40, 4  ;;  %v1705_v11 = vrot.slane %v1703_v41, 5  ;;  %5047 = vmatprep.subr.bf16.mxu0 %v5366_v56 }
 0x1c9   : > { %v1711_v50 = vrot.slane %v1709_v29, 5  ;;  %v1721_v46 = vrot.slane %v1719_v45, 5  ;;  %v1992_v43 = vld [vmem:[#allocation2 + $0x68] sm:$0x1]  ;;  %v2399_v51 = vld [vmem:[#allocation3 + $0x138] sm:$0xff]  ;;  %v2134_v54 = vrot.slane %v2133_v39, 4  ;;  %5048 = vmatpush3.bf16.msra.mxu0 %v5366_v56 }
 0x1ca   : > { %v2404_v35 = vld [vmem:[#allocation3 + $0x15c] sm:$0xff]  ;;  %v1889_v18 = vsel %vm5930_vm15, %v4484_v16, %v1888_v17  ;;  %v1890_v0 = vrot.slane %v1888_v17, 4  ;;  %v5351_v2 = vld [vmem:[#allocation3 + $0xe8] ss:$36 sps:$4 sm:$0xff]   ;;  %v2129_v13 = vsel %vm5997_vm4, %v2124_v31, %v2128_v59  ;;  %v1706_v63 = vor.u32 %v1705_v11, %v1702_v53  ;;  %v1575_v58 = vld [vmem:[#allocation2 + $0x5c] sm:$0x1] }
 0x1cb   : > { %v5348_v12 = vld [vmem:[#allocation3 + $0x13c] ss:$36 sps:$4 sm:$0xff]   ;;  %v4538_v4 = vcombine.low %v2399_v51, %v2404_v35  ;;  %1933 = vst [vmem:[#allocation3 + $0x17c] sm:$0xf] %v1889_v18  ;;  %v2139_v37 = vsel %vm5997_vm4, %v2134_v54, %v2138_v61  ;;  %2214 = vst [vmem:[#allocation3 + $0x184] sm:$0xf] %v2129_v13  ;;  %3638 = vmatmul.mubr.bf16.gmra.mxu0 %v5351_v2 }
 0x1cc   : > { %v6804_v23 = vld [vmem:[#allocation12_spill] sm:$0xff]  ;;  %v1573_v28 = vld [vmem:[#allocation2 + $0x54] sm:$0xf]  ;;  %3742 = vmatprep.mubr.bf16.mxu1 %v5348_v12  ;;  %v1891_v3 = vrot.slane %v1820_v55, 5  ;;  %v2141_v49 = vshrl.u32 %v1990_v20, 16  ;;  %v2144_v10 = vshll.u32 %v1990_v20, 16 }
 0x1cd   : > { %v1716_v24 = vor.u32 %v6804_v23, %v1711_v50  ;;  %3743 = vmatmul.mubr.bf16.gmra.mxu1 %v4538_v4  ;;  %2215 = vst [vmem:[#allocation3 + $0x1a8] sm:$0xf] %v2139_v37  ;;  %v1707_v52 = vrot.slane %v1706_v63, 4  ;;  %v2150_v7 = vshll.u32 %v6147_v62, 16  ;;  %v2160_v32 = vshll.u32 %v1992_v43, 16  ;;  %v5370_v47 = vld [vmem:[#allocation4 + $0x200] sm:$0xff]  }
 0x1ce   : > { %v5352_v34 = vld [vmem:[#allocation3 + $0x134] ss:$36 sps:$4 sm:$0xff]   ;;  %v1892_v8 = vsel %vm5930_vm15, %v1890_v0, %v1891_v3  ;;  %v2143_v48 = vrot.slane %v2141_v49, 4  ;;  %v1821_v33 = vld [vmem:[#allocation2 + $0x54] sm:$0xe]  ;;  %v2146_v26 = vrot.slane %v2144_v10, 5  ;;  %5049 = vmatprep.subr.bf16.mxu0 %v5370_v47 }
 0x1cf   : > { %v1717_v42 = vrot.slane %v1716_v24, 4  ;;  %v1712_v21 = vsel %vm5997_vm4, %v1707_v52, %v1711_v50  ;;  %1934 = vst [vmem:[#allocation3 + $0x1a0] sm:$0xf] %v1892_v8  ;;  %v2152_v19 = vrot.slane %v2150_v7, 5  ;;  %v1822_v62 = vld [vmem:[#allocation2 + $0x58] sm:$0xf]  ;;  %3645 = vmatprep.mubr.bf16.mxu0 %v5352_v34  ;;  %5050 = vmatpush3.bf16.msra.mxu0 %v5370_v47 }
 0x1d0   : > { %1797 = vst [vmem:[#allocation3 + $0x178] sm:$0xf] %v1712_v21  ;;  %v2162_v57 = vrot.slane %v2160_v32, 5  ;;  %v1724_v38 = vshrl.u32 %v1573_v28, 16  ;;  %v1727_v30 = vshll.u32 %v1573_v28, 16  ;;  %v1733_v22 = vshll.u32 %v6195_v9, 16 }
 0x1d1   : > { %v1722_v25 = vsel %vm5997_vm4, %v1717_v42, %v1721_v46  ;;  %v1823_v60 = vld [vmem:[#allocation2 + $0x5c] sm:$0x1]  ;;  %v2147_v14 = vor.u32 %v2146_v26, %v2143_v48  ;;  %v2157_v59 = vor.u32 %v6167_v27, %v2152_v19  ;;  %v1743_v61 = vshll.u32 %v1575_v58, 16  ;;  %v1954_v40 = vld [vmem:[#allocation2 + $0x6c] sm:$0xf] }
 0x1d2   : > { %1798 = vst [vmem:[#allocation3 + $0x19c] sm:$0xf] %v1722_v25  ;;  %v4485_v15 = vrot.slane %v1821_v33, 9  ;;  %v1955_v41 = vld [vmem:[#allocation2 + $0x70] sm:$0xf]  ;;  %v1726_v6 = vrot.slane %v1724_v38, 4 }
 0x1d3   : > { %v1729_v29 = vrot.slane %v1727_v30, 5  ;;  %v1735_v45 = vrot.slane %v1733_v22, 5  ;;  %v1895_v55 = vrot.slane %v1822_v62, 5  ;;  %v1576_v39 = vld [vmem:[#allocation2 + $0x60] sm:$0xf]  ;;  %v2409_v53 = vld [vmem:[#allocation3 + $0x180] sm:$0xff] }
 0x1d4   : > { %1970 = vst [vmem:[#allocation3 + $0x210] sm:$0xf] %v1954_v40  ;;  %1971 = vst [vmem:[#allocation3 + $0x234] sm:$0xf] %v1955_v41  ;;  %v5357_v16 = vld [vmem:[#allocation3 + $0x130] ss:$36 sps:$4 sm:$0xff]  }
 0x1d5   : > { %v2148_v9 = vrot.slane %v2147_v14, 4  ;;  %v2158_v17 = vrot.slane %v2157_v59, 4  ;;  %v1745_v20 = vrot.slane %v1743_v61, 5  ;;  %v1898_v56 = vrot.slane %v1823_v60, 5  ;;  %v1578_v31 = vld [vmem:[#allocation2 + $0x68] sm:$0x1]  ;;  %3646 = vmatmul.mubr.bf16.gmra.mxu0 %v5357_v16 }
 0x1d6   : > { %v2414_v27 = vld [vmem:[#allocation3 + $0x1a4] sm:$0xff]  ;;  %v1730_v50 = vor.u32 %v1729_v29, %v1726_v6  ;;  %v1740_v46 = vor.u32 %v6236_v36, %v1735_v45  ;;  %v1896_v43 = vsel %vm5930_vm15, %v4485_v15, %v1895_v55  ;;  %v1897_v51 = vrot.slane %v1895_v55, 4  ;;  %v1825_v2 = vld [vmem:[#allocation2 + $0x64] sm:$0xf]  ;;  %v1826_v4 = vld [vmem:[#allocation2 + $0x68] sm:$0x1] }
 0x1d7   : > { %v5354_v11 = vld [vmem:[#allocation3 + $0x184] ss:$36 sps:$4 sm:$0xff]   ;;  %v4547_v12 = vcombine.low %v2409_v53, %v2414_v27  ;;  %v2153_v54 = vsel %vm5997_vm4, %v2148_v9, %v2152_v19  ;;  %v2163_v18 = vsel %vm5997_vm4, %v2158_v17, %v2162_v57  ;;  %1935 = vst [vmem:[#allocation3 + $0x1c4] sm:$0xf] %v1896_v43  ;;  %v1748_v0 = vshrl.u32 %v1576_v39, 16 }
 0x1d8   : > { %v1824_v35 = vld [vmem:[#allocation2 + $0x60] sm:$0xe]  ;;  %3750 = vmatprep.mubr.bf16.mxu1 %v5354_v11  ;;  %2216 = vst [vmem:[#allocation3 + $0x1cc] sm:$0xf] %v2153_v54  ;;  %2217 = vst [vmem:[#allocation3 + $0x1f0] sm:$0xf] %v2163_v18  ;;  %v1899_v63 = vsel %vm5930_vm15, %v1897_v51, %v1898_v56 }
 0x1d9   : > { %v1731_v36 = vrot.slane %v1730_v50, 4  ;;  %v1741_v13 = vrot.slane %v1740_v46, 4  ;;  %v1751_v23 = vshll.u32 %v1576_v39, 16  ;;  %v1993_v24 = vld [vmem:[#allocation2 + $0x6c] sm:$0xf]  ;;  %3751 = vmatmul.mubr.bf16.gmra.mxu1 %v4547_v12  ;;  %v1750_v37 = vrot.slane %v1748_v0, 4 }
 0x1da   : > { %v5358_v28 = vld [vmem:[#allocation3 + $0x17c] ss:$36 sps:$4 sm:$0xff]   ;;  %1936 = vst [vmem:[#allocation3 + $0x1e8] sm:$0xf] %v1899_v63  ;;  %v5410_v3 = vld [vmem:[#allocation2 + $0x64] sm:$0xf] }
 0x1db   : > { %v1757_v49 = vshll.u32 %v5410_v3, 16  ;;  %v1736_v10 = vsel %vm5997_vm4, %v1731_v36, %v1735_v45  ;;  %v1746_v58 = vsel %vm5997_vm4, %v1741_v13, %v1745_v20  ;;  %v1753_v52 = vrot.slane %v1751_v23, 5  ;;  %v1994_v7 = vld [vmem:[#allocation2 + $0x70] sm:$0xf]  ;;  %3653 = vmatprep.mubr.bf16.mxu0 %v5358_v28  ;;  %v1995_v21 = vld [vmem:[#allocation2 + $0x74] sm:$0x1] }
 0x1dc   : > { %v1767_v42 = vshll.u32 %v1578_v31, 16  ;;  %1799 = vst [vmem:[#allocation3 + $0x1c0] sm:$0xf] %v1736_v10  ;;  %1800 = vst [vmem:[#allocation3 + $0x1e4] sm:$0xf] %v1746_v58  ;;  %v4486_v47 = vrot.slane %v1824_v35, 9 }
 0x1dd   : > { %v1759_v32 = vrot.slane %v1757_v49, 5  ;;  %v1902_v34 = vrot.slane %v1825_v2, 5  ;;  %v1905_v8 = vrot.slane %v1826_v4, 5  ;;  %v1754_v48 = vor.u32 %v1753_v52, %v1750_v37  ;;  %v2220_v19 = vld [vmem:[#allocation2 + $0x18] sm:$0xe] }
 0x1de   : > { %v1769_v33 = vrot.slane %v1767_v42, 5  ;;  %v2165_v25 = vshrl.u32 %v1993_v24, 16  ;;  %v2168_v26 = vshll.u32 %v1993_v24, 16  ;;  %v2221_v62 = vld [vmem:[#allocation2 + $0x1c] sm:$0xf]  ;;  %v2174_v60 = vshll.u32 %v1994_v7, 16 }
 0x1df   : > { %v5363_v57 = vld [vmem:[#allocation3 + $0x178] ss:$36 sps:$4 sm:$0xff]   ;;  %v1764_v38 = vor.u32 %v6165_v44, %v1759_v32  ;;  %v1903_v30 = vsel %vm5930_vm15, %v4486_v47, %v1902_v34  ;;  %v1904_v22 = vrot.slane %v1902_v34, 4  ;;  %v2222_v14 = vld [vmem:[#allocation2 + $0x20] sm:$0x1]  ;;  %v1755_v59 = vrot.slane %v1754_v48, 4 }
 0x1e0   : > { %1937 = vst [vmem:[#allocation3 + $0x20c] sm:$0xf] %v1903_v30  ;;  %v2167_v61 = vrot.slane %v2165_v25, 4  ;;  %v2170_v15 = vrot.slane %v2168_v26, 5  ;;  %v2178_v40 = vshrl.u32 %v1994_v7, 16  ;;  %v2419_v6 = vld [vmem:[#allocation3 + $0x1c8] sm:$0xff]  ;;  %3654 = vmatmul.mubr.bf16.gmra.mxu0 %v5363_v57 }
 0x1e1   : > { %v2226_v41 = vld [vmem:[#allocation2 + $0x30] sm:$0xe]  ;;  %v2424_v29 = vld [vmem:[#allocation3 + $0x1ec] sm:$0xff]  ;;  %v1765_v55 = vrot.slane %v1764_v38, 4  ;;  %v1906_v39 = vsel %vm5930_vm15, %v1904_v22, %v1905_v8  ;;  %v2176_v44 = vrot.slane %v2174_v60, 5  ;;  %v1760_v9 = vsel %vm5997_vm4, %v1755_v59, %v1759_v32 }
 0x1e2   : > { %v5360_v45 = vld [vmem:[#allocation3 + $0x1cc] ss:$36 sps:$4 sm:$0xff]   ;;  %v2227_v53 = vld [vmem:[#allocation2 + $0x34] sm:$0xf]  ;;  %v4556_v16 = vcombine.low %v2419_v6, %v2424_v29  ;;  %1938 = vst [vmem:[#allocation3 + $0x230] sm:$0xf] %v1906_v39  ;;  %v2171_v17 = vor.u32 %v2170_v15, %v2167_v61 }
 0x1e3   : > { %v2180_v20 = vrot.slane %v2178_v40, 4  ;;  %v2228_v56 = vld [vmem:[#allocation2 + $0x38] sm:$0x1]  ;;  %v2229_v31 = vld [vmem:[#allocation2 + $0x3c] sm:$0xe]  ;;  %3758 = vmatprep.mubr.bf16.mxu1 %v5360_v45  ;;  %v1770_v27 = vsel %vm5997_vm4, %v1765_v55, %v1769_v33  ;;  %v2184_v11 = vshll.u32 %v1995_v21, 16 }
 0x1e4   : > { %1801 = vst [vmem:[#allocation3 + $0x208] sm:$0xf] %v1760_v9  ;;  %v4487_v50 = vrot.slane %v2220_v19, 9  ;;  %v2270_v46 = vrot.slane %v2221_v62, 5  ;;  %v2230_v43 = vld [vmem:[#allocation2 + $0x40] sm:$0xf]  ;;  %3759 = vmatmul.mubr.bf16.gmra.mxu1 %v4556_v16 }
 0x1e5   : > { %v5364_v51 = vld [vmem:[#allocation3 + $0x1c4] ss:$36 sps:$4 sm:$0xff]   ;;  %1802 = vst [vmem:[#allocation3 + $0x22c] sm:$0xf] %v1770_v27  ;;  %v2172_v35 = vrot.slane %v2171_v17, 4  ;;  %v2181_v12 = vor.u32 %v2180_v20, %v2176_v44  ;;  %v2273_v54 = vrot.slane %v2222_v14, 5 }
 0x1e6   : > { %v2186_v18 = vrot.slane %v2184_v11, 5  ;;  %v2271_v0 = vsel %vm5930_vm15, %v4487_v50, %v2270_v46  ;;  %v2272_v2 = vrot.slane %v2270_v46, 4  ;;  %v4489_v4 = vrot.slane %v2226_v41, 9  ;;  %3661 = vmatprep.mubr.bf16.mxu0 %v5364_v51  ;;  %v2231_v24 = vld [vmem:[#allocation2 + $0x44] sm:$0x1] }
 0x1e7   : > { %v2177_v36 = vsel %vm5997_vm4, %v2172_v35, %v2176_v44  ;;  %v2182_v13 = vrot.slane %v2181_v12, 4  ;;  %2340 = vst [vmem:[#allocation3 + $0x20] sm:$0xf] %v2271_v0  ;;  %v2284_v63 = vrot.slane %v2227_v53, 5  ;;  %v2287_v23 = vrot.slane %v2228_v56, 5 }
 0x1e8   : > { %v5367_v28 = vld [vmem:[#allocation3 + $0x1c0] ss:$36 sps:$4 sm:$0xff]   ;;  %2218 = vst [vmem:[#allocation3 + $0x214] sm:$0xf] %v2177_v36  ;;  %v2274_v37 = vsel %vm5930_vm15, %v2272_v2, %v2273_v54  ;;  %v4490_v3 = vrot.slane %v2229_v31, 9  ;;  %v2291_v49 = vrot.slane %v2230_v43, 5 }
 0x1e9   : > { %v2294_v10 = vrot.slane %v2231_v24, 5  ;;  %v2232_v58 = vld [vmem:[#allocation2 + $0x48] sm:$0xe]  ;;  %v2187_v52 = vsel %vm5997_vm4, %v2182_v13, %v2186_v18  ;;  %2341 = vst [vmem:[#allocation3 + $0x44] sm:$0xf] %v2274_v37  ;;  %v2285_v42 = vsel %vm5930_vm15, %v4489_v4, %v2284_v63  ;;  %v2286_v7 = vrot.slane %v2284_v63, 4  ;;  %3662 = vmatmul.mubr.bf16.gmra.mxu0 %v5367_v28 }
 0x1ea   : > { %v2233_v32 = vld [vmem:[#allocation2 + $0x4c] sm:$0xf]  ;;  %v2234_v47 = vld [vmem:[#allocation2 + $0x50] sm:$0x1]  ;;  %v4491_v34 = vrot.slane %v2232_v58, 9  ;;  %v2292_v8 = vsel %vm5930_vm15, %v4490_v3, %v2291_v49  ;;  %v2293_v48 = vrot.slane %v2291_v49, 4 }
 0x1eb   : > { %2219 = vst [vmem:[#allocation3 + $0x238] sm:$0xf] %v2187_v52  ;;  %2344 = vst [vmem:[#allocation3 + $0xb0] sm:$0xf] %v2285_v42  ;;  %v2298_v33 = vrot.slane %v2233_v32, 5  ;;  %v2301_v21 = vrot.slane %v2234_v47, 5  ;;  %v2288_v5 = vsel %vm5930_vm15, %v2286_v7, %v2287_v23 }
 0x1ec   : > { %v2235_v25 = vld [vmem:[#allocation2 + $0x54] sm:$0xe]  ;;  %2346 = vst [vmem:[#allocation3 + $0xf8] sm:$0xf] %v2292_v8  ;;  %v2236_v26 = vld [vmem:[#allocation2 + $0x58] sm:$0xf]  ;;  %v2295_v38 = vsel %vm5930_vm15, %v2293_v48, %v2294_v10 }
 0x1ed   : > { %v2237_v19 = vld [vmem:[#allocation2 + $0x5c] sm:$0x1]  ;;  %v4492_v62 = vrot.slane %v2235_v25, 9  ;;  %v5368_v57 = vld [vmem:[#allocation3 + $0x20c] ss:$36 sps:$4 sm:$0xff]   ;;  %v2299_v30 = vsel %vm5930_vm15, %v4491_v34, %v2298_v33  ;;  %v2300_v22 = vrot.slane %v2298_v33, 4 }
 0x1ee   : > { %2345 = vst [vmem:[#allocation3 + $0xd4] sm:$0xf] %v2288_v5  ;;  %2347 = vst [vmem:[#allocation3 + $0x11c] sm:$0xf] %v2295_v38  ;;  %v2305_v60 = vrot.slane %v2236_v26, 5  ;;  %v2308_v14 = vrot.slane %v2237_v19, 5  ;;  %3669 = vmatprep.mubr.bf16.mxu0 %v5368_v57 }
 0x1ef   : > { %2348 = vst [vmem:[#allocation3 + $0x140] sm:$0xf] %v2299_v30  ;;  %v2238_v59 = vld [vmem:[#allocation2 + $0x60] sm:$0xe]  ;;  %v2239_v61 = vld [vmem:[#allocation2 + $0x64] sm:$0xf]  ;;  %v2302_v15 = vsel %vm5930_vm15, %v2300_v22, %v2301_v21 }
 0x1f0   : > { %v2240_v40 = vld [vmem:[#allocation2 + $0x68] sm:$0x1]  ;;  %v4493_v41 = vrot.slane %v2238_v59, 9  ;;  %v2312_v6 = vrot.slane %v2239_v61, 5  ;;  %2349 = vst [vmem:[#allocation3 + $0x164] sm:$0xf] %v2302_v15  ;;  %v2306_v29 = vsel %vm5930_vm15, %v4492_v62, %v2305_v60 }
 0x1f1   : > { %v2307_v45 = vrot.slane %v2305_v60, 4  ;;  %v2315_v55 = vrot.slane %v2240_v40, 5  ;;  %v5371_v39 = vld [vmem:[#allocation3 + $0x208] ss:$36 sps:$4 sm:$0xff]   ;;  %2350 = vst [vmem:[#allocation3 + $0x188] sm:$0xf] %v2306_v29 }
 0x1f2   : > { %v2313_v44 = vsel %vm5930_vm15, %v4493_v41, %v2312_v6  ;;  %v2314_v53 = vrot.slane %v2312_v6, 4  ;;  %v2241_v16 = vld [vmem:[#allocation2 + $0x6c] sm:$0xe]  ;;  %v5374_v17 = vld [vmem:[#allocation3 + $0x20] ss:$36 sps:$4 sm:$0xff]   ;;  %3670 = vmatmul.mubr.bf16.gmra.mxu0 %v5371_v39  ;;  %v5386_v24 = vld [vmem:[%s6768_s5 + $0x20] sm:$0xff]  }
 0x1f3   : > { %v5372_v9 = vld [vmem:[#allocation3 + $0x214] ss:$36 sps:$4 sm:$0xff]   ;;  %v2309_v56 = vsel %vm5930_vm15, %v2307_v45, %v2308_v14  ;;  %2352 = vst [vmem:[#allocation3 + $0x1d0] sm:$0xf] %v2313_v44  ;;  %v2243_v11 = vld [vmem:[#allocation2 + $0x74] sm:$0x1]  ;;  %5051 = vmatprep.mubr.bf16.mxu0 %v5374_v17 }
 0x1f4   : > { %v5375_v20 = vld [vmem:[#allocation3 + $0x210] ss:$36 sps:$4 sm:$0xff]   ;;  %2351 = vst [vmem:[#allocation3 + $0x1ac] sm:$0xf] %v2309_v56  ;;  %v2316_v31 = vsel %vm5930_vm15, %v2314_v53, %v2315_v55  ;;  %v2242_v27 = vld [vmem:[#allocation2 + $0x70] sm:$0xf]  ;;  %3766 = vmatprep.mubr.bf16.mxu1 %v5372_v9 }
 0x1f5   : > { %2353 = vst [vmem:[#allocation3 + $0x1f4] sm:$0xf] %v2316_v31  ;;  %v4494_v50 = vrot.slane %v2241_v16, 9  ;;  %3767 = vmatmul.mubr.bf16.gmra.mxu1 %v5375_v20  ;;  %v2319_v46 = vrot.slane %v2242_v27, 5  ;;  %v2322_v43 = vrot.slane %v2243_v11, 5  ;;  %v5383_v4 = vld [vmem:[%s6768_s5 + $0x38] sm:$0xff]  }
 0x1f6   : > { %v5376_v54 = vld [vmem:[#allocation3 + $0x68] ss:$36 sps:$4 sm:$0xff]   ;;  %v5377_v18 = vld [vmem:[#allocation3 + $0xb0] ss:$36 sps:$4 sm:$0xff]   ;;  %v5378_v0 = vld [vmem:[#allocation3 + $0xf8] ss:$36 sps:$4 sm:$0xff]   ;;  %5067 = vmatprep.subr.bf16.mxu1 %v5383_v4 }
 0x1f7   : > { %v2320_v51 = vsel %vm5930_vm15, %v4494_v50, %v2319_v46  ;;  %v2321_v35 = vrot.slane %v2319_v46, 4  ;;  %v5379_v2 = vld [vmem:[#allocation3 + $0x140] ss:$36 sps:$4 sm:$0xff]   ;;  %5068 = vmatpush3.bf16.msra.mxu1 %v5383_v4  ;;  %v5385_v23 = vld [vmem:[%s6768_s5 + $0x28] sm:$0xff]   ;;  %v5388_v3 = vld [vmem:[%s6768_s5 + $0x10] sm:$0xff]  }
 0x1f8   : > { %2354 = vst [vmem:[#allocation3 + $0x218] sm:$0xf] %v2320_v51  ;;  %5069 = vmatprep.subr.bf16.mxu1 %v5384_v1  ;;  %v5387_v28 = vld [vmem:[%s6768_s5 + $0x18] sm:$0xff]   ;;  %v5389_v32 = vld [vmem:[%s6768_s5 + $0x8] sm:$0xff]   ;;  %v4080_v47 = vld [vmem:[%s6770_s7] sm:$0x3] }
 0x1f9   : > { %v2323_v12 = vsel %vm5930_vm15, %v2321_v35, %v2322_v43  ;;  %5120 = vmatprep.subr.msk.bf16.mxu0 %vm520_vm1, %v4080_v47  ;;  %v6402_v21 = vsel %vm520_vm1, %v4080_v47, 0  ;;  %v6407_v25 = vld [vmem:[%s6767_s4] ss:$0 sm:$0xff] }
 0x1fa   : > { %2355 = vst [vmem:[#allocation3 + $0x23c] sm:$0xf] %v2323_v12  ;;  %5052 = vmatmul.mubr.bf16.vlgmr.msra.gmra.mxu0 %v5376_v54  ;;  %6805 = vst [vmem:[#allocation12_spill] sm:$0xff] %v6402_v21  ;;  %v5390_v6 = vld [vmem:[%s6768_s5] sm:$0xff]  }
 0x1fb   : > { %5055 = vmatprep.mubr.bf16.mxu0 %v5377_v18  ;;  %v5380_v36 = vld [vmem:[#allocation3 + $0x188] ss:$36 sps:$4 sm:$0xff]   ;;  %5070 = vmatpush3.bf16.msra.mxu1 %v5384_v1  ;;  %v5392_v18 = vld [vmem:[%s5703_s3 + $0x8] sm:$0xff]  }
 0x1fc   : > { %v5381_v13 = vld [vmem:[#allocation3 + $0x1d0] ss:$36 sps:$4 sm:$0xff]   ;;  %5071 = vmatprep.subr.bf16.mxu1 %v5385_v23  ;;  %5100 = vmatpush3.bf16.msra.mxu0 %v6402_v21  ;;  %v5391_v43 = vld [vmem:[%s5703_s3] sm:$0xff]  }
 0x1ff   : > { %5072 = vmatpush3.bf16.msra.mxu1 %v5385_v23 }
 0x200   : > { %5073 = vmatprep.subr.bf16.mxu1 %v5386_v24 }
 0x201   : > { %v5382_v63 = vld [vmem:[#allocation3 + $0x218] ss:$36 sps:$4 sm:$0xff]  }
 0x202   : > { %5056 = vmatmul.mubr.bf16.gmra.mxu0 %v5378_v0 }
 0x203   : > { %5059 = vmatprep.mubr.bf16.mxu0 %v5379_v2  ;;  %5074 = vmatpush3.bf16.msra.mxu1 %v5386_v24 }
 0x204   : > { %5075 = vmatprep.subr.bf16.mxu1 %v5387_v28 }
 0x205   : > { %v4788_v37 = vpop.f32.mrf.mxu1 }
 0x207   : > { %5076 = vmatpush3.bf16.msra.mxu1 %v5387_v28  ;;  %v4789_v49 = vpop.f32.mrf.mxu1 }
 0x208   : > { %5077 = vmatprep.subr.bf16.mxu1 %v5388_v3  ;;  %v4790_v10 = vadd.f32 %v4789_v49, %v4788_v37  ;;  %v5393_v49 = vld [vmem:[%s5703_s3 + $0x10] sm:$0xff]  }
 0x209   : > { %v4791_v58 = vpop.f32.mrf.mxu1 }
 0x20a   : > { %5060 = vmatmul.mubr.bf16.gmra.mxu0 %v5380_v36 }
 0x20b   : > { %5063 = vmatprep.mubr.bf16.mxu0 %v5381_v13  ;;  %5078 = vmatpush3.bf16.msra.mxu1 %v5388_v3  ;;  %v4792_v52 = vpop.f32.mrf.mxu1 }
 0x20c   : > { %v4793_v42 = vadd.f32 %v4792_v52, %v4791_v58  ;;  %5079 = vmatprep.subr.bf16.mxu1 %v5389_v32 }
 0x20d   : > { %v4794_v7 = vpop.f32.mrf.mxu1 }
 0x20f   : > { %v4795_v34 = vpop.f32.mrf.mxu1  ;;  %5080 = vmatpush3.bf16.msra.mxu1 %v5389_v32 }
 0x210   : > { %v4796_v48 = vadd.f32 %v4795_v34, %v4794_v7  ;;  %5081 = vmatprep.subr.bf16.mxu1 %v5390_v6  ;;  %v5394_v7 = vld [vmem:[%s5703_s3 + $0x18] sm:$0xff]  }
 0x211   : > { %v4797_v33 = vpop.f32.mrf.mxu1 }
 0x212   : > { %5064 = vmatmul.mubr.bf16.gmra.mxu0 %v5382_v63 }
 0x213   : > { %v4798_v19 = vpop.f32.mrf.mxu1  ;;  %5082 = vmatpush3.bf16.msra.mxu1 %v5390_v6  ;;  %5101 = vmatprep.mubr.msk.bf16.mxu0 %vm495_vm2, %v5391_v43 }
 0x214   : > { %v4799_v57 = vadd.f32 %v4798_v19, %v4797_v33  ;;  %5121 = vmatprep.subr.msk.bf16.mxu1 %vm520_vm1, %v4080_v47  ;;  %vm4284_vm1 = vcmask 130048  }
 0x219   : > { %v4724_v8 = vpop.f32.mrf.mxu0 }
 0x21a   : > { %5102 = vmatmul.mubr.msk.bf16.vlgmr.msra.gmra.mxu0 %vm495_vm2, %v5392_v18 }
 0x21b   : > { %v4725_v5 = vpop.f32.mrf.mxu0  ;;  %5105 = vmatprep.mubr.msk.bf16.mxu0 %vm495_vm2, %v5393_v49 }
 0x21c   : > { %v4726_v26 = vadd.f32 %v4725_v5, %v4724_v8 }
 0x21d   : > { %v4727_v62 = vpop.f32.mrf.mxu0 }
 0x21e   : > { %v3422_v38 = vadd.f32 %v4726_v26, %v6407_v25 }
 0x21f   : > { %v4728_v22 = vpop.f32.mrf.mxu0 }
 0x220   : > { %v4800_v30 = vpop.f32.mrf.mxu1  ;;  %v4729_v60 = vadd.f32 %v4728_v22, %v4727_v62  ;;  %v6411_v59 = vadd.f32 %v4790_v10, %v3422_v38 }
 0x222   : > { %v4801_v14 = vpop.f32.mrf.mxu1  ;;  %v3425_v40 = vadd.f32 %v4729_v60, %v6407_v25  ;;  %5106 = vmatmul.mubr.msk.bf16.gmra.mxu0 %vm495_vm2, %v5394_v7 }
 0x223   : > { %v4730_v61 = vpop.f32.mrf.mxu0  ;;  %v4802_v15 = vadd.f32 %v4801_v14, %v4800_v30  ;;  %v5395_v30 = vld [vmem:[%s5703_s3 + $0x20] sm:$0xff]  }
 0x224   : > { %v4803_v41 = vpop.f32.mrf.mxu1  ;;  %v6417_v39 = vadd.f32 %v4793_v42, %v3425_v40  ;;  %5109 = vmatprep.mubr.msk.bf16.mxu0 %vm495_vm2, %v5395_v30 }
 0x225   : > { %v4731_v29 = vpop.f32.mrf.mxu0 }
 0x226   : > { %v4732_v45 = vadd.f32 %v4731_v29, %v4730_v61  ;;  %v4804_v55 = vpop.f32.mrf.mxu1 }
 0x227   : > { %v4733_v44 = vpop.f32.mrf.mxu0  ;;  %v4805_v53 = vadd.f32 %v4804_v55, %v4803_v41 }
 0x228   : > { %v3430_v16 = vadd.f32 %v4732_v45, %v6407_v25 }
 0x229   : > { %v4734_v17 = vpop.f32.mrf.mxu0 }
 0x22a   : > { %v4806_v9 = vpop.f32.mrf.mxu1  ;;  %v4735_v20 = vadd.f32 %v4734_v17, %v4733_v44  ;;  %v6421_v31 = vadd.f32 %v4796_v48, %v3430_v16 }
 0x22c   : > { %v4807_v56 = vpop.f32.mrf.mxu1  ;;  %v3433_v50 = vadd.f32 %v4735_v20, %v6407_v25 }
 0x22d   : > { %v4808_v11 = vadd.f32 %v4807_v56, %v4806_v9 }
 0x22e   : > { %v4809_v46 = vpop.f32.mrf.mxu1  ;;  %v6425_v54 = vadd.f32 %v4799_v57, %v3433_v50 }
 0x22f   : > { %v4736_v27 = vpop.f32.mrf.mxu0 }
 0x230   : > { %v4810_v12 = vpop.f32.mrf.mxu1 }
 0x231   : > { %v4737_v51 = vpop.f32.mrf.mxu0  ;;  %v4811_v2 = vadd.f32 %v4810_v12, %v4809_v46 }
 0x232   : > { %v4738_v35 = vadd.f32 %v4737_v51, %v4736_v27 }
 0x233   : > { %v4739_v0 = vpop.f32.mrf.mxu0 }
 0x234   : > { %v3438_v4 = vadd.f32 %v4738_v35, %v6407_v25  ;;  %v4812_v36 = vpop.f32.mrf.mxu1 }
 0x235   : > { %v4740_v13 = vpop.f32.mrf.mxu0 }
 0x236   : > { %v4741_v1 = vadd.f32 %v4740_v13, %v4739_v0  ;;  %v4813_v63 = vpop.f32.mrf.mxu1  ;;  %v6431_v23 = vadd.f32 %v4802_v15, %v3438_v4  ;;  %v5396_v15 = vld [vmem:[%s5703_s3 + $0x28] sm:$0xff]  }
 0x237   : > { %v4814_v28 = vadd.f32 %v4813_v63, %v4812_v36  ;;  %5110 = vmatmul.mubr.msk.bf16.gmra.mxu0 %vm495_vm2, %v5396_v15 }
 0x238   : > { %v3441_v37 = vadd.f32 %v4741_v1, %v6407_v25  ;;  %v4815_v3 = vpop.f32.mrf.mxu1 }
 0x23a   : > { %v4816_v52 = vpop.f32.mrf.mxu1  ;;  %v6435_v42 = vadd.f32 %v4805_v53, %v3441_v37 }
 0x23b   : > { %v4817_v47 = vadd.f32 %v4816_v52, %v4815_v3 }
 0x23c   : > { %v4742_v24 = vpop.f32.mrf.mxu0 }
 0x23e   : > { %v4743_v10 = vpop.f32.mrf.mxu0 }
 0x23f   : > { %v4744_v58 = vadd.f32 %v4743_v10, %v4742_v24  ;;  %v4818_v8 = vpop.f32.mrf.mxu1 }
 0x240   : > { %v4745_v32 = vpop.f32.mrf.mxu0 }
 0x241   : > { %v3446_v34 = vadd.f32 %v4744_v58, %v6407_v25  ;;  %v4819_v5 = vpop.f32.mrf.mxu1 }
 0x242   : > { %v4746_v48 = vpop.f32.mrf.mxu0  ;;  %v4820_v62 = vadd.f32 %v4819_v5, %v4818_v8 }
 0x243   : > { %v4747_v33 = vadd.f32 %v4746_v48, %v4745_v32  ;;  %v6441_v26 = vadd.f32 %v4808_v11, %v3446_v34  ;;  %v4821_v38 = vpop.f32.mrf.mxu1 }
 0x245   : > { %v3449_v57 = vadd.f32 %v4747_v33, %v6407_v25  ;;  %v4822_v14 = vpop.f32.mrf.mxu1 }
 0x246   : > { %v4748_v19 = vpop.f32.mrf.mxu0  ;;  %v4823_v41 = vadd.f32 %v4822_v14, %v4821_v38 }
 0x247   : > { %v6445_v61 = vadd.f32 %v4811_v2, %v3449_v57  ;;  %v4824_v29 = vpop.f32.mrf.mxu1 }
 0x248   : > { %v4749_v22 = vpop.f32.mrf.mxu0 }
 0x249   : > { %v4750_v60 = vadd.f32 %v4749_v22, %v4748_v19  ;;  %v4825_v44 = vpop.f32.mrf.mxu1 }
 0x24a   : > { %v4751_v40 = vpop.f32.mrf.mxu0  ;;  %v4826_v9 = vadd.f32 %v4825_v44, %v4824_v29 }
 0x24b   : > { %v3454_v6 = vadd.f32 %v4750_v60, %v6407_v25  ;;  %v4827_v20 = vpop.f32.mrf.mxu1 }
 0x24c   : > { %v4752_v45 = vpop.f32.mrf.mxu0 }
 0x24d   : > { %v4753_v55 = vadd.f32 %v4752_v45, %v4751_v40  ;;  %v6451_v53 = vadd.f32 %v4814_v28, %v3454_v6  ;;  %v4828_v11 = vpop.f32.mrf.mxu1 }
 0x24e   : > { %v4754_v16 = vpop.f32.mrf.mxu0  ;;  %v4829_v43 = vadd.f32 %v4828_v11, %v4827_v20 }
 0x24f   : > { %v3457_v17 = vadd.f32 %v4753_v55, %v6407_v25 }
 0x250   : > { %v4755_v56 = vpop.f32.mrf.mxu0 }
 0x251   : > { %v4756_v27 = vadd.f32 %v4755_v56, %v4754_v16  ;;  %v6454_v50 = vadd.f32 %v4817_v47, %v3457_v17 }
 0x252   : > { %v4757_v46 = vpop.f32.mrf.mxu0 }
 0x253   : > { %6806 = vst [vmem:[#allocation13_spill] sm:$0xff] %v6454_v50  ;;  %v3462_v51 = vadd.f32 %v4756_v27, %v6407_v25 }
 0x254   : > { %v4758_v12 = vpop.f32.mrf.mxu0 }
 0x255   : > { %v4830_v35 = vpop.f32.mrf.mxu1  ;;  %v4759_v18 = vadd.f32 %v4758_v12, %v4757_v46  ;;  %v6457_v2 = vadd.f32 %v4820_v62, %v3462_v51 }
 0x257   : > { %v4831_v0 = vpop.f32.mrf.mxu1  ;;  %v3465_v13 = vadd.f32 %v4759_v18, %v6407_v25 }
 0x258   : > { %v4760_v4 = vpop.f32.mrf.mxu0  ;;  %v4832_v36 = vadd.f32 %v4831_v0, %v4830_v35 }
 0x259   : > { %v6460_v1 = vpop.f32.mrf.mxu1  ;;  %v6464_v37 = vadd.f32 %v4823_v41, %v3465_v13 }
 0x25a   : > { %6807 = vst [vmem:[#allocation14_spill] sm:$0xff] %v6460_v1  ;;  %v4761_v63 = vpop.f32.mrf.mxu0 }
 0x25b   : > { %v4762_v24 = vadd.f32 %v4761_v63, %v4760_v4  ;;  %v6462_v28 = vpop.f32.mrf.mxu1  ;;  %6809 = vst [vmem:[#allocation16_spill] sm:$0xff] %v6464_v37 }
 0x25c   : > { %6808 = vst [vmem:[#allocation15_spill] sm:$0xff] %v6462_v28  ;;  %v4763_v3 = vpop.f32.mrf.mxu0 }
 0x25d   : > { %v3470_v49 = vadd.f32 %v4762_v24, %v6407_v25 }
 0x25e   : > { %v6467_v10 = vpop.f32.mrf.mxu1  ;;  %v4764_v58 = vpop.f32.mrf.mxu0 }
 0x25f   : > { %v4765_v52 = vadd.f32 %v4764_v58, %v4763_v3  ;;  %v6471_v32 = vadd.f32 %v4826_v9, %v3470_v49 }
 0x260   : > { %v6469_v7 = vpop.f32.mrf.mxu1 }
 0x261   : > { %6810 = vst [vmem:[#allocation17_spill] sm:$0xff] %v6471_v32  ;;  %v3473_v34 = vadd.f32 %v4765_v52, %v6407_v25 }
 0x262   : > { %v6474_v8 = vpop.f32.mrf.mxu1 }
 0x263   : > { %v6478_v19 = vadd.f32 %v4829_v43, %v3473_v34 }
 0x264   : > { %v4766_v47 = vpop.f32.mrf.mxu0  ;;  %v6476_v5 = vpop.f32.mrf.mxu1 }
 0x265   : > { %6811 = vst [vmem:[#allocation18_spill] sm:$0xff] %v6478_v19 }
 0x266   : > { %v4767_v48 = vpop.f32.mrf.mxu0 }
 0x267   : > { %v4768_v33 = vadd.f32 %v4767_v48, %v4766_v47 }
 0x268   : > { %v4769_v62 = vpop.f32.mrf.mxu0  ;;  %v6481_v38 = vpop.f32.mrf.mxu1 }
 0x269   : > { %v3478_v57 = vadd.f32 %v4768_v33, %v6407_v25 }
 0x26a   : > { %v4770_v30 = vpop.f32.mrf.mxu0  ;;  %v4923_v60 = vpop.f32.mrf.mxu1 }
 0x26b   : > { %v6483_v22 = vadd.f32 %v4770_v30, %v4769_v62  ;;  %v6485_v14 = vadd.f32 %v4832_v36, %v3478_v57 }
 0x26c   : > { %v4925_v40 = vpop.f32.mrf.mxu1 }
 0x26d   : > { %6812 = vst [vmem:[#allocation19_spill] sm:$0xff] %v6485_v14  ;;  %v4852_v15 = vpop.f32.mrf.mxu0 }
 0x26e   : > { %v4926_v29 = vpop.f32.mrf.mxu1 }
 0x26f   : > { %v4853_v41 = vpop.f32.mrf.mxu0 }
 0x270   : > { %v4854_v6 = vadd.f32 %v4853_v41, %v4852_v15  ;;  %v6490_v44 = vpop.f32.mrf.mxu1 }
 0x271   : > { %v4855_v45 = vpop.f32.mrf.mxu0 }
 0x272   : > { %v6488_v55 = vadd.f32 %v4854_v6, %v6411_v59  ;;  %v6492_v9 = vpop.f32.mrf.mxu1 }
 0x273   : > { %v4856_v16 = vpop.f32.mrf.mxu0 }
 0x274   : > { %v6494_v20 = vpop.f32.mrf.mxu1 }
 0x276   : > { %v6496_v27 = vpop.f32.mrf.mxu1 }
 0x277   : > { %v4858_v17 = vpop.f32.mrf.mxu0 }
 0x279   : > { %v4859_v56 = vpop.f32.mrf.mxu0 }
 0x27a   : > { %v4860_v50 = vadd.f32 %v4859_v56, %v4858_v17  ;;  %v4918_v17 = vadd.f32 %v6469_v7, %v6467_v10 }
 0x27b   : > { %v4861_v11 = vpop.f32.mrf.mxu0 }
 0x27d   : > { %v4862_v43 = vpop.f32.mrf.mxu0 }
 0x27e   : > { %v4863_v21 = vadd.f32 %v4862_v43, %v4861_v11  ;;  %v4927_v11 = vadd.f32 %v4926_v29, %v4925_v40 }
 0x27f   : > { %v6498_v46 = vpop.f32.mrf.mxu1 }
 0x281   : > { %v6500_v51 = vpop.f32.mrf.mxu1  ;;  %v4864_v35 = vpop.f32.mrf.mxu0 }
 0x283   : > { %v6502_v59 = vpop.f32.mrf.mxu1  ;;  %v4865_v12 = vpop.f32.mrf.mxu0 }
 0x285   : > { %v4867_v18 = vpop.f32.mrf.mxu0  ;;  %v6504_v0 = vpop.f32.mrf.mxu1 }
 0x287   : > { %v4868_v4 = vpop.f32.mrf.mxu0 }
 0x28b   : > { %v4870_v36 = vpop.f32.mrf.mxu0 }
 0x28d   : > { %v6506_v13 = vpop.f32.mrf.mxu1  ;;  %v4871_v63 = vpop.f32.mrf.mxu0 }
 0x28e   : > { %6813 = vst [vmem:[#allocation20_spill] sm:$0xff] %v6506_v13  ;;  %v4872_v43 = vadd.f32 %v4871_v63, %v4870_v36  ;;  %v4939_v36 = vadd.f32 %v6504_v0, %v6502_v59 }
 0x28f   : > { %v4873_v24 = vpop.f32.mrf.mxu0  ;;  %v6508_v3 = vpop.f32.mrf.mxu1 }
 0x290   : > { %6814 = vst [vmem:[#allocation21_spill] sm:$0xff] %v6508_v3  ;;  %v3640_v7 = vadd.f32 %v4872_v43, %v6441_v26  ;;  %v4930_v26 = vadd.f32 %v6492_v9, %v6490_v44 }
 0x291   : > { %v4874_v49 = vpop.f32.mrf.mxu0  ;;  %v6512_v52 = vpop.f32.mrf.mxu1 }
 0x292   : > { %6815 = vst [vmem:[#allocation22_spill] sm:$0xff] %v6512_v52 }
 0x293   : > { %v6518_v48 = vpop.f32.mrf.mxu1 }
 0x294   : > { %6816 = vst [vmem:[#allocation23_spill] sm:$0xff] %v6518_v48 }
 0x295   : > { %v6510_v58 = vpop.f32.mrf.mxu0 }
 0x297   : > { %v6514_v47 = vpop.f32.mrf.mxu0 }
 0x299   : > { %v6516_v34 = vpop.f32.mrf.mxu0  ;;  %v6522_v57 = vpop.f32.mrf.mxu1 }
 0x29b   : > { %v6520_v33 = vpop.f32.mrf.mxu0  ;;  %v6526_v41 = vpop.f32.mrf.mxu1 }
 0x29c   : > { %v4881_v0 = vadd.f32 %v6520_v33, %v6516_v34 }
 0x29d   : > { %v6530_v32 = vpop.f32.mrf.mxu1 }
 0x29e   : > { %6818 = vst [vmem:[#allocation25_spill] sm:$0xff] %v6530_v32  ;;  %v3624_v32 = vadd.f32 %v4860_v50, %v6421_v31  ;;  %v4921_v31 = vadd.f32 %v6476_v5, %v6474_v8  ;;  %v4866_v50 = vadd.f32 %v4865_v12, %v4864_v35  ;;  %v4936_v8 = vadd.f32 %v6500_v51, %v6498_v46 }
 0x29f   : > { %v6536_v48 = vpop.f32.mrf.mxu1 }
 0x2a0   : > { %v4882_v62 = vpop.f32.mrf.mxu0  ;;  %6821 = vst [vmem:[#allocation28_spill] sm:$0xff] %v6536_v48  ;;  %v4924_v48 = vadd.f32 %v4923_v60, %v6481_v38  ;;  %v4869_v60 = vadd.f32 %v4868_v4, %v4867_v18 }
 0x2a2   : > { %v4883_v30 = vpop.f32.mrf.mxu0  ;;  %v3635_v4 = vadd.f32 %v4869_v60, %v6435_v42 }
 0x2a4   : > { %v6524_v15 = vpop.f32.mrf.mxu0  ;;  %v6542_v3 = vpop.f32.mrf.mxu1 }
 0x2a5   : > { %6823 = vst [vmem:[#allocation30_spill] sm:$0xff] %v6542_v3 }
 0x2a6   : > { %v4886_v6 = vpop.f32.mrf.mxu0 }
 0x2a7   : > { %v4887_v44 = vadd.f32 %v4886_v6, %v6524_v15  ;;  %v6826_v6 = vld [vmem:[#allocation16_spill] sm:$0xff] }
 0x2a9   : > { %v6528_v19 = vpop.f32.mrf.mxu0  ;;  %v3659_v43 = vadd.f32 %v4887_v44, %v6826_v6  ;;  %v6846_v6 = vld [vmem:[#allocation18_spill] sm:$0xff] }
 0x2aa   : > { %6817 = vst [vmem:[#allocation24_spill] sm:$0xff] %v6528_v19  ;;  %v4857_v19 = vadd.f32 %v4856_v16, %v4855_v45  ;;  %v3721_v45 = vadd.f32 %v4924_v48, %v3624_v32  ;;  %v3632_v32 = vadd.f32 %v4866_v50, %v6431_v23  ;;  %v4884_v23 = vadd.f32 %v4883_v30, %v4882_v62  ;;  %v6828_v50 = vld [vmem:[#allocation20_spill] sm:$0xff] }
 0x2ab   : > { %v6532_v14 = vpop.f32.mrf.mxu0 }
 0x2ac   : > { %6819 = vst [vmem:[#allocation26_spill] sm:$0xff] %v6532_v14  ;;  %v6549_v14 = vpop.f32.mrf.mxu1  ;;  %v3619_v3 = vadd.f32 %v4857_v19, %v6417_v39  ;;  %v3656_v62 = vadd.f32 %v4884_v23, %v6457_v2 }
 0x2ad   : > { %v6534_v52 = vpop.f32.mrf.mxu0  ;;  %6825 = vst [vmem:[#allocation32_spill] sm:$0xff] %v6549_v14  ;;  %v4875_v14 = vadd.f32 %v4874_v49, %v4873_v24  ;;  %v3729_v49 = vadd.f32 %v4930_v26, %v3632_v32 }
 0x2ae   : > { %6820 = vst [vmem:[#allocation27_spill] sm:$0xff] %v6534_v52  ;;  %v3716_v29 = vadd.f32 %v4921_v31, %v3619_v3  ;;  %v3737_v3 = vadd.f32 %v4936_v8, %v3640_v7  ;;  %v6827_v31 = vld [vmem:[#allocation12_spill] sm:$0xff]  ;;  %v6835_v8 = vld [vmem:[#allocation22_spill] sm:$0xff] }
 0x2af   : > { %v6538_v28 = vpop.f32.mrf.mxu0  ;;  %v3643_v35 = vadd.f32 %v4875_v14, %v6445_v61  ;;  %v4933_v61 = vadd.f32 %v6496_v27, %v6494_v20  ;;  %v4878_v14 = vadd.f32 %v6514_v47, %v6510_v58  ;;  %v3481_v27 = vadd.f32 %v6483_v22, %v6407_v25  ;;  %v6831_v22 = vld [vmem:[#allocation25_spill] sm:$0xff] }
 0x2b0   : > { %6822 = vst [vmem:[#allocation29_spill] sm:$0xff] %v6538_v28  ;;  %v3627_v28 = vadd.f32 %v4863_v21, %v6425_v54  ;;  %v3713_v21 = vadd.f32 %v4918_v17, %v6488_v55  ;;  %v4948_v47 = vadd.f32 %v6526_v41, %v6522_v57 }
 0x2b1   : > { %v3740_v59 = vadd.f32 %v4939_v36, %v3643_v35  ;;  %v3732_v20 = vadd.f32 %v4933_v61, %v3635_v4  ;;  %v3648_v58 = vadd.f32 %v4878_v14, %v6451_v53  ;;  %v6832_v53 = vld [vmem:[#allocation28_spill] sm:$0xff] }
 0x2b2   : > { %v6540_v1 = vpop.f32.mrf.mxu0  ;;  %v3724_v54 = vadd.f32 %v4927_v11, %v3627_v28  ;;  %v3753_v60 = vadd.f32 %v4948_v47, %v3656_v62  ;;  %v6844_v47 = vld [vmem:[#allocation30_spill] sm:$0xff] }
 0x2b4   : > { %v6544_v13 = vpop.f32.mrf.mxu0 }
 0x2b5   : > { %v4896_v41 = vadd.f32 %v6544_v13, %v6540_v1 }
 0x2b6   : > { %v6546_v37 = vpop.f32.mrf.mxu0 }
 0x2b7   : > { %6824 = vst [vmem:[#allocation31_spill] sm:$0xff] %v6546_v37  ;;  %v6558_v37 = vpop.f32.mrf.mxu1 }
 0x2b8   : > { %v6551_v52 = vpop.f32.mrf.mxu0 }
 0x2b9   : > { %v6564_v39 = vpop.f32.mrf.mxu1 }
 0x2ba   : > { %v5053_v56 = vpop.f32.mrf.mxu0 }
 0x2bb   : > { %v3818_v38 = vadd.f32 %v5053_v56, %v3721_v45  ;;  %v6570_v12 = vpop.f32.mrf.mxu1 }
 0x2bc   : > { %v3809_v16 = vpop.f32.mrf.mxu0 }
 0x2bd   : > { %v3810_v19 = vadd.f32 %v3809_v16, %v3713_v21  ;;  %v3874_v28 = vmax.f32 %v3818_v38, 0.0  ;;  %v4959_v42 = vpop.f32.mrf.mxu1  ;;  %v6829_v16 = vld [vmem:[#allocation21_spill] sm:$0xff] }
 0x2be   : > { %v5054_v10 = vpop.f32.mrf.mxu0  ;;  %v4942_v38 = vadd.f32 %v6829_v16, %v6828_v50  ;;  %v6830_v21 = vld [vmem:[#allocation13_spill] sm:$0xff]  ;;  %v6839_v36 = vld [vmem:[#allocation31_spill] sm:$0xff] }
 0x2bf   : > { %v3821_v40 = vadd.f32 %v5054_v10, %v3724_v54  ;;  %v3872_v24 = vmax.f32 %v3810_v19, 0.0  ;;  %v4961_v34 = vpop.f32.mrf.mxu1  ;;  %v3651_v25 = vadd.f32 %v4881_v0, %v6830_v21  ;;  %v4951_v54 = vadd.f32 %v6832_v53, %v6831_v22  ;;  %v6843_v0 = vld [vmem:[#allocation17_spill] sm:$0xff] }
 0x2c0   : > { %v3812_v5 = vpop.f32.mrf.mxu0  ;;  %v3745_v26 = vadd.f32 %v4942_v38, %v3648_v58  ;;  %v4899_v23 = vadd.f32 %v6551_v52, %v6839_v36 }
 0x2c1   : > { %v3875_v55 = vmax.f32 %v3821_v40, 0.0  ;;  %v3813_v18 = vadd.f32 %v3812_v5, %v3716_v29  ;;  %v6833_v40 = vld [vmem:[#allocation14_spill] sm:$0xff]  ;;  %v6834_v29 = vld [vmem:[#allocation15_spill] sm:$0xff]  ;;  %v3756_v13 = vadd.f32 %v4951_v54, %v3659_v43 }
 0x2c2   : > { %v5057_v63 = vpop.f32.mrf.mxu0  ;;  %v4835_v32 = vadd.f32 %v6834_v29, %v6833_v40  ;;  %v6836_v5 = vld [vmem:[#allocation23_spill] sm:$0xff]  ;;  %v5398_v29 = vld [vmem:[%s5703_s3 + $0x38] sm:$0xff]  }
 0x2c3   : > { %v3889_v46 = vpack.c.bf16 %v3875_v55, %v3874_v28  ;;  %v3873_v51 = vmax.f32 %v3813_v18, 0.0  ;;  %v3834_v17 = vadd.f32 %v5057_v63, %v3737_v3  ;;  %v4945_v35 = vadd.f32 %v6836_v5, %v6835_v8  ;;  %v6837_v28 = vld [vmem:[#allocation24_spill] sm:$0xff]  ;;  %v6838_v55 = vld [vmem:[#allocation26_spill] sm:$0xff]  ;;  %v4962_v63 = vpop.f32.mrf.mxu1  ;;  %v5397_v40 = vld [vmem:[%s5703_s3 + $0x30] sm:$0xff]   ;;  %s4419_s3 = sshll.u32 %s352_s21, 7 }
 0x2c4   : > { %v3825_v48 = vpop.f32.mrf.mxu0  ;;  %v4890_v18 = vadd.f32 %v6838_v55, %v6837_v28  ;;  %v3578_v61 = vadd.f32 %v4835_v32, %v3481_v27  ;;  %v4963_v52 = vadd.f32 %v4962_v63, %v4961_v34  ;;  %v6845_v27 = vld [vmem:[#allocation32_spill] sm:$0xff]  ;;  %s6641_s28 = scalar_lea.vmem [#allocation7], %s4419_s3  ;;  %s5540_s3 = smov [#allocation7]  }
 0x2c5   : > { %v3888_v9 = vpack.c.bf16 %v3873_v51, %v3872_v24  ;;  %v3826_v56 = vadd.f32 %v3825_v48, %v3729_v49  ;;  %v3878_v33 = vmax.f32 %v3834_v17, 0.0  ;;  %v6841_v51 = vld [vmem:[#allocation29_spill] sm:$0xff]  ;;  %v3748_v49 = vadd.f32 %v4945_v35, %v3651_v25  ;;  %v6842_v48 = vld [vmem:[#allocation19_spill] sm:$0xff]  ;;  %s4318_s13 = sshll.u32 %s6641_s28, 4  ;;  %s5441_s19 = sshll.u32 %s5540_s3, 4  ;;  %s6704_s13 = int_to_ptr.vmem [resolvable:$true] %s4318_s13  ;;  %s5442_s19 = int_to_ptr.vmem [resolvable:$false] %s5441_s19 }
 0x2c6   : > { %v5058_v30 = vpop.f32.mrf.mxu0  ;;  %v3672_v44 = vadd.f32 %v4896_v41, %v6842_v48  ;;  %v3664_v62 = vadd.f32 %v4890_v18, %v6843_v0  ;;  %v6624_v18 = vld [vmem:[%s6771_s8] ss:$0 sm:$0xff]  ;;  %s5437_s20 = scalar_lea.vmem %s6704_s13, 2048  ;;  %s5443_s25 = scalar_lea.vmem %s5442_s19, 4096 }
 0x2c7   : > { %v3837_v11 = vadd.f32 %v5058_v30, %v3740_v59  ;;  %5083 = vmatprep.mubr.bf16.mxu1 %v3888_v9  ;;  %v3876_v10 = vmax.f32 %v3826_v56, 0.0  ;;  %v4960_v9 = vadd.f32 %v4959_v42, %v6570_v12  ;;  %v3675_v56 = vadd.f32 %v4899_v23, %v3578_v61  ;;  %p5438_p2 = scmp.ne.s32.totalorder %s6704_s13, %s5437_s20  ;;  %p5444_p6 = scmp.lt.s32.totalorder %s6704_s13, %s5442_s19 }
 0x2c8   : > { %v3828_v15 = vpop.f32.mrf.mxu0  ;;  %5084 = vmatmul.mubr.bf16.vlgmr.msra.gmra.mxu1 %v3889_v46  ;;  %v6840_v46 = vld [vmem:[#allocation27_spill] sm:$0xff]  ;;  %p5445_p7 = scmp.lt.s32.totalorder %s5443_s25, %s5437_s20 }
 0x2c9   : > { %v3879_v2 = vmax.f32 %v3837_v11, 0.0  ;;  %v3829_v45 = vadd.f32 %v3828_v15, %v3732_v20  ;;  %5118 = vmatpush3.bf16.msra.mxu1 %v6827_v31  ;;  %v4893_v3 = vadd.f32 %v6841_v51, %v6840_v46  ;;  %v4954_v15 = vadd.f32 %v6845_v27, %v6844_v47  ;;  %p5439_p4 = pnand %p5438_p2, %p5645_p3 }
 0x2ca   : > { %v5061_v57 = vpop.f32.mrf.mxu0  ;;  %v4957_v31 = vadd.f32 %v6564_v39, %v6558_v37  ;;  %v3772_v21 = vadd.f32 %v4963_v52, %v3675_v56  ;;  %p5446_p9 = por %p5445_p7, %p5444_p6 }
 0x2cb   : > { %v3891_v7 = vpack.c.bf16 %v3879_v2, %v3878_v33  ;;  %v3877_v19 = vmax.f32 %v3829_v45, 0.0  ;;  %v3850_v1 = vadd.f32 %v5061_v57, %v3753_v60  ;;  %v3667_v43 = vadd.f32 %v4893_v3, %v6846_v6  ;;  %p5440_p5 = pneg %p5439_p4 }
 0x2cc   : > { %v3841_v4 = vpop.f32.mrf.mxu0  ;;  %v3769_v45 = vadd.f32 %v4960_v9, %v3672_v44  ;;  %v3761_v38 = vadd.f32 %v4954_v15, %v3664_v62 }
 0x2cd   : > { %v3890_v24 = vpack.c.bf16 %v3877_v19, %v3876_v10  ;;  %v3842_v17 = vadd.f32 %v3841_v4, %v3745_v26  ;;  %v3882_v11 = vmax.f32 %v3850_v1, 0.0  ;;  %v3764_v54 = vadd.f32 %v4957_v31, %v3667_v43  ;;  %v6629_v26 = vld [vmem:[%s6769_s6] ss:$0 sm:$0xff]  ;;  %p5447_p11 = pnand %p5446_p9, %p5440_p5 }
 0x2ce   : > { %v5062_v14 = vpop.f32.mrf.mxu0 }
 0x2cf   : > { %v3853_v59 = vadd.f32 %v5062_v14, %v3756_v13  ;;  %5087 = vmatprep.mubr.bf16.mxu1 %v3890_v24  ;;  %v3880_v2 = vmax.f32 %v3842_v17, 0.0 }
 0x2d0   : > { %v3844_v30 = vpop.f32.mrf.mxu0  ;;  %5088 = vmatmul.mubr.bf16.gmra.mxu1 %v3891_v7 }
 0x2d1   : > { %v3883_v20 = vmax.f32 %v3853_v59, 0.0  ;;  %v3845_v58 = vadd.f32 %v3844_v30, %v3748_v49 }
 0x2d2   : > { %v5065_v33 = vpop.f32.mrf.mxu0 }
 0x2d3   : > { %v3893_v12 = vpack.c.bf16 %v3883_v20, %v3882_v11  ;;  %v3881_v42 = vmax.f32 %v3845_v58, 0.0  ;;  %v3866_v16 = vadd.f32 %v5065_v33, %v3769_v45 }
 0x2d4   : > { %v3857_v34 = vpop.f32.mrf.mxu0 }
 0x2d5   : > { %v3892_v50 = vpack.c.bf16 %v3881_v42, %v3880_v2  ;;  %v3858_v22 = vadd.f32 %v3857_v34, %v3761_v38  ;;  %v3886_v57 = vmax.f32 %v3866_v16, 0.0 }
 0x2d6   : > { %v5066_v25 = vpop.f32.mrf.mxu0 }
 0x2d7   : > { %v3869_v53 = vadd.f32 %v5066_v25, %v3772_v21  ;;  %5091 = vmatprep.mubr.bf16.mxu1 %v3892_v50  ;;  %v3884_v7 = vmax.f32 %v3858_v22, 0.0 }
 0x2d8   : > { %v3860_v60 = vpop.f32.mrf.mxu0  ;;  %5092 = vmatmul.mubr.bf16.gmra.mxu1 %v3893_v12 }
 0x2d9   : > { %v3887_v41 = vmax.f32 %v3869_v53, 0.0  ;;  %v3861_v10 = vadd.f32 %v3860_v60, %v3764_v54 }
 0x2da   : > { %v5103_v32 = vpop.f32.mrf.mxu0 }
 0x2db   : > { %v3895_v19 = vpack.c.bf16 %v3887_v41, %v3886_v57  ;;  %v3885_v37 = vmax.f32 %v3861_v10, 0.0  ;;  %v4198_v36 = vadd.f32 %v5103_v32, %v6624_v18 }
 0x2dc   : > { %v4189_v8 = vpop.f32.mrf.mxu0 }
 0x2dd   : > { %v3894_v39 = vpack.c.bf16 %v3885_v37, %v3884_v7  ;;  %v4190_v24 = vadd.f32 %v6624_v18, %v4189_v8 }
 0x2de   : > { %v5104_v5 = vpop.f32.mrf.mxu0 }
 0x2df   : > { %5095 = vmatprep.mubr.bf16.mxu1 %v3894_v39  ;;  %v4201_v3 = vadd.f32 %v5104_v5, %v6624_v18 }
 0x2e0   : > { %5096 = vmatmul.mubr.bf16.gmra.mxu1 %v3895_v19  ;;  %v4192_v35 = vpop.f32.mrf.mxu0 }
 0x2e1   : > { %5113 = vmatprep.mubr.msk.bf16.mxu1 %vm495_vm2, %v5397_v40  ;;  %v4193_v44 = vadd.f32 %v6624_v18, %v4192_v35 }
 0x2e2   : > { %v5107_v28 = vpop.f32.mrf.mxu0 }
 0x2e3   : > { %v4214_v52 = vadd.f32 %v5107_v28, %v6624_v18 }
 0x2e4   : > { %v4205_v55 = vpop.f32.mrf.mxu0 }
 0x2e5   : > { %v4206_v58 = vadd.f32 %v6624_v18, %v4205_v55 }
 0x2e6   : > { %v5108_v4 = vpop.f32.mrf.mxu0 }
 0x2e7   : > { %v4217_v33 = vadd.f32 %v5108_v4, %v6624_v18 }
 0x2e8   : > { %5114 = vmatmul.mubr.msk.bf16.vlgmr.msra.gmra.mxu1 %vm495_vm2, %v5398_v29  ;;  %v4208_v13 = vpop.f32.mrf.mxu0 }
 0x2e9   : > { %v4209_v31 = vadd.f32 %v6624_v18, %v4208_v13 }
 0x2f7   : > { %v5111_v17 = vpop.f32.mrf.mxu0 }
 0x2f8   : > { %v4230_v25 = vadd.f32 %v5111_v17, %v6624_v18 }
 0x2f9   : > { %v4221_v27 = vpop.f32.mrf.mxu0 }
 0x2fa   : > { %v4222_v57 = vadd.f32 %v6624_v18, %v4221_v27 }
 0x2fb   : > { %v5112_v50 = vpop.f32.mrf.mxu0 }
 0x2fc   : > { %v4233_v39 = vadd.f32 %v5112_v50, %v6624_v18 }
 0x2fd   : > { %v4224_v10 = vpop.f32.mrf.mxu0 }
 0x2fe   : > { %v4225_v5 = vadd.f32 %v6624_v18, %v4224_v10 }
 0x388   : > { %v5085_v23 = vpop.f32.mrf.mxu1 }
 0x389   : > { %v4010_v63 = vadd.f32 %v5085_v23, %v6629_v26 }
 0x38a   : > { %v4001_v1 = vpop.f32.mrf.mxu1 }
 0x38b   : > { %v4254_v46 = vadd.f32 %v4198_v36, %v4010_v63  ;;  %v4002_v51 = vadd.f32 %v6629_v26, %v4001_v1 }
 0x38c   : > { %v5086_v61 = vpop.f32.mrf.mxu1 }
 0x38d   : > { %v4270_v14 = vmax.f32 %v4254_v46, 0.0  ;;  %v4252_v49 = vadd.f32 %v4190_v24, %v4002_v51  ;;  %v4013_v48 = vadd.f32 %v5086_v61, %v6629_v26 }
 0x38e   : > { %v4004_v9 = vpop.f32.mrf.mxu1 }
 0x38f   : > { %4287 = vst.msk [vmem:[%s6641_s28 + $0x10] sm:$0xff] %vm4284_vm1, %v4270_v14  ;;  %v4268_v59 = vmax.f32 %v4252_v49, 0.0  ;;  %v4255_v0 = vadd.f32 %v4201_v3, %v4013_v48  ;;  %v4005_v62 = vadd.f32 %v6629_v26, %v4004_v9 }
 0x390   : > { %v5089_v30 = vpop.f32.mrf.mxu1 }
 0x391   : > { %4285 = vst.msk [vmem:[%s6641_s28] sm:$0xff] %vm4284_vm1, %v4268_v59  ;;  %v4271_v56 = vmax.f32 %v4255_v0, 0.0  ;;  %v4253_v11 = vadd.f32 %v4193_v44, %v4005_v62  ;;  %v4026_v20 = vadd.f32 %v5089_v30, %v6629_v26 }
 0x392   : > { %v4017_v47 = vpop.f32.mrf.mxu1 }
 0x393   : > { %4288 = vst.msk [vmem:[%s6641_s28 + $0x18] sm:$0xff] %vm4284_vm1, %v4271_v56  ;;  %v4269_v15 = vmax.f32 %v4253_v11, 0.0  ;;  %v4258_v6 = vadd.f32 %v4214_v52, %v4026_v20  ;;  %v4018_v43 = vadd.f32 %v6629_v26, %v4017_v47 }
 0x394   : > { %v5090_v2 = vpop.f32.mrf.mxu1 }
 0x395   : > { %4286 = vst.msk [vmem:[%s6641_s28 + $0x8] sm:$0xff] %vm4284_vm1, %v4269_v15  ;;  %v4274_v12 = vmax.f32 %v4258_v6, 0.0  ;;  %v4256_v42 = vadd.f32 %v4206_v58, %v4018_v43  ;;  %v4029_v45 = vadd.f32 %v5090_v2, %v6629_v26 }
 0x396   : > { %v4020_v34 = vpop.f32.mrf.mxu1 }
 0x397   : > { %4291 = vst.msk [vmem:[%s6641_s28 + $0x30] sm:$0xff] %vm4284_vm1, %v4274_v12  ;;  %v4272_v16 = vmax.f32 %v4256_v42, 0.0  ;;  %v4259_v38 = vadd.f32 %v4217_v33, %v4029_v45  ;;  %v4021_v21 = vadd.f32 %v6629_v26, %v4020_v34 }
 0x398   : > { %v5093_v22 = vpop.f32.mrf.mxu1 }
 0x399   : > { %4289 = vst.msk [vmem:[%s6641_s28 + $0x20] sm:$0xff] %vm4284_vm1, %v4272_v16  ;;  %v4275_v53 = vmax.f32 %v4259_v38, 0.0  ;;  %v4257_v54 = vadd.f32 %v4209_v31, %v4021_v21  ;;  %v4042_v60 = vadd.f32 %v5093_v22, %v6629_v26 }
 0x39a   : > { %v4033_v41 = vpop.f32.mrf.mxu1 }
 0x39b   : > { %4292 = vst.msk [vmem:[%s6641_s28 + $0x38] sm:$0xff] %vm4284_vm1, %v4275_v53  ;;  %v4273_v7 = vmax.f32 %v4257_v54, 0.0  ;;  %v4262_v19 = vadd.f32 %v4230_v25, %v4042_v60  ;;  %v4034_v37 = vadd.f32 %v6629_v26, %v4033_v41 }
 0x39c   : > { %v5094_v40 = vpop.f32.mrf.mxu1 }
 0x39d   : > { %4290 = vst.msk [vmem:[%s6641_s28 + $0x28] sm:$0xff] %vm4284_vm1, %v4273_v7  ;;  %v4278_v29 = vmax.f32 %v4262_v19, 0.0  ;;  %v4260_v32 = vadd.f32 %v4222_v57, %v4034_v37  ;;  %v4045_v8 = vadd.f32 %v5094_v40, %v6629_v26 }
 0x39e   : > { %v4036_v35 = vpop.f32.mrf.mxu1 }
 0x39f   : > { %4295 = vst.msk [vmem:[%s6641_s28 + $0x50] sm:$0xff] %vm4284_vm1, %v4278_v29  ;;  %v4276_v28 = vmax.f32 %v4260_v32, 0.0  ;;  %v4263_v55 = vadd.f32 %v4233_v39, %v4045_v8  ;;  %v4037_v4 = vadd.f32 %v6629_v26, %v4036_v35 }
 0x3a0   : > { %v5097_v36 = vpop.f32.mrf.mxu1 }
 0x3a1   : > { %4293 = vst.msk [vmem:[%s6641_s28 + $0x40] sm:$0xff] %vm4284_vm1, %v4276_v28  ;;  %v4279_v23 = vmax.f32 %v4263_v55, 0.0  ;;  %v4261_v63 = vadd.f32 %v4225_v5, %v4037_v4  ;;  %v4058_v3 = vadd.f32 %v5097_v36, %v6629_v26 }
 0x3a2   : > { %v4049_v24 = vpop.f32.mrf.mxu1 }
 0x3a3   : > { %4296 = vst.msk [vmem:[%s6641_s28 + $0x58] sm:$0xff] %vm4284_vm1, %v4279_v23  ;;  %v4277_v1 = vmax.f32 %v4261_v63, 0.0  ;;  %v4050_v49 = vadd.f32 %v6629_v26, %v4049_v24 }
 0x3a4   : > { %v5098_v13 = vpop.f32.mrf.mxu1 }
 0x3a5   : > { %4294 = vst.msk [vmem:[%s6641_s28 + $0x48] sm:$0xff] %vm4284_vm1, %v4277_v1  ;;  %v4061_v17 = vadd.f32 %v5098_v13, %v6629_v26 }
 0x3a6   : > { %v4052_v46 = vpop.f32.mrf.mxu1 }
 0x3a7   : > { %v4053_v30 = vadd.f32 %v6629_v26, %v4052_v46 }
 0x3a8   : > { %v5115_v51 = vpop.f32.mrf.mxu1 }
 0x3a9   : > { %v4246_v61 = vadd.f32 %v5115_v51, %v6624_v18 }
 0x3aa   : > { %v4237_v14 = vpop.f32.mrf.mxu1 }
 0x3ab   : > { %v4266_v48 = vadd.f32 %v4246_v61, %v4058_v3  ;;  %v4238_v44 = vadd.f32 %v6624_v18, %v4237_v14 }
 0x3ac   : > { %v5116_v9 = vpop.f32.mrf.mxu1 }
 0x3ad   : > { %v4282_v59 = vmax.f32 %v4266_v48, 0.0  ;;  %v4264_v0 = vadd.f32 %v4238_v44, %v4050_v49  ;;  %v4249_v62 = vadd.f32 %v5116_v9, %v6624_v18 }
 0x3ae   : > { %v4240_v52 = vpop.f32.mrf.mxu1 }
 0x3af   : > { %4299 = vst.msk [vmem:[%s6641_s28 + $0x70] sm:$0xff] %vm4284_vm1, %v4282_v59  ;;  %v4280_v56 = vmax.f32 %v4264_v0, 0.0  ;;  %v4267_v11 = vadd.f32 %v4249_v62, %v4061_v17  ;;  %v4241_v20 = vadd.f32 %v6624_v18, %v4240_v52 }
 0x3b1   : > { %4297 = vst.msk [vmem:[%s6641_s28 + $0x60] sm:$0xff] %vm4284_vm1, %v4280_v56  ;;  %v4283_v58 = vmax.f32 %v4267_v11, 0.0  ;;  %v4265_v47 = vadd.f32 %v4241_v20, %v4053_v30 }
 0x3b3   : > { %4300 = vst.msk [vmem:[%s6641_s28 + $0x78] sm:$0xff] %vm4284_vm1, %v4283_v58  ;;  %v4281_v26 = vmax.f32 %v4265_v47, 0.0 }
 0x3b5   : > { %4298 = vst.msk [vmem:[%s6641_s28 + $0x68] sm:$0xff] %vm4284_vm1, %v4281_v26 }
 0x3b6   : > { %5450 = shalt.err (!%p5447_p11)
}
 0x3b7   : > { %s5451_s21 = scalar_lea.hbm %s6702_s22, 2048  ;;  %s5455_s12 = scalar_lea.hbm %s6772_s9, 8192 }
 0x3b8   : > { %p5452_p13 = scmp.ne.s32.totalorder %s6702_s22, %s5451_s21  ;;  %p5456_p0 = scmp.lt.s32.totalorder %s6702_s22, %s6772_s9 }
 0x3b9   : > { %p5457_p1 = scmp.lt.s32.totalorder %s5455_s12, %s5451_s21 }
 0x3ba   : > { %p5453_p10 = pnand %p5452_p13, %p5645_p3 }
 0x3bb   : > { %p5458_p2 = por %p5457_p1, %p5456_p0 }
 0x3bc   : > { %p5454_p12 = pneg %p5453_p10 }
 0x3be   : > { %p5459_p4 = pnand %p5458_p2, %p5454_p12 }
 0x3c0   : > { %5462 = shalt.err (!%p5459_p4)
}
 0x3c1   : > { %s5541_s20 = smov 128   ;;  %s5542_s3 = smov 8  }
 0x3c2   : > { %5126 = dma.vmem_to_hbm [thread:$0]  (%p5645_p3), %s6704_s13, 2048, %s6702_s22, %s6712_s26, %s5541_s20, %s5541_s20, %s5542_s3  }
 0x3c3 PF: > { %p5138_p5 = scmp.ge.s32.totalorder %s5533_s16, 2  ;;  %s4333_s19 = sand.u32 1, %s5505_s30  }
 0x3c4   : > { %s4334_s25 = scalar_lea.sflag [#allocation6], %s4333_s19 }
 0x3c5   : > { %p5133_p6 = pnand %p5138_p5, %p5654_p8 }
 0x3c7   : > { %p5134_p7 = pneg %p5133_p6 }
 0x3c9   : > { %5500 = dma.done.wait (%p5134_p7), %s4334_s25, 2048  }
 0x3ca   : > { %5502 = vsyncadd (%p5134_p7), %s4334_s25, 4294965248  ;;  %s23_s16 = sadd.s32 1, %s5533_s16   ;;  %s6847_s23 = sld [smem:[#allocation10_spill]] }
 0x3cb   : > { %p20_p9 = scmp.ge.s32.totalorder %s23_s16, 6   ;;  %s6848_s22 = sld [smem:[#allocation11_spill]] }
 0x3cc   : > { %s6849_s30 = smov %s5509_s10  ;;  %s6850_s10 = smov %s5513_s11 }
 0x3cd   : > { %s6851_s11 = smov %s5672_s29  ;;  %s6852_s12 = smov %s5525_s14 }
 0x3ce   : > { %s6853_s13 = smov %s5529_s15  ;;  %22 = sbr.rel (!%p20_p9) target bundleno = 8 (0x8), region = 102 }
 0x3d0   : > { %s6854_s14 = smov %s6847_s23 }
 0x3d1   : > { %s6855_s15 = smov %s6848_s22 }
 0x3d3   :  { %4339 = vsyncpa [#allocation5], 1 }
 0x3d4   :  { %4341 = vsyncpa [#allocation5 + $0x1], 1 }
 0x3d5   :  { %4342 = vsyncpa [#allocation6], 1 }
 0x3d6   :  { %4344 = vsyncpa [#allocation6 + $0x1], 1 }

</bundles_post_ra>
